<compile_context>
chip_gen: v5e
topology: v5e:2x2
jax: 0.10.0
libtpu: 0.0.40
codegen_flags: <defaults>
</compile_context>

<pallas_src>
import functools

import jax
import jax.numpy as jnp
from jax.experimental import pallas as pl
from jax.experimental.pallas import tpu as pltpu

EPS = 1e-5


def _round_up(x, m):
    return -(-x // m) * m


def _pick_bm(m):
    # Row-tile size: largest candidate (all multiples of 16, so valid for both
    # f32 and bf16 blocks) dividing m; else a single full-extent block.
    for d in (512, 256, 128, 64, 32, 16):
        if m % d == 0:
            return d
    return m


# ----------------------------------------------------------------------------
# Pallas kernels
# ----------------------------------------------------------------------------
def _mm_kernel(*refs, pre_act, has_res, has_post2, relu):
    """out = [s2*(.)+t2]( maybe_relu( (A')@B * scale + shift [+ res] ) ),
       A' = relu(A*pre_s + pre_t) if pre_act else A."""
    it = iter(refs)
    a_ref = next(it)
    b_ref = next(it)
    scale_ref = next(it)
    shift_ref = next(it)
    if pre_act:
        ps_ref = next(it)
        pt_ref = next(it)
    if has_res:
        res_ref = next(it)
    if has_post2:
        s2_ref = next(it)
        t2_ref = next(it)
    o_ref = next(it)

    a = a_ref[...]
    if pre_act:
        # fused pre-activation BN + ReLU (f32 VPU math), then narrow for MXU.
        a = jnp.maximum(a * ps_ref[...] + pt_ref[...], 0.0)
    acc = jnp.dot(a.astype(jnp.bfloat16), b_ref[...],
                  preferred_element_type=jnp.float32)
    y = acc * scale_ref[...] + shift_ref[...]          # conv bias folded in
    if has_res:
        y = y + res_ref[...].astype(jnp.float32)
    if relu:
        y = jnp.maximum(y, 0.0)
    if has_post2:
        y = y * s2_ref[...] + t2_ref[...]
    o_ref[...] = y.astype(o_ref.dtype)


def _maxpool_kernel(x_ref, o_ref):
    # x_ref: (bm, 2, W2, 2*C)  ->  o_ref: (bm, W2, C)    (2x2 max, stride 2)
    v = x_ref[...]
    m = jnp.maximum(v[:, 0], v[:, 1])                  # reduce the H pair
    c = o_ref.shape[-1]
    o_ref[...] = jnp.maximum(m[..., :c], m[..., c:])   # reduce the W pair


# ----------------------------------------------------------------------------
# Pallas call wrappers
# ----------------------------------------------------------------------------
def matmul_fused(a, b, scale, shift, *, pre=None, res=None, post2=None,
                 relu=False, out_dtype=jnp.float32):
    m, k = a.shape
    _, nc = b.shape

    mp = _round_up(m, 8)
    if mp != m:                       # rare ragged edge: pad rows only
        a = jnp.pad(a, ((0, mp - m), (0, 0)))
        if res is not None:
            res = jnp.pad(res, ((0, mp - m), (0, 0)))
    bm = _pick_bm(mp)

    operands = [a, b, scale, shift]
    in_specs = [
        pl.BlockSpec((bm, k), lambda i: (i, 0)),
        pl.BlockSpec((k, nc), lambda i: (0, 0)),
        pl.BlockSpec((1, nc), lambda i: (0, 0)),
        pl.BlockSpec((1, nc), lambda i: (0, 0)),
    ]
    if pre is not None:
        operands += [pre[0], pre[1]]
        in_specs += [pl.BlockSpec((1, k), lambda i: (0, 0)),
                     pl.BlockSpec((1, k), lambda i: (0, 0))]
    if res is not None:
        operands.append(res)
        in_specs.append(pl.BlockSpec((bm, nc), lambda i: (i, 0)))
    if post2 is not None:
        operands += [post2[0], post2[1]]
        in_specs += [pl.BlockSpec((1, nc), lambda i: (0, 0)),
                     pl.BlockSpec((1, nc), lambda i: (0, 0))]

    kernel = functools.partial(_mm_kernel, pre_act=pre is not None,
                               has_res=res is not None,
                               has_post2=post2 is not None, relu=relu)
    out = pl.pallas_call(
        kernel,
        out_shape=jax.ShapeDtypeStruct((mp, nc), out_dtype),
        grid=(mp // bm,),
        in_specs=in_specs,
        out_specs=pl.BlockSpec((bm, nc), lambda i: (i, 0)),
        # No explicit vmem_limit_bytes: per-step footprint is tiny and the
        # default scoped limit is valid on v5e/v6e/v7x (v7x has only 64 MiB).
        compiler_params=pltpu.CompilerParams(
            dimension_semantics=("parallel",)),
    )(*operands)
    if mp != m:
        out = out[:m]
    return out


def maxpool2x2(x):
    # x: NHWC, kernel 2, stride 2 (H, W even)
    n, h, w, c = x.shape
    h2, w2 = h // 2, w // 2
    xr = x.reshape(n * h2, 2, w2, 2 * c)      # free reshape of the NHWC buffer
    rows = n * h2
    bm = _pick_bm(rows)
    out = pl.pallas_call(
        _maxpool_kernel,
        out_shape=jax.ShapeDtypeStruct((rows, w2, c), x.dtype),
        grid=(rows // bm,),
        in_specs=[pl.BlockSpec((bm, 2, w2, 2 * c), lambda i: (i, 0, 0, 0))],
        out_specs=pl.BlockSpec((bm, w2, c), lambda i: (i, 0, 0)),
        compiler_params=pltpu.CompilerParams(
            dimension_semantics=("parallel",)),
    )(xr)
    return out.reshape(n, h2, w2, c)


# ----------------------------------------------------------------------------
# conv / conv-transpose glue (im2col in plain JAX, matmul in Pallas)
# ----------------------------------------------------------------------------
def im2col(x, kh, kw, stride, pad):
    n, h, w, c = x.shape
    if kh == 1 and kw == 1 and stride == 1 and pad == 0:
        return x.reshape(n * h * w, c), (n, h, w)
    xp = jnp.pad(x, ((0, 0), (pad, pad), (pad, pad), (0, 0)))
    ho = (h + 2 * pad - kh) // stride + 1
    wo = (w + 2 * pad - kw) // stride + 1
    cols = []
    for i in range(kh):
        for j in range(kw):
            cols.append(xp[:, i:i + stride * (ho - 1) + 1:stride,
                            j:j + stride * (wo - 1) + 1:stride, :])
    patches = jnp.stack(cols, axis=3)                  # (N, Ho, Wo, kh*kw, C)
    return patches.reshape(n * ho * wo, kh * kw * c), (n, ho, wo)


def conv2d(x, w, b, stride=1, pad=0, pre=None, post=None, res=None,
           relu=False, post2=None, out_dtype=jnp.float32):
    # x: NHWC, w: (Cout, Cin, kh, kw) [PyTorch layout], b: (Cout,)
    cout, cin, kh, kw = w.shape
    if pre is not None:
        assert kh == 1 and kw == 1          # pre-act fusion only for 1x1 convs
    cols, (n, ho, wo) = im2col(x, kh, kw, stride, pad)
    if pre is None and cols.dtype != jnp.bfloat16:
        if kh * kw > 1:                     # halve HBM for the im2col slab
            cols = cols.astype(jnp.bfloat16)
    wmat = jnp.transpose(w, (2, 3, 1, 0)).reshape(kh * kw * cin, cout)
    wmat = wmat.astype(jnp.bfloat16)
    bias = b.reshape(1, cout).astype(jnp.float32)
    if post is None:
        scale = jnp.ones((1, cout), jnp.float32)
        shift = bias
    else:
        s, t = post
        scale = s
        shift = bias * s + t                # fold conv bias into BN shift
    out = matmul_fused(cols, wmat, scale, shift, pre=pre, res=res, relu=relu,
                       post2=post2, out_dtype=out_dtype)
    return out.reshape(n, ho, wo, cout)


def conv_transpose2d(x, w, b, stride=2, pad=1, post=None, relu=False,
                     post2=None, out_dtype=jnp.float32):
    # w: (Cin, Cout, kh, kw) [PyTorch ConvTranspose2d layout]
    cin, cout, kh, kw = w.shape
    assert kh == 4 and kw == 4 and stride == 2 and pad == 1
    n, h, wd, _ = x.shape
    xp = jnp.pad(x, ((0, 0), (1, 1), (1, 1), (0, 0)))
    rows = []
    for p in range(2):
        cols_ = []
        for q in range(2):
            # phase (p,q) effective 2x2 kernel: taps w[ci,co,3-p-2a,3-q-2b]
            w_sub = w[:, :, 3 - p::-2, 3 - q::-2]          # (Cin,Cout,2,2)
            w_eff = jnp.transpose(w_sub, (1, 0, 2, 3))     # (Cout,Cin,2,2)
            xs = xp[:, p:p + h + 1, q:q + wd + 1, :]
            ph = conv2d(xs, w_eff, b, stride=1, pad=0, post=post, relu=relu,
                        post2=post2, out_dtype=out_dtype)  # (N,H,W,Cout)
            cols_.append(ph)
        rows.append(jnp.stack(cols_, axis=3))              # (N,H,W,2,Cout)
    y = jnp.stack(rows, axis=2)                            # (N,H,2,W,2,Cout)
    return y.reshape(n, 2 * h, 2 * wd, cout)


def bn_fold(gamma, beta, mean, var):
    s = gamma / jnp.sqrt(var + EPS)
    t = beta - mean * s
    return s.reshape(1, -1), t.reshape(1, -1)


# ----------------------------------------------------------------------------
# Net definition (pre-activation Bottleneck, expansion = 2)
# ----------------------------------------------------------------------------
def bottleneck(x, p):
    s1, t1 = p['bn1']
    s2, t2 = p['bn2']
    s3, t3 = p['bn3']
    out_c = p['conv3'][0].shape[0]
    # conv1 (1x1): fused pre-act bn1+relu, fused post bn2+relu, bf16 output.
    o = conv2d(x, *p['conv1'], pre=(s1, t1), post=(s2, t2), relu=True,
               out_dtype=jnp.bfloat16)
    # conv2 (3x3): fused post bn3+relu, bf16 output.
    o = conv2d(o, *p['conv2'], stride=1, pad=1, post=(s3, t3), relu=True,
               out_dtype=jnp.bfloat16)
    # residual branch on the raw block input.
    if 'down' in p:
        res = conv2d(x, *p['down'])                        # 1x1 downsample
    else:
        res = x
    res_flat = res.reshape(-1, out_c)
    # conv3 (1x1): bias + residual fused into the epilogue, f32 output.
    return conv2d(o, *p['conv3'], res=res_flat)


def net_forward(params, x_nchw):
    x = jnp.transpose(x_nchw, (0, 2, 3, 1)).astype(jnp.float32)  # NCHW -> NHWC
    prea = conv2d(x, *params['conv1'], stride=2, pad=3)  # 7x7/s2 (no relu here)
    prea = bottleneck(prea, params['layer1'])
    prea = maxpool2x2(prea)
    prea = bottleneck(prea, params['layer2'])
    prea = bottleneck(prea, params['layer3'])
    d1 = conv_transpose2d(prea, params['deconv1_w'], params['deconv1_b'],
                          post=params['bn1'], relu=True,
                          out_dtype=jnp.bfloat16)
    # conv_final (1x1, 1->1 channel) fused as a second affine into deconv2.
    wf, bf = params['conv_final']
    post2 = (wf.reshape(1, 1).astype(jnp.float32),
             bf.reshape(1, 1).astype(jnp.float32))
    d2 = conv_transpose2d(d1, params['deconv2_w'], params['deconv2_b'],
                          post=params['bn2'], relu=True, post2=post2)
    return jnp.transpose(d2, (0, 3, 1, 2))               # NHWC -> NCHW


# ----------------------------------------------------------------------------
# deterministic synthetic parameter init
# ----------------------------------------------------------------------------
def init_params(key):
    ks = iter(jax.random.split(key, 128))

    def conv_p(cout, cin, kh, kw):
        w = jax.random.normal(next(ks), (cout, cin, kh, kw), jnp.float32) * 0.05
        b = jax.random.normal(next(ks), (cout,), jnp.float32) * 0.05
        return w, b

    def bn_p(c):
        gamma = 1.0 + 0.1 * jax.random.normal(next(ks), (c,), jnp.float32)
        beta = 0.1 * jax.random.normal(next(ks), (c,), jnp.float32)
        mean = 0.1 * jax.random.normal(next(ks), (c,), jnp.float32)
        var = 1.0 + 0.1 * jax.random.uniform(next(ks), (c,), jnp.float32)
        return bn_fold(gamma, beta, mean, var)

    def bottleneck_p(inplanes, planes, downsample):
        p = {
            'bn1': bn_p(inplanes),
            'conv1': conv_p(planes, inplanes, 1, 1),
            'bn2': bn_p(planes),
            'conv2': conv_p(planes, planes, 3, 3),
            'bn3': bn_p(planes),
            'conv3': conv_p(2 * planes, planes, 1, 1),
        }
        if downsample:
            p['down'] = conv_p(2 * planes, inplanes, 1, 1)
        return p

    params = {
        'conv1': conv_p(64, 1, 7, 7),
        'layer1': bottleneck_p(64, 64, True),       # 64  -> 128
        'layer2': bottleneck_p(128, 128, True),     # 128 -> 256
        'layer3': bottleneck_p(256, 128, False),    # 256 -> 256
        'deconv1_w': jax.random.normal(next(ks), (256, 128, 4, 4), jnp.float32) * 0.05,
        'deconv1_b': jax.random.normal(next(ks), (128,), jnp.float32) * 0.05,
        'bn1': bn_p(128),
        'deconv2_w': jax.random.normal(next(ks), (128, 1, 4, 4), jnp.float32) * 0.05,
        'deconv2_b': jax.random.normal(next(ks), (1,), jnp.float32) * 0.05,
        'bn2': bn_p(1),
        'conv_final': conv_p(1, 1, 1, 1),
    }
    return params


if __name__ == "__main__":
    key = jax.random.PRNGKey(0)
    pkey, xkey = jax.random.split(key)
    params = init_params(pkey)
    x = jax.random.normal(xkey, (2, 1, 16, 16), jnp.float32)  # NCHW, 1 channel
    out = jax.jit(net_forward)(params, x)
    out = jax.block_until_ready(out)
    assert out.shape == (2, 1, 16, 16), out.shape
    assert jnp.all(jnp.isfinite(out))
    print("KERNEL_OK")
</pallas_src>

<mosaic_0001>
module attributes {stable_mosaic.version = 11 : i64} {
  func.func @_mm_kernel(%arg0: i32, %arg1: memref<128x49xbf16, #tpu.memory_space<vmem>>, %arg2: memref<49x64xbf16, #tpu.memory_space<vmem>>, %arg3: memref<1x64xf32, #tpu.memory_space<vmem>>, %arg4: memref<1x64xf32, #tpu.memory_space<vmem>>, %arg5: memref<128x64xf32, #tpu.memory_space<vmem>>) attributes {dimension_semantics = [#tpu.dimension_semantics<parallel>], iteration_bounds = array<i64: 1>, scalar_prefetch = 0 : i64, scratch_operands = 0 : i64, tpu.core_type = #tpu.core_type<tc>, window_params = [{transform_indices = @transform_0, window_bounds = array<i64: 128, 49>}, {pipeline_mode = #tpu.pipeline_mode<synchronous>, transform_indices = @transform_1, window_bounds = array<i64: 49, 64>}, {pipeline_mode = #tpu.pipeline_mode<synchronous>, transform_indices = @transform_2, window_bounds = array<i64: 1, 64>}, {pipeline_mode = #tpu.pipeline_mode<synchronous>, transform_indices = @transform_3, window_bounds = array<i64: 1, 64>}, {transform_indices = @transform_4, window_bounds = array<i64: 128, 64>}]} {
    %c0 = arith.constant 0 : index
    %c0_0 = arith.constant 0 : index
    %0 = vector.load %arg1[%c0, %c0_0] : memref<128x49xbf16, #tpu.memory_space<vmem>>, vector<128x49xbf16>
    %c0_1 = arith.constant 0 : index
    %c0_2 = arith.constant 0 : index
    %1 = vector.load %arg2[%c0_1, %c0_2] : memref<49x64xbf16, #tpu.memory_space<vmem>>, vector<49x64xbf16>
    %cst = arith.constant dense<0.000000e+00> : vector<128x64xf32>
    %2 = tpu.matmul %0, %1, %cst {dimension_numbers = #tpu.dot_dimension_numbers<[1], [0], [0], [1], [0, 0, 1, 1], [], []>} : vector<128x49xbf16>, vector<49x64xbf16>, vector<128x64xf32> -> vector<128x64xf32>
    %c0_3 = arith.constant 0 : index
    %c0_4 = arith.constant 0 : index
    %3 = vector.load %arg3[%c0_3, %c0_4] : memref<1x64xf32, #tpu.memory_space<vmem>>, vector<1x64xf32>
    %4 = vector.broadcast %3 : vector<1x64xf32> to vector<128x64xf32>
    %5 = arith.mulf %2, %4 : vector<128x64xf32>
    %c0_5 = arith.constant 0 : index
    %c0_6 = arith.constant 0 : index
    %6 = vector.load %arg4[%c0_5, %c0_6] : memref<1x64xf32, #tpu.memory_space<vmem>>, vector<1x64xf32>
    %7 = vector.broadcast %6 : vector<1x64xf32> to vector<128x64xf32>
    %8 = arith.addf %5, %7 : vector<128x64xf32>
    %c0_7 = arith.constant 0 : index
    %c0_8 = arith.constant 0 : index
    %9 = vector.load %arg5[%c0_7, %c0_8] : memref<128x64xf32, #tpu.memory_space<vmem>>, vector<128x64xf32>
    tpu.vector_store %arg5[%c0_7, %c0_8], %8 {strides = array<i32>} : memref<128x64xf32, #tpu.memory_space<vmem>>, vector<128x64xf32>,
    return
  }
  func.func @transform_0(%arg0: i32) -> (i32, i32) {
    %c0_i32 = arith.constant 0 : i32
    %c0_i32_0 = arith.constant 0 : i32
    return %arg0, %c0_i32 : i32, i32
  }
  func.func @transform_1(%arg0: i32) -> (i32, i32) {
    %c0_i32 = arith.constant 0 : i32
    %c0_i32_0 = arith.constant 0 : i32
    %c0_i32_1 = arith.constant 0 : i32
    return %c0_i32, %c0_i32_0 : i32, i32
  }
  func.func @transform_2(%arg0: i32) -> (i32, i32) {
    %c0_i32 = arith.constant 0 : i32
    %c0_i32_0 = arith.constant 0 : i32
    %c0_i32_1 = arith.constant 0 : i32
    return %c0_i32, %c0_i32_0 : i32, i32
  }
  func.func @transform_3(%arg0: i32) -> (i32, i32) {
    %c0_i32 = arith.constant 0 : i32
    %c0_i32_0 = arith.constant 0 : i32
    %c0_i32_1 = arith.constant 0 : i32
    return %c0_i32, %c0_i32_0 : i32, i32
  }
  func.func @transform_4(%arg0: i32) -> (i32, i32) {
    %c0_i32 = arith.constant 0 : i32
    %c0_i32_0 = arith.constant 0 : i32
    return %arg0, %c0_i32 : i32, i32
  }
}

module attributes {stable_mosaic.version = 11 : i64} {
  func.func @_mm_kernel(%arg0: i32, %arg1: memref<128x64xf32, #tpu.memory_space<vmem>>, %arg2: memref<64x64xbf16, #tpu.memory_space<vmem>>, %arg3: memref<1x64xf32, #tpu.memory_space<vmem>>, %arg4: memref<1x64xf32, #tpu.memory_space<vmem>>, %arg5: memref<1x64xf32, #tpu.memory_space<vmem>>, %arg6: memref<1x64xf32, #tpu.memory_space<vmem>>, %arg7: memref<128x64xbf16, #tpu.memory_space<vmem>>) attributes {dimension_semantics = [#tpu.dimension_semantics<parallel>], iteration_bounds = array<i64: 1>, scalar_prefetch = 0 : i64, scratch_operands = 0 : i64, tpu.core_type = #tpu.core_type<tc>, window_params = [{transform_indices = @transform_0, window_bounds = array<i64: 128, 64>}, {pipeline_mode = #tpu.pipeline_mode<synchronous>, transform_indices = @transform_1, window_bounds = array<i64: 64, 64>}, {pipeline_mode = #tpu.pipeline_mode<synchronous>, transform_indices = @transform_2, window_bounds = array<i64: 1, 64>}, {pipeline_mode = #tpu.pipeline_mode<synchronous>, transform_indices = @transform_3, window_bounds = array<i64: 1, 64>}, {pipeline_mode = #tpu.pipeline_mode<synchronous>, transform_indices = @transform_4, window_bounds = array<i64: 1, 64>}, {pipeline_mode = #tpu.pipeline_mode<synchronous>, transform_indices = @transform_5, window_bounds = array<i64: 1, 64>}, {transform_indices = @transform_6, window_bounds = array<i64: 128, 64>}]} {
    %c0 = arith.constant 0 : index
    %c0_0 = arith.constant 0 : index
    %0 = vector.load %arg1[%c0, %c0_0] : memref<128x64xf32, #tpu.memory_space<vmem>>, vector<128x64xf32>
    %c0_1 = arith.constant 0 : index
    %c0_2 = arith.constant 0 : index
    %1 = vector.load %arg5[%c0_1, %c0_2] : memref<1x64xf32, #tpu.memory_space<vmem>>, vector<1x64xf32>
    %2 = vector.broadcast %1 : vector<1x64xf32> to vector<128x64xf32>
    %3 = arith.mulf %0, %2 : vector<128x64xf32>
    %c0_3 = arith.constant 0 : index
    %c0_4 = arith.constant 0 : index
    %4 = vector.load %arg6[%c0_3, %c0_4] : memref<1x64xf32, #tpu.memory_space<vmem>>, vector<1x64xf32>
    %5 = vector.broadcast %4 : vector<1x64xf32> to vector<128x64xf32>
    %6 = arith.addf %3, %5 : vector<128x64xf32>
    %cst = arith.constant 0.000000e+00 : f32
    %7 = vector.broadcast %cst : f32 to vector<128x64xf32>
    %8 = arith.maximumf %6, %7 : vector<128x64xf32>
    %9 = arith.truncf %8 : vector<128x64xf32> to vector<128x64xbf16>
    %c0_5 = arith.constant 0 : index
    %c0_6 = arith.constant 0 : index
    %10 = vector.load %arg2[%c0_5, %c0_6] : memref<64x64xbf16, #tpu.memory_space<vmem>>, vector<64x64xbf16>
    %cst_7 = arith.constant dense<0.000000e+00> : vector<128x64xf32>
    %11 = tpu.matmul %9, %10, %cst_7 {dimension_numbers = #tpu.dot_dimension_numbers<[1], [0], [0], [1], [0, 0, 1, 1], [], []>} : vector<128x64xbf16>, vector<64x64xbf16>, vector<128x64xf32> -> vector<128x64xf32>
    %c0_8 = arith.constant 0 : index
    %c0_9 = arith.constant 0 : index
    %12 = vector.load %arg3[%c0_8, %c0_9] : memref<1x64xf32, #tpu.memory_space<vmem>>, vector<1x64xf32>
    %13 = vector.broadcast %12 : vector<1x64xf32> to vector<128x64xf32>
    %14 = arith.mulf %11, %13 : vector<128x64xf32>
    %c0_10 = arith.constant 0 : index
    %c0_11 = arith.constant 0 : index
    %15 = vector.load %arg4[%c0_10, %c0_11] : memref<1x64xf32, #tpu.memory_space<vmem>>, vector<1x64xf32>
    %16 = vector.broadcast %15 : vector<1x64xf32> to vector<128x64xf32>
    %17 = arith.addf %14, %16 : vector<128x64xf32>
    %cst_12 = arith.constant 0.000000e+00 : f32
    %18 = vector.broadcast %cst_12 : f32 to vector<128x64xf32>
    %19 = arith.maximumf %17, %18 : vector<128x64xf32>
    %20 = arith.truncf %19 : vector<128x64xf32> to vector<128x64xbf16>
    %c0_13 = arith.constant 0 : index
    %c0_14 = arith.constant 0 : index
    %21 = vector.load %arg7[%c0_13, %c0_14] : memref<128x64xbf16, #tpu.memory_space<vmem>>, vector<128x64xbf16>
    tpu.vector_store %arg7[%c0_13, %c0_14], %20 {strides = array<i32>} : memref<128x64xbf16, #tpu.memory_space<vmem>>, vector<128x64xbf16>,
    return
  }
  func.func @transform_0(%arg0: i32) -> (i32, i32) {
    %c0_i32 = arith.constant 0 : i32
    %c0_i32_0 = arith.constant 0 : i32
    return %arg0, %c0_i32 : i32, i32
  }
  func.func @transform_1(%arg0: i32) -> (i32, i32) {
    %c0_i32 = arith.constant 0 : i32
    %c0_i32_0 = arith.constant 0 : i32
    %c0_i32_1 = arith.constant 0 : i32
    return %c0_i32, %c0_i32_0 : i32, i32
  }
  func.func @transform_2(%arg0: i32) -> (i32, i32) {
    %c0_i32 = arith.constant 0 : i32
    %c0_i32_0 = arith.constant 0 : i32
    %c0_i32_1 = arith.constant 0 : i32
    return %c0_i32, %c0_i32_0 : i32, i32
  }
  func.func @transform_3(%arg0: i32) -> (i32, i32) {
    %c0_i32 = arith.constant 0 : i32
    %c0_i32_0 = arith.constant 0 : i32
    %c0_i32_1 = arith.constant 0 : i32
    return %c0_i32, %c0_i32_0 : i32, i32
  }
  func.func @transform_4(%arg0: i32) -> (i32, i32) {
    %c0_i32 = arith.constant 0 : i32
    %c0_i32_0 = arith.constant 0 : i32
    %c0_i32_1 = arith.constant 0 : i32
    return %c0_i32, %c0_i32_0 : i32, i32
  }
  func.func @transform_5(%arg0: i32) -> (i32, i32) {
    %c0_i32 = arith.constant 0 : i32
    %c0_i32_0 = arith.constant 0 : i32
    %c0_i32_1 = arith.constant 0 : i32
    return %c0_i32, %c0_i32_0 : i32, i32
  }
  func.func @transform_6(%arg0: i32) -> (i32, i32) {
    %c0_i32 = arith.constant 0 : i32
    %c0_i32_0 = arith.constant 0 : i32
    return %arg0, %c0_i32 : i32, i32
  }
}

module attributes {stable_mosaic.version = 11 : i64} {
  func.func @_mm_kernel(%arg0: i32, %arg1: memref<128x576xbf16, #tpu.memory_space<vmem>>, %arg2: memref<576x64xbf16, #tpu.memory_space<vmem>>, %arg3: memref<1x64xf32, #tpu.memory_space<vmem>>, %arg4: memref<1x64xf32, #tpu.memory_space<vmem>>, %arg5: memref<128x64xbf16, #tpu.memory_space<vmem>>) attributes {dimension_semantics = [#tpu.dimension_semantics<parallel>], iteration_bounds = array<i64: 1>, scalar_prefetch = 0 : i64, scratch_operands = 0 : i64, tpu.core_type = #tpu.core_type<tc>, window_params = [{transform_indices = @transform_0, window_bounds = array<i64: 128, 576>}, {pipeline_mode = #tpu.pipeline_mode<synchronous>, transform_indices = @transform_1, window_bounds = array<i64: 576, 64>}, {pipeline_mode = #tpu.pipeline_mode<synchronous>, transform_indices = @transform_2, window_bounds = array<i64: 1, 64>}, {pipeline_mode = #tpu.pipeline_mode<synchronous>, transform_indices = @transform_3, window_bounds = array<i64: 1, 64>}, {transform_indices = @transform_4, window_bounds = array<i64: 128, 64>}]} {
    %c0 = arith.constant 0 : index
    %c0_0 = arith.constant 0 : index
    %0 = vector.load %arg1[%c0, %c0_0] : memref<128x576xbf16, #tpu.memory_space<vmem>>, vector<128x576xbf16>
    %c0_1 = arith.constant 0 : index
    %c0_2 = arith.constant 0 : index
    %1 = vector.load %arg2[%c0_1, %c0_2] : memref<576x64xbf16, #tpu.memory_space<vmem>>, vector<576x64xbf16>
    %cst = arith.constant dense<0.000000e+00> : vector<128x64xf32>
    %2 = tpu.matmul %0, %1, %cst {dimension_numbers = #tpu.dot_dimension_numbers<[1], [0], [0], [1], [0, 0, 1, 1], [], []>} : vector<128x576xbf16>, vector<576x64xbf16>, vector<128x64xf32> -> vector<128x64xf32>
    %c0_3 = arith.constant 0 : index
    %c0_4 = arith.constant 0 : index
    %3 = vector.load %arg3[%c0_3, %c0_4] : memref<1x64xf32, #tpu.memory_space<vmem>>, vector<1x64xf32>
    %4 = vector.broadcast %3 : vector<1x64xf32> to vector<128x64xf32>
    %5 = arith.mulf %2, %4 : vector<128x64xf32>
    %c0_5 = arith.constant 0 : index
    %c0_6 = arith.constant 0 : index
    %6 = vector.load %arg4[%c0_5, %c0_6] : memref<1x64xf32, #tpu.memory_space<vmem>>, vector<1x64xf32>
    %7 = vector.broadcast %6 : vector<1x64xf32> to vector<128x64xf32>
    %8 = arith.addf %5, %7 : vector<128x64xf32>
    %cst_7 = arith.constant 0.000000e+00 : f32
    %9 = vector.broadcast %cst_7 : f32 to vector<128x64xf32>
    %10 = arith.maximumf %8, %9 : vector<128x64xf32>
    %11 = arith.truncf %10 : vector<128x64xf32> to vector<128x64xbf16>
    %c0_8 = arith.constant 0 : index
    %c0_9 = arith.constant 0 : index
    %12 = vector.load %arg5[%c0_8, %c0_9] : memref<128x64xbf16, #tpu.memory_space<vmem>>, vector<128x64xbf16>
    tpu.vector_store %arg5[%c0_8, %c0_9], %11 {strides = array<i32>} : memref<128x64xbf16, #tpu.memory_space<vmem>>, vector<128x64xbf16>,
    return
  }
  func.func @transform_0(%arg0: i32) -> (i32, i32) {
    %c0_i32 = arith.constant 0 : i32
    %c0_i32_0 = arith.constant 0 : i32
    return %arg0, %c0_i32 : i32, i32
  }
  func.func @transform_1(%arg0: i32) -> (i32, i32) {
    %c0_i32 = arith.constant 0 : i32
    %c0_i32_0 = arith.constant 0 : i32
    %c0_i32_1 = arith.constant 0 : i32
    return %c0_i32, %c0_i32_0 : i32, i32
  }
  func.func @transform_2(%arg0: i32) -> (i32, i32) {
    %c0_i32 = arith.constant 0 : i32
    %c0_i32_0 = arith.constant 0 : i32
    %c0_i32_1 = arith.constant 0 : i32
    return %c0_i32, %c0_i32_0 : i32, i32
  }
  func.func @transform_3(%arg0: i32) -> (i32, i32) {
    %c0_i32 = arith.constant 0 : i32
    %c0_i32_0 = arith.constant 0 : i32
    %c0_i32_1 = arith.constant 0 : i32
    return %c0_i32, %c0_i32_0 : i32, i32
  }
  func.func @transform_4(%arg0: i32) -> (i32, i32) {
    %c0_i32 = arith.constant 0 : i32
    %c0_i32_0 = arith.constant 0 : i32
    return %arg0, %c0_i32 : i32, i32
  }
}

module attributes {stable_mosaic.version = 11 : i64} {
  func.func @_mm_kernel(%arg0: i32, %arg1: memref<128x64xf32, #tpu.memory_space<vmem>>, %arg2: memref<64x128xbf16, #tpu.memory_space<vmem>>, %arg3: memref<1x128xf32, #tpu.memory_space<vmem>>, %arg4: memref<1x128xf32, #tpu.memory_space<vmem>>, %arg5: memref<128x128xf32, #tpu.memory_space<vmem>>) attributes {dimension_semantics = [#tpu.dimension_semantics<parallel>], iteration_bounds = array<i64: 1>, scalar_prefetch = 0 : i64, scratch_operands = 0 : i64, tpu.core_type = #tpu.core_type<tc>, window_params = [{transform_indices = @transform_0, window_bounds = array<i64: 128, 64>}, {pipeline_mode = #tpu.pipeline_mode<synchronous>, transform_indices = @transform_1, window_bounds = array<i64: 64, 128>}, {pipeline_mode = #tpu.pipeline_mode<synchronous>, transform_indices = @transform_2, window_bounds = array<i64: 1, 128>}, {pipeline_mode = #tpu.pipeline_mode<synchronous>, transform_indices = @transform_3, window_bounds = array<i64: 1, 128>}, {transform_indices = @transform_4, window_bounds = array<i64: 128, 128>}]} {
    %c0 = arith.constant 0 : index
    %c0_0 = arith.constant 0 : index
    %0 = vector.load %arg1[%c0, %c0_0] : memref<128x64xf32, #tpu.memory_space<vmem>>, vector<128x64xf32>
    %1 = arith.truncf %0 : vector<128x64xf32> to vector<128x64xbf16>
    %c0_1 = arith.constant 0 : index
    %c0_2 = arith.constant 0 : index
    %2 = vector.load %arg2[%c0_1, %c0_2] : memref<64x128xbf16, #tpu.memory_space<vmem>>, vector<64x128xbf16>
    %cst = arith.constant dense<0.000000e+00> : vector<128x128xf32>
    %3 = tpu.matmul %1, %2, %cst {dimension_numbers = #tpu.dot_dimension_numbers<[1], [0], [0], [1], [0, 0, 1, 1], [], []>} : vector<128x64xbf16>, vector<64x128xbf16>, vector<128x128xf32> -> vector<128x128xf32>
    %c0_3 = arith.constant 0 : index
    %c0_4 = arith.constant 0 : index
    %4 = vector.load %arg3[%c0_3, %c0_4] : memref<1x128xf32, #tpu.memory_space<vmem>>, vector<1x128xf32>
    %5 = vector.broadcast %4 : vector<1x128xf32> to vector<128x128xf32>
    %6 = arith.mulf %3, %5 : vector<128x128xf32>
    %c0_5 = arith.constant 0 : index
    %c0_6 = arith.constant 0 : index
    %7 = vector.load %arg4[%c0_5, %c0_6] : memref<1x128xf32, #tpu.memory_space<vmem>>, vector<1x128xf32>
    %8 = vector.broadcast %7 : vector<1x128xf32> to vector<128x128xf32>
    %9 = arith.addf %6, %8 : vector<128x128xf32>
    %c0_7 = arith.constant 0 : index
    %c0_8 = arith.constant 0 : index
    %10 = vector.load %arg5[%c0_7, %c0_8] : memref<128x128xf32, #tpu.memory_space<vmem>>, vector<128x128xf32>
    tpu.vector_store %arg5[%c0_7, %c0_8], %9 {strides = array<i32>} : memref<128x128xf32, #tpu.memory_space<vmem>>, vector<128x128xf32>,
    return
  }
  func.func @transform_0(%arg0: i32) -> (i32, i32) {
    %c0_i32 = arith.constant 0 : i32
    %c0_i32_0 = arith.constant 0 : i32
    return %arg0, %c0_i32 : i32, i32
  }
  func.func @transform_1(%arg0: i32) -> (i32, i32) {
    %c0_i32 = arith.constant 0 : i32
    %c0_i32_0 = arith.constant 0 : i32
    %c0_i32_1 = arith.constant 0 : i32
    return %c0_i32, %c0_i32_0 : i32, i32
  }
  func.func @transform_2(%arg0: i32) -> (i32, i32) {
    %c0_i32 = arith.constant 0 : i32
    %c0_i32_0 = arith.constant 0 : i32
    %c0_i32_1 = arith.constant 0 : i32
    return %c0_i32, %c0_i32_0 : i32, i32
  }
  func.func @transform_3(%arg0: i32) -> (i32, i32) {
    %c0_i32 = arith.constant 0 : i32
    %c0_i32_0 = arith.constant 0 : i32
    %c0_i32_1 = arith.constant 0 : i32
    return %c0_i32, %c0_i32_0 : i32, i32
  }
  func.func @transform_4(%arg0: i32) -> (i32, i32) {
    %c0_i32 = arith.constant 0 : i32
    %c0_i32_0 = arith.constant 0 : i32
    return %arg0, %c0_i32 : i32, i32
  }
}

module attributes {stable_mosaic.version = 11 : i64} {
  func.func @_mm_kernel(%arg0: i32, %arg1: memref<128x64xbf16, #tpu.memory_space<vmem>>, %arg2: memref<64x128xbf16, #tpu.memory_space<vmem>>, %arg3: memref<1x128xf32, #tpu.memory_space<vmem>>, %arg4: memref<1x128xf32, #tpu.memory_space<vmem>>, %arg5: memref<128x128xf32, #tpu.memory_space<vmem>>, %arg6: memref<128x128xf32, #tpu.memory_space<vmem>>) attributes {dimension_semantics = [#tpu.dimension_semantics<parallel>], iteration_bounds = array<i64: 1>, scalar_prefetch = 0 : i64, scratch_operands = 0 : i64, tpu.core_type = #tpu.core_type<tc>, window_params = [{transform_indices = @transform_0, window_bounds = array<i64: 128, 64>}, {pipeline_mode = #tpu.pipeline_mode<synchronous>, transform_indices = @transform_1, window_bounds = array<i64: 64, 128>}, {pipeline_mode = #tpu.pipeline_mode<synchronous>, transform_indices = @transform_2, window_bounds = array<i64: 1, 128>}, {pipeline_mode = #tpu.pipeline_mode<synchronous>, transform_indices = @transform_3, window_bounds = array<i64: 1, 128>}, {transform_indices = @transform_4, window_bounds = array<i64: 128, 128>}, {transform_indices = @transform_5, window_bounds = array<i64: 128, 128>}]} {
    %c0 = arith.constant 0 : index
    %c0_0 = arith.constant 0 : index
    %0 = vector.load %arg1[%c0, %c0_0] : memref<128x64xbf16, #tpu.memory_space<vmem>>, vector<128x64xbf16>
    %c0_1 = arith.constant 0 : index
    %c0_2 = arith.constant 0 : index
    %1 = vector.load %arg2[%c0_1, %c0_2] : memref<64x128xbf16, #tpu.memory_space<vmem>>, vector<64x128xbf16>
    %cst = arith.constant dense<0.000000e+00> : vector<128x128xf32>
    %2 = tpu.matmul %0, %1, %cst {dimension_numbers = #tpu.dot_dimension_numbers<[1], [0], [0], [1], [0, 0, 1, 1], [], []>} : vector<128x64xbf16>, vector<64x128xbf16>, vector<128x128xf32> -> vector<128x128xf32>
    %c0_3 = arith.constant 0 : index
    %c0_4 = arith.constant 0 : index
    %3 = vector.load %arg3[%c0_3, %c0_4] : memref<1x128xf32, #tpu.memory_space<vmem>>, vector<1x128xf32>
    %4 = vector.broadcast %3 : vector<1x128xf32> to vector<128x128xf32>
    %5 = arith.mulf %2, %4 : vector<128x128xf32>
    %c0_5 = arith.constant 0 : index
    %c0_6 = arith.constant 0 : index
    %6 = vector.load %arg4[%c0_5, %c0_6] : memref<1x128xf32, #tpu.memory_space<vmem>>, vector<1x128xf32>
    %7 = vector.broadcast %6 : vector<1x128xf32> to vector<128x128xf32>
    %8 = arith.addf %5, %7 : vector<128x128xf32>
    %c0_7 = arith.constant 0 : index
    %c0_8 = arith.constant 0 : index
    %9 = vector.load %arg5[%c0_7, %c0_8] : memref<128x128xf32, #tpu.memory_space<vmem>>, vector<128x128xf32>
    %10 = arith.addf %8, %9 : vector<128x128xf32>
    %c0_9 = arith.constant 0 : index
    %c0_10 = arith.constant 0 : index
    %11 = vector.load %arg6[%c0_9, %c0_10] : memref<128x128xf32, #tpu.memory_space<vmem>>, vector<128x128xf32>
    tpu.vector_store %arg6[%c0_9, %c0_10], %10 {strides = array<i32>} : memref<128x128xf32, #tpu.memory_space<vmem>>, vector<128x128xf32>,
    return
  }
  func.func @transform_0(%arg0: i32) -> (i32, i32) {
    %c0_i32 = arith.constant 0 : i32
    %c0_i32_0 = arith.constant 0 : i32
    return %arg0, %c0_i32 : i32, i32
  }
  func.func @transform_1(%arg0: i32) -> (i32, i32) {
    %c0_i32 = arith.constant 0 : i32
    %c0_i32_0 = arith.constant 0 : i32
    %c0_i32_1 = arith.constant 0 : i32
    return %c0_i32, %c0_i32_0 : i32, i32
  }
  func.func @transform_2(%arg0: i32) -> (i32, i32) {
    %c0_i32 = arith.constant 0 : i32
    %c0_i32_0 = arith.constant 0 : i32
    %c0_i32_1 = arith.constant 0 : i32
    return %c0_i32, %c0_i32_0 : i32, i32
  }
  func.func @transform_3(%arg0: i32) -> (i32, i32) {
    %c0_i32 = arith.constant 0 : i32
    %c0_i32_0 = arith.constant 0 : i32
    %c0_i32_1 = arith.constant 0 : i32
    return %c0_i32, %c0_i32_0 : i32, i32
  }
  func.func @transform_4(%arg0: i32) -> (i32, i32) {
    %c0_i32 = arith.constant 0 : i32
    %c0_i32_0 = arith.constant 0 : i32
    return %arg0, %c0_i32 : i32, i32
  }
  func.func @transform_5(%arg0: i32) -> (i32, i32) {
    %c0_i32 = arith.constant 0 : i32
    %c0_i32_0 = arith.constant 0 : i32
    return %arg0, %c0_i32 : i32, i32
  }
}

module attributes {stable_mosaic.version = 11 : i64} {
  func.func @_maxpool_kernel(%arg0: i32, %arg1: memref<8x2x4x256xf32, #tpu.memory_space<vmem>>, %arg2: memref<8x4x128xf32, #tpu.memory_space<vmem>>) attributes {dimension_semantics = [#tpu.dimension_semantics<parallel>], iteration_bounds = array<i64: 1>, scalar_prefetch = 0 : i64, scratch_operands = 0 : i64, tpu.core_type = #tpu.core_type<tc>, window_params = [{transform_indices = @transform_0, window_bounds = array<i64: 8, 2, 4, 256>}, {transform_indices = @transform_1, window_bounds = array<i64: 8, 4, 128>}]} {
    %c0 = arith.constant 0 : index
    %c0_0 = arith.constant 0 : index
    %c0_1 = arith.constant 0 : index
    %c0_2 = arith.constant 0 : index
    %0 = vector.load %arg1[%c0, %c0_0, %c0_1, %c0_2] : memref<8x2x4x256xf32, #tpu.memory_space<vmem>>, vector<8x2x4x256xf32>
    %1 = vector.extract_strided_slice %0 {offsets = [0, 0, 0, 0], sizes = [8, 1, 4, 256], strides = [1, 1, 1, 1]} : vector<8x2x4x256xf32> to vector<8x1x4x256xf32>
    %2 = vector.shape_cast %1 : vector<8x1x4x256xf32> to vector<8x4x256xf32>
    %3 = vector.extract_strided_slice %0 {offsets = [0, 1, 0, 0], sizes = [8, 1, 4, 256], strides = [1, 1, 1, 1]} : vector<8x2x4x256xf32> to vector<8x1x4x256xf32>
    %4 = vector.shape_cast %3 : vector<8x1x4x256xf32> to vector<8x4x256xf32>
    %5 = arith.maximumf %2, %4 : vector<8x4x256xf32>
    %6 = vector.extract_strided_slice %5 {offsets = [0, 0, 0], sizes = [8, 4, 128], strides = [1, 1, 1]} : vector<8x4x256xf32> to vector<8x4x128xf32>
    %7 = vector.extract_strided_slice %5 {offsets = [0, 0, 128], sizes = [8, 4, 128], strides = [1, 1, 1]} : vector<8x4x256xf32> to vector<8x4x128xf32>
    %8 = arith.maximumf %6, %7 : vector<8x4x128xf32>
    %c0_3 = arith.constant 0 : index
    %c0_4 = arith.constant 0 : index
    %c0_5 = arith.constant 0 : index
    %9 = vector.load %arg2[%c0_3, %c0_4, %c0_5] : memref<8x4x128xf32, #tpu.memory_space<vmem>>, vector<8x4x128xf32>
    tpu.vector_store %arg2[%c0_3, %c0_4, %c0_5], %8 {strides = array<i32>} : memref<8x4x128xf32, #tpu.memory_space<vmem>>, vector<8x4x128xf32>,
    return
  }
  func.func @transform_0(%arg0: i32) -> (i32, i32, i32, i32) {
    %c0_i32 = arith.constant 0 : i32
    %c0_i32_0 = arith.constant 0 : i32
    %c0_i32_1 = arith.constant 0 : i32
    %c0_i32_2 = arith.constant 0 : i32
    return %arg0, %c0_i32, %c0_i32_0, %c0_i32_1 : i32, i32, i32, i32
  }
  func.func @transform_1(%arg0: i32) -> (i32, i32, i32) {
    %c0_i32 = arith.constant 0 : i32
    %c0_i32_0 = arith.constant 0 : i32
    %c0_i32_1 = arith.constant 0 : i32
    return %arg0, %c0_i32, %c0_i32_0 : i32, i32, i32
  }
}

module attributes {stable_mosaic.version = 11 : i64} {
  func.func @_mm_kernel(%arg0: i32, %arg1: memref<32x128xf32, #tpu.memory_space<vmem>>, %arg2: memref<128x128xbf16, #tpu.memory_space<vmem>>, %arg3: memref<1x128xf32, #tpu.memory_space<vmem>>, %arg4: memref<1x128xf32, #tpu.memory_space<vmem>>, %arg5: memref<1x128xf32, #tpu.memory_space<vmem>>, %arg6: memref<1x128xf32, #tpu.memory_space<vmem>>, %arg7: memref<32x128xbf16, #tpu.memory_space<vmem>>) attributes {dimension_semantics = [#tpu.dimension_semantics<parallel>], iteration_bounds = array<i64: 1>, scalar_prefetch = 0 : i64, scratch_operands = 0 : i64, tpu.core_type = #tpu.core_type<tc>, window_params = [{transform_indices = @transform_0, window_bounds = array<i64: 32, 128>}, {pipeline_mode = #tpu.pipeline_mode<synchronous>, transform_indices = @transform_1, window_bounds = array<i64: 128, 128>}, {pipeline_mode = #tpu.pipeline_mode<synchronous>, transform_indices = @transform_2, window_bounds = array<i64: 1, 128>}, {pipeline_mode = #tpu.pipeline_mode<synchronous>, transform_indices = @transform_3, window_bounds = array<i64: 1, 128>}, {pipeline_mode = #tpu.pipeline_mode<synchronous>, transform_indices = @transform_4, window_bounds = array<i64: 1, 128>}, {pipeline_mode = #tpu.pipeline_mode<synchronous>, transform_indices = @transform_5, window_bounds = array<i64: 1, 128>}, {transform_indices = @transform_6, window_bounds = array<i64: 32, 128>}]} {
    %c0 = arith.constant 0 : index
    %c0_0 = arith.constant 0 : index
    %0 = vector.load %arg1[%c0, %c0_0] : memref<32x128xf32, #tpu.memory_space<vmem>>, vector<32x128xf32>
    %c0_1 = arith.constant 0 : index
    %c0_2 = arith.constant 0 : index
    %1 = vector.load %arg5[%c0_1, %c0_2] : memref<1x128xf32, #tpu.memory_space<vmem>>, vector<1x128xf32>
    %2 = vector.broadcast %1 : vector<1x128xf32> to vector<32x128xf32>
    %3 = arith.mulf %0, %2 : vector<32x128xf32>
    %c0_3 = arith.constant 0 : index
    %c0_4 = arith.constant 0 : index
    %4 = vector.load %arg6[%c0_3, %c0_4] : memref<1x128xf32, #tpu.memory_space<vmem>>, vector<1x128xf32>
    %5 = vector.broadcast %4 : vector<1x128xf32> to vector<32x128xf32>
    %6 = arith.addf %3, %5 : vector<32x128xf32>
    %cst = arith.constant 0.000000e+00 : f32
    %7 = vector.broadcast %cst : f32 to vector<32x128xf32>
    %8 = arith.maximumf %6, %7 : vector<32x128xf32>
    %9 = arith.truncf %8 : vector<32x128xf32> to vector<32x128xbf16>
    %c0_5 = arith.constant 0 : index
    %c0_6 = arith.constant 0 : index
    %10 = vector.load %arg2[%c0_5, %c0_6] : memref<128x128xbf16, #tpu.memory_space<vmem>>, vector<128x128xbf16>
    %cst_7 = arith.constant dense<0.000000e+00> : vector<32x128xf32>
    %11 = tpu.matmul %9, %10, %cst_7 {dimension_numbers = #tpu.dot_dimension_numbers<[1], [0], [0], [1], [0, 0, 1, 1], [], []>} : vector<32x128xbf16>, vector<128x128xbf16>, vector<32x128xf32> -> vector<32x128xf32>
    %c0_8 = arith.constant 0 : index
    %c0_9 = arith.constant 0 : index
    %12 = vector.load %arg3[%c0_8, %c0_9] : memref<1x128xf32, #tpu.memory_space<vmem>>, vector<1x128xf32>
    %13 = vector.broadcast %12 : vector<1x128xf32> to vector<32x128xf32>
    %14 = arith.mulf %11, %13 : vector<32x128xf32>
    %c0_10 = arith.constant 0 : index
    %c0_11 = arith.constant 0 : index
    %15 = vector.load %arg4[%c0_10, %c0_11] : memref<1x128xf32, #tpu.memory_space<vmem>>, vector<1x128xf32>
    %16 = vector.broadcast %15 : vector<1x128xf32> to vector<32x128xf32>
    %17 = arith.addf %14, %16 : vector<32x128xf32>
    %cst_12 = arith.constant 0.000000e+00 : f32
    %18 = vector.broadcast %cst_12 : f32 to vector<32x128xf32>
    %19 = arith.maximumf %17, %18 : vector<32x128xf32>
    %20 = arith.truncf %19 : vector<32x128xf32> to vector<32x128xbf16>
    %c0_13 = arith.constant 0 : index
    %c0_14 = arith.constant 0 : index
    %21 = vector.load %arg7[%c0_13, %c0_14] : memref<32x128xbf16, #tpu.memory_space<vmem>>, vector<32x128xbf16>
    tpu.vector_store %arg7[%c0_13, %c0_14], %20 {strides = array<i32>} : memref<32x128xbf16, #tpu.memory_space<vmem>>, vector<32x128xbf16>,
    return
  }
  func.func @transform_0(%arg0: i32) -> (i32, i32) {
    %c0_i32 = arith.constant 0 : i32
    %c0_i32_0 = arith.constant 0 : i32
    return %arg0, %c0_i32 : i32, i32
  }
  func.func @transform_1(%arg0: i32) -> (i32, i32) {
    %c0_i32 = arith.constant 0 : i32
    %c0_i32_0 = arith.constant 0 : i32
    %c0_i32_1 = arith.constant 0 : i32
    return %c0_i32, %c0_i32_0 : i32, i32
  }
  func.func @transform_2(%arg0: i32) -> (i32, i32) {
    %c0_i32 = arith.constant 0 : i32
    %c0_i32_0 = arith.constant 0 : i32
    %c0_i32_1 = arith.constant 0 : i32
    return %c0_i32, %c0_i32_0 : i32, i32
  }
  func.func @transform_3(%arg0: i32) -> (i32, i32) {
    %c0_i32 = arith.constant 0 : i32
    %c0_i32_0 = arith.constant 0 : i32
    %c0_i32_1 = arith.constant 0 : i32
    return %c0_i32, %c0_i32_0 : i32, i32
  }
  func.func @transform_4(%arg0: i32) -> (i32, i32) {
    %c0_i32 = arith.constant 0 : i32
    %c0_i32_0 = arith.constant 0 : i32
    %c0_i32_1 = arith.constant 0 : i32
    return %c0_i32, %c0_i32_0 : i32, i32
  }
  func.func @transform_5(%arg0: i32) -> (i32, i32) {
    %c0_i32 = arith.constant 0 : i32
    %c0_i32_0 = arith.constant 0 : i32
    %c0_i32_1 = arith.constant 0 : i32
    return %c0_i32, %c0_i32_0 : i32, i32
  }
  func.func @transform_6(%arg0: i32) -> (i32, i32) {
    %c0_i32 = arith.constant 0 : i32
    %c0_i32_0 = arith.constant 0 : i32
    return %arg0, %c0_i32 : i32, i32
  }
}

module attributes {stable_mosaic.version = 11 : i64} {
  func.func @_mm_kernel(%arg0: i32, %arg1: memref<32x1152xbf16, #tpu.memory_space<vmem>>, %arg2: memref<1152x128xbf16, #tpu.memory_space<vmem>>, %arg3: memref<1x128xf32, #tpu.memory_space<vmem>>, %arg4: memref<1x128xf32, #tpu.memory_space<vmem>>, %arg5: memref<32x128xbf16, #tpu.memory_space<vmem>>) attributes {dimension_semantics = [#tpu.dimension_semantics<parallel>], iteration_bounds = array<i64: 1>, scalar_prefetch = 0 : i64, scratch_operands = 0 : i64, tpu.core_type = #tpu.core_type<tc>, window_params = [{transform_indices = @transform_0, window_bounds = array<i64: 32, 1152>}, {pipeline_mode = #tpu.pipeline_mode<synchronous>, transform_indices = @transform_1, window_bounds = array<i64: 1152, 128>}, {pipeline_mode = #tpu.pipeline_mode<synchronous>, transform_indices = @transform_2, window_bounds = array<i64: 1, 128>}, {pipeline_mode = #tpu.pipeline_mode<synchronous>, transform_indices = @transform_3, window_bounds = array<i64: 1, 128>}, {transform_indices = @transform_4, window_bounds = array<i64: 32, 128>}]} {
    %c0 = arith.constant 0 : index
    %c0_0 = arith.constant 0 : index
    %0 = vector.load %arg1[%c0, %c0_0] : memref<32x1152xbf16, #tpu.memory_space<vmem>>, vector<32x1152xbf16>
    %c0_1 = arith.constant 0 : index
    %c0_2 = arith.constant 0 : index
    %1 = vector.load %arg2[%c0_1, %c0_2] : memref<1152x128xbf16, #tpu.memory_space<vmem>>, vector<1152x128xbf16>
    %cst = arith.constant dense<0.000000e+00> : vector<32x128xf32>
    %2 = tpu.matmul %0, %1, %cst {dimension_numbers = #tpu.dot_dimension_numbers<[1], [0], [0], [1], [0, 0, 1, 1], [], []>} : vector<32x1152xbf16>, vector<1152x128xbf16>, vector<32x128xf32> -> vector<32x128xf32>
    %c0_3 = arith.constant 0 : index
    %c0_4 = arith.constant 0 : index
    %3 = vector.load %arg3[%c0_3, %c0_4] : memref<1x128xf32, #tpu.memory_space<vmem>>, vector<1x128xf32>
    %4 = vector.broadcast %3 : vector<1x128xf32> to vector<32x128xf32>
    %5 = arith.mulf %2, %4 : vector<32x128xf32>
    %c0_5 = arith.constant 0 : index
    %c0_6 = arith.constant 0 : index
    %6 = vector.load %arg4[%c0_5, %c0_6] : memref<1x128xf32, #tpu.memory_space<vmem>>, vector<1x128xf32>
    %7 = vector.broadcast %6 : vector<1x128xf32> to vector<32x128xf32>
    %8 = arith.addf %5, %7 : vector<32x128xf32>
    %cst_7 = arith.constant 0.000000e+00 : f32
    %9 = vector.broadcast %cst_7 : f32 to vector<32x128xf32>
    %10 = arith.maximumf %8, %9 : vector<32x128xf32>
    %11 = arith.truncf %10 : vector<32x128xf32> to vector<32x128xbf16>
    %c0_8 = arith.constant 0 : index
    %c0_9 = arith.constant 0 : index
    %12 = vector.load %arg5[%c0_8, %c0_9] : memref<32x128xbf16, #tpu.memory_space<vmem>>, vector<32x128xbf16>
    tpu.vector_store %arg5[%c0_8, %c0_9], %11 {strides = array<i32>} : memref<32x128xbf16, #tpu.memory_space<vmem>>, vector<32x128xbf16>,
    return
  }
  func.func @transform_0(%arg0: i32) -> (i32, i32) {
    %c0_i32 = arith.constant 0 : i32
    %c0_i32_0 = arith.constant 0 : i32
    return %arg0, %c0_i32 : i32, i32
  }
  func.func @transform_1(%arg0: i32) -> (i32, i32) {
    %c0_i32 = arith.constant 0 : i32
    %c0_i32_0 = arith.constant 0 : i32
    %c0_i32_1 = arith.constant 0 : i32
    return %c0_i32, %c0_i32_0 : i32, i32
  }
  func.func @transform_2(%arg0: i32) -> (i32, i32) {
    %c0_i32 = arith.constant 0 : i32
    %c0_i32_0 = arith.constant 0 : i32
    %c0_i32_1 = arith.constant 0 : i32
    return %c0_i32, %c0_i32_0 : i32, i32
  }
  func.func @transform_3(%arg0: i32) -> (i32, i32) {
    %c0_i32 = arith.constant 0 : i32
    %c0_i32_0 = arith.constant 0 : i32
    %c0_i32_1 = arith.constant 0 : i32
    return %c0_i32, %c0_i32_0 : i32, i32
  }
  func.func @transform_4(%arg0: i32) -> (i32, i32) {
    %c0_i32 = arith.constant 0 : i32
    %c0_i32_0 = arith.constant 0 : i32
    return %arg0, %c0_i32 : i32, i32
  }
}

module attributes {stable_mosaic.version = 11 : i64} {
  func.func @_mm_kernel(%arg0: i32, %arg1: memref<32x128xf32, #tpu.memory_space<vmem>>, %arg2: memref<128x256xbf16, #tpu.memory_space<vmem>>, %arg3: memref<1x256xf32, #tpu.memory_space<vmem>>, %arg4: memref<1x256xf32, #tpu.memory_space<vmem>>, %arg5: memref<32x256xf32, #tpu.memory_space<vmem>>) attributes {dimension_semantics = [#tpu.dimension_semantics<parallel>], iteration_bounds = array<i64: 1>, scalar_prefetch = 0 : i64, scratch_operands = 0 : i64, tpu.core_type = #tpu.core_type<tc>, window_params = [{transform_indices = @transform_0, window_bounds = array<i64: 32, 128>}, {pipeline_mode = #tpu.pipeline_mode<synchronous>, transform_indices = @transform_1, window_bounds = array<i64: 128, 256>}, {pipeline_mode = #tpu.pipeline_mode<synchronous>, transform_indices = @transform_2, window_bounds = array<i64: 1, 256>}, {pipeline_mode = #tpu.pipeline_mode<synchronous>, transform_indices = @transform_3, window_bounds = array<i64: 1, 256>}, {transform_indices = @transform_4, window_bounds = array<i64: 32, 256>}]} {
    %c0 = arith.constant 0 : index
    %c0_0 = arith.constant 0 : index
    %0 = vector.load %arg1[%c0, %c0_0] : memref<32x128xf32, #tpu.memory_space<vmem>>, vector<32x128xf32>
    %1 = arith.truncf %0 : vector<32x128xf32> to vector<32x128xbf16>
    %c0_1 = arith.constant 0 : index
    %c0_2 = arith.constant 0 : index
    %2 = vector.load %arg2[%c0_1, %c0_2] : memref<128x256xbf16, #tpu.memory_space<vmem>>, vector<128x256xbf16>
    %cst = arith.constant dense<0.000000e+00> : vector<32x256xf32>
    %3 = tpu.matmul %1, %2, %cst {dimension_numbers = #tpu.dot_dimension_numbers<[1], [0], [0], [1], [0, 0, 1, 1], [], []>} : vector<32x128xbf16>, vector<128x256xbf16>, vector<32x256xf32> -> vector<32x256xf32>
    %c0_3 = arith.constant 0 : index
    %c0_4 = arith.constant 0 : index
    %4 = vector.load %arg3[%c0_3, %c0_4] : memref<1x256xf32, #tpu.memory_space<vmem>>, vector<1x256xf32>
    %5 = vector.broadcast %4 : vector<1x256xf32> to vector<32x256xf32>
    %6 = arith.mulf %3, %5 : vector<32x256xf32>
    %c0_5 = arith.constant 0 : index
    %c0_6 = arith.constant 0 : index
    %7 = vector.load %arg4[%c0_5, %c0_6] : memref<1x256xf32, #tpu.memory_space<vmem>>, vector<1x256xf32>
    %8 = vector.broadcast %7 : vector<1x256xf32> to vector<32x256xf32>
    %9 = arith.addf %6, %8 : vector<32x256xf32>
    %c0_7 = arith.constant 0 : index
    %c0_8 = arith.constant 0 : index
    %10 = vector.load %arg5[%c0_7, %c0_8] : memref<32x256xf32, #tpu.memory_space<vmem>>, vector<32x256xf32>
    tpu.vector_store %arg5[%c0_7, %c0_8], %9 {strides = array<i32>} : memref<32x256xf32, #tpu.memory_space<vmem>>, vector<32x256xf32>,
    return
  }
  func.func @transform_0(%arg0: i32) -> (i32, i32) {
    %c0_i32 = arith.constant 0 : i32
    %c0_i32_0 = arith.constant 0 : i32
    return %arg0, %c0_i32 : i32, i32
  }
  func.func @transform_1(%arg0: i32) -> (i32, i32) {
    %c0_i32 = arith.constant 0 : i32
    %c0_i32_0 = arith.constant 0 : i32
    %c0_i32_1 = arith.constant 0 : i32
    return %c0_i32, %c0_i32_0 : i32, i32
  }
  func.func @transform_2(%arg0: i32) -> (i32, i32) {
    %c0_i32 = arith.constant 0 : i32
    %c0_i32_0 = arith.constant 0 : i32
    %c0_i32_1 = arith.constant 0 : i32
    return %c0_i32, %c0_i32_0 : i32, i32
  }
  func.func @transform_3(%arg0: i32) -> (i32, i32) {
    %c0_i32 = arith.constant 0 : i32
    %c0_i32_0 = arith.constant 0 : i32
    %c0_i32_1 = arith.constant 0 : i32
    return %c0_i32, %c0_i32_0 : i32, i32
  }
  func.func @transform_4(%arg0: i32) -> (i32, i32) {
    %c0_i32 = arith.constant 0 : i32
    %c0_i32_0 = arith.constant 0 : i32
    return %arg0, %c0_i32 : i32, i32
  }
}

module attributes {stable_mosaic.version = 11 : i64} {
  func.func @_mm_kernel(%arg0: i32, %arg1: memref<32x128xbf16, #tpu.memory_space<vmem>>, %arg2: memref<128x256xbf16, #tpu.memory_space<vmem>>, %arg3: memref<1x256xf32, #tpu.memory_space<vmem>>, %arg4: memref<1x256xf32, #tpu.memory_space<vmem>>, %arg5: memref<32x256xf32, #tpu.memory_space<vmem>>, %arg6: memref<32x256xf32, #tpu.memory_space<vmem>>) attributes {dimension_semantics = [#tpu.dimension_semantics<parallel>], iteration_bounds = array<i64: 1>, scalar_prefetch = 0 : i64, scratch_operands = 0 : i64, tpu.core_type = #tpu.core_type<tc>, window_params = [{transform_indices = @transform_0, window_bounds = array<i64: 32, 128>}, {pipeline_mode = #tpu.pipeline_mode<synchronous>, transform_indices = @transform_1, window_bounds = array<i64: 128, 256>}, {pipeline_mode = #tpu.pipeline_mode<synchronous>, transform_indices = @transform_2, window_bounds = array<i64: 1, 256>}, {pipeline_mode = #tpu.pipeline_mode<synchronous>, transform_indices = @transform_3, window_bounds = array<i64: 1, 256>}, {transform_indices = @transform_4, window_bounds = array<i64: 32, 256>}, {transform_indices = @transform_5, window_bounds = array<i64: 32, 256>}]} {
    %c0 = arith.constant 0 : index
    %c0_0 = arith.constant 0 : index
    %0 = vector.load %arg1[%c0, %c0_0] : memref<32x128xbf16, #tpu.memory_space<vmem>>, vector<32x128xbf16>
    %c0_1 = arith.constant 0 : index
    %c0_2 = arith.constant 0 : index
    %1 = vector.load %arg2[%c0_1, %c0_2] : memref<128x256xbf16, #tpu.memory_space<vmem>>, vector<128x256xbf16>
    %cst = arith.constant dense<0.000000e+00> : vector<32x256xf32>
    %2 = tpu.matmul %0, %1, %cst {dimension_numbers = #tpu.dot_dimension_numbers<[1], [0], [0], [1], [0, 0, 1, 1], [], []>} : vector<32x128xbf16>, vector<128x256xbf16>, vector<32x256xf32> -> vector<32x256xf32>
    %c0_3 = arith.constant 0 : index
    %c0_4 = arith.constant 0 : index
    %3 = vector.load %arg3[%c0_3, %c0_4] : memref<1x256xf32, #tpu.memory_space<vmem>>, vector<1x256xf32>
    %4 = vector.broadcast %3 : vector<1x256xf32> to vector<32x256xf32>
    %5 = arith.mulf %2, %4 : vector<32x256xf32>
    %c0_5 = arith.constant 0 : index
    %c0_6 = arith.constant 0 : index
    %6 = vector.load %arg4[%c0_5, %c0_6] : memref<1x256xf32, #tpu.memory_space<vmem>>, vector<1x256xf32>
    %7 = vector.broadcast %6 : vector<1x256xf32> to vector<32x256xf32>
    %8 = arith.addf %5, %7 : vector<32x256xf32>
    %c0_7 = arith.constant 0 : index
    %c0_8 = arith.constant 0 : index
    %9 = vector.load %arg5[%c0_7, %c0_8] : memref<32x256xf32, #tpu.memory_space<vmem>>, vector<32x256xf32>
    %10 = arith.addf %8, %9 : vector<32x256xf32>
    %c0_9 = arith.constant 0 : index
    %c0_10 = arith.constant 0 : index
    %11 = vector.load %arg6[%c0_9, %c0_10] : memref<32x256xf32, #tpu.memory_space<vmem>>, vector<32x256xf32>
    tpu.vector_store %arg6[%c0_9, %c0_10], %10 {strides = array<i32>} : memref<32x256xf32, #tpu.memory_space<vmem>>, vector<32x256xf32>,
    return
  }
  func.func @transform_0(%arg0: i32) -> (i32, i32) {
    %c0_i32 = arith.constant 0 : i32
    %c0_i32_0 = arith.constant 0 : i32
    return %arg0, %c0_i32 : i32, i32
  }
  func.func @transform_1(%arg0: i32) -> (i32, i32) {
    %c0_i32 = arith.constant 0 : i32
    %c0_i32_0 = arith.constant 0 : i32
    %c0_i32_1 = arith.constant 0 : i32
    return %c0_i32, %c0_i32_0 : i32, i32
  }
  func.func @transform_2(%arg0: i32) -> (i32, i32) {
    %c0_i32 = arith.constant 0 : i32
    %c0_i32_0 = arith.constant 0 : i32
    %c0_i32_1 = arith.constant 0 : i32
    return %c0_i32, %c0_i32_0 : i32, i32
  }
  func.func @transform_3(%arg0: i32) -> (i32, i32) {
    %c0_i32 = arith.constant 0 : i32
    %c0_i32_0 = arith.constant 0 : i32
    %c0_i32_1 = arith.constant 0 : i32
    return %c0_i32, %c0_i32_0 : i32, i32
  }
  func.func @transform_4(%arg0: i32) -> (i32, i32) {
    %c0_i32 = arith.constant 0 : i32
    %c0_i32_0 = arith.constant 0 : i32
    return %arg0, %c0_i32 : i32, i32
  }
  func.func @transform_5(%arg0: i32) -> (i32, i32) {
    %c0_i32 = arith.constant 0 : i32
    %c0_i32_0 = arith.constant 0 : i32
    return %arg0, %c0_i32 : i32, i32
  }
}

module attributes {stable_mosaic.version = 11 : i64} {
  func.func @_mm_kernel(%arg0: i32, %arg1: memref<32x256xf32, #tpu.memory_space<vmem>>, %arg2: memref<256x128xbf16, #tpu.memory_space<vmem>>, %arg3: memref<1x128xf32, #tpu.memory_space<vmem>>, %arg4: memref<1x128xf32, #tpu.memory_space<vmem>>, %arg5: memref<1x256xf32, #tpu.memory_space<vmem>>, %arg6: memref<1x256xf32, #tpu.memory_space<vmem>>, %arg7: memref<32x128xbf16, #tpu.memory_space<vmem>>) attributes {dimension_semantics = [#tpu.dimension_semantics<parallel>], iteration_bounds = array<i64: 1>, scalar_prefetch = 0 : i64, scratch_operands = 0 : i64, tpu.core_type = #tpu.core_type<tc>, window_params = [{transform_indices = @transform_0, window_bounds = array<i64: 32, 256>}, {pipeline_mode = #tpu.pipeline_mode<synchronous>, transform_indices = @transform_1, window_bounds = array<i64: 256, 128>}, {pipeline_mode = #tpu.pipeline_mode<synchronous>, transform_indices = @transform_2, window_bounds = array<i64: 1, 128>}, {pipeline_mode = #tpu.pipeline_mode<synchronous>, transform_indices = @transform_3, window_bounds = array<i64: 1, 128>}, {pipeline_mode = #tpu.pipeline_mode<synchronous>, transform_indices = @transform_4, window_bounds = array<i64: 1, 256>}, {pipeline_mode = #tpu.pipeline_mode<synchronous>, transform_indices = @transform_5, window_bounds = array<i64: 1, 256>}, {transform_indices = @transform_6, window_bounds = array<i64: 32, 128>}]} {
    %c0 = arith.constant 0 : index
    %c0_0 = arith.constant 0 : index
    %0 = vector.load %arg1[%c0, %c0_0] : memref<32x256xf32, #tpu.memory_space<vmem>>, vector<32x256xf32>
    %c0_1 = arith.constant 0 : index
    %c0_2 = arith.constant 0 : index
    %1 = vector.load %arg5[%c0_1, %c0_2] : memref<1x256xf32, #tpu.memory_space<vmem>>, vector<1x256xf32>
    %2 = vector.broadcast %1 : vector<1x256xf32> to vector<32x256xf32>
    %3 = arith.mulf %0, %2 : vector<32x256xf32>
    %c0_3 = arith.constant 0 : index
    %c0_4 = arith.constant 0 : index
    %4 = vector.load %arg6[%c0_3, %c0_4] : memref<1x256xf32, #tpu.memory_space<vmem>>, vector<1x256xf32>
    %5 = vector.broadcast %4 : vector<1x256xf32> to vector<32x256xf32>
    %6 = arith.addf %3, %5 : vector<32x256xf32>
    %cst = arith.constant 0.000000e+00 : f32
    %7 = vector.broadcast %cst : f32 to vector<32x256xf32>
    %8 = arith.maximumf %6, %7 : vector<32x256xf32>
    %9 = arith.truncf %8 : vector<32x256xf32> to vector<32x256xbf16>
    %c0_5 = arith.constant 0 : index
    %c0_6 = arith.constant 0 : index
    %10 = vector.load %arg2[%c0_5, %c0_6] : memref<256x128xbf16, #tpu.memory_space<vmem>>, vector<256x128xbf16>
    %cst_7 = arith.constant dense<0.000000e+00> : vector<32x128xf32>
    %11 = tpu.matmul %9, %10, %cst_7 {dimension_numbers = #tpu.dot_dimension_numbers<[1], [0], [0], [1], [0, 0, 1, 1], [], []>} : vector<32x256xbf16>, vector<256x128xbf16>, vector<32x128xf32> -> vector<32x128xf32>
    %c0_8 = arith.constant 0 : index
    %c0_9 = arith.constant 0 : index
    %12 = vector.load %arg3[%c0_8, %c0_9] : memref<1x128xf32, #tpu.memory_space<vmem>>, vector<1x128xf32>
    %13 = vector.broadcast %12 : vector<1x128xf32> to vector<32x128xf32>
    %14 = arith.mulf %11, %13 : vector<32x128xf32>
    %c0_10 = arith.constant 0 : index
    %c0_11 = arith.constant 0 : index
    %15 = vector.load %arg4[%c0_10, %c0_11] : memref<1x128xf32, #tpu.memory_space<vmem>>, vector<1x128xf32>
    %16 = vector.broadcast %15 : vector<1x128xf32> to vector<32x128xf32>
    %17 = arith.addf %14, %16 : vector<32x128xf32>
    %cst_12 = arith.constant 0.000000e+00 : f32
    %18 = vector.broadcast %cst_12 : f32 to vector<32x128xf32>
    %19 = arith.maximumf %17, %18 : vector<32x128xf32>
    %20 = arith.truncf %19 : vector<32x128xf32> to vector<32x128xbf16>
    %c0_13 = arith.constant 0 : index
    %c0_14 = arith.constant 0 : index
    %21 = vector.load %arg7[%c0_13, %c0_14] : memref<32x128xbf16, #tpu.memory_space<vmem>>, vector<32x128xbf16>
    tpu.vector_store %arg7[%c0_13, %c0_14], %20 {strides = array<i32>} : memref<32x128xbf16, #tpu.memory_space<vmem>>, vector<32x128xbf16>,
    return
  }
  func.func @transform_0(%arg0: i32) -> (i32, i32) {
    %c0_i32 = arith.constant 0 : i32
    %c0_i32_0 = arith.constant 0 : i32
    return %arg0, %c0_i32 : i32, i32
  }
  func.func @transform_1(%arg0: i32) -> (i32, i32) {
    %c0_i32 = arith.constant 0 : i32
    %c0_i32_0 = arith.constant 0 : i32
    %c0_i32_1 = arith.constant 0 : i32
    return %c0_i32, %c0_i32_0 : i32, i32
  }
  func.func @transform_2(%arg0: i32) -> (i32, i32) {
    %c0_i32 = arith.constant 0 : i32
    %c0_i32_0 = arith.constant 0 : i32
    %c0_i32_1 = arith.constant 0 : i32
    return %c0_i32, %c0_i32_0 : i32, i32
  }
  func.func @transform_3(%arg0: i32) -> (i32, i32) {
    %c0_i32 = arith.constant 0 : i32
    %c0_i32_0 = arith.constant 0 : i32
    %c0_i32_1 = arith.constant 0 : i32
    return %c0_i32, %c0_i32_0 : i32, i32
  }
  func.func @transform_4(%arg0: i32) -> (i32, i32) {
    %c0_i32 = arith.constant 0 : i32
    %c0_i32_0 = arith.constant 0 : i32
    %c0_i32_1 = arith.constant 0 : i32
    return %c0_i32, %c0_i32_0 : i32, i32
  }
  func.func @transform_5(%arg0: i32) -> (i32, i32) {
    %c0_i32 = arith.constant 0 : i32
    %c0_i32_0 = arith.constant 0 : i32
    %c0_i32_1 = arith.constant 0 : i32
    return %c0_i32, %c0_i32_0 : i32, i32
  }
  func.func @transform_6(%arg0: i32) -> (i32, i32) {
    %c0_i32 = arith.constant 0 : i32
    %c0_i32_0 = arith.constant 0 : i32
    return %arg0, %c0_i32 : i32, i32
  }
}

module attributes {stable_mosaic.version = 11 : i64} {
  func.func @_mm_kernel(%arg0: i32, %arg1: memref<32x1024xbf16, #tpu.memory_space<vmem>>, %arg2: memref<1024x128xbf16, #tpu.memory_space<vmem>>, %arg3: memref<1x128xf32, #tpu.memory_space<vmem>>, %arg4: memref<1x128xf32, #tpu.memory_space<vmem>>, %arg5: memref<32x128xbf16, #tpu.memory_space<vmem>>) attributes {dimension_semantics = [#tpu.dimension_semantics<parallel>], iteration_bounds = array<i64: 1>, scalar_prefetch = 0 : i64, scratch_operands = 0 : i64, tpu.core_type = #tpu.core_type<tc>, window_params = [{transform_indices = @transform_0, window_bounds = array<i64: 32, 1024>}, {pipeline_mode = #tpu.pipeline_mode<synchronous>, transform_indices = @transform_1, window_bounds = array<i64: 1024, 128>}, {pipeline_mode = #tpu.pipeline_mode<synchronous>, transform_indices = @transform_2, window_bounds = array<i64: 1, 128>}, {pipeline_mode = #tpu.pipeline_mode<synchronous>, transform_indices = @transform_3, window_bounds = array<i64: 1, 128>}, {transform_indices = @transform_4, window_bounds = array<i64: 32, 128>}]} {
    %c0 = arith.constant 0 : index
    %c0_0 = arith.constant 0 : index
    %0 = vector.load %arg1[%c0, %c0_0] : memref<32x1024xbf16, #tpu.memory_space<vmem>>, vector<32x1024xbf16>
    %c0_1 = arith.constant 0 : index
    %c0_2 = arith.constant 0 : index
    %1 = vector.load %arg2[%c0_1, %c0_2] : memref<1024x128xbf16, #tpu.memory_space<vmem>>, vector<1024x128xbf16>
    %cst = arith.constant dense<0.000000e+00> : vector<32x128xf32>
    %2 = tpu.matmul %0, %1, %cst {dimension_numbers = #tpu.dot_dimension_numbers<[1], [0], [0], [1], [0, 0, 1, 1], [], []>} : vector<32x1024xbf16>, vector<1024x128xbf16>, vector<32x128xf32> -> vector<32x128xf32>
    %c0_3 = arith.constant 0 : index
    %c0_4 = arith.constant 0 : index
    %3 = vector.load %arg3[%c0_3, %c0_4] : memref<1x128xf32, #tpu.memory_space<vmem>>, vector<1x128xf32>
    %4 = vector.broadcast %3 : vector<1x128xf32> to vector<32x128xf32>
    %5 = arith.mulf %2, %4 : vector<32x128xf32>
    %c0_5 = arith.constant 0 : index
    %c0_6 = arith.constant 0 : index
    %6 = vector.load %arg4[%c0_5, %c0_6] : memref<1x128xf32, #tpu.memory_space<vmem>>, vector<1x128xf32>
    %7 = vector.broadcast %6 : vector<1x128xf32> to vector<32x128xf32>
    %8 = arith.addf %5, %7 : vector<32x128xf32>
    %cst_7 = arith.constant 0.000000e+00 : f32
    %9 = vector.broadcast %cst_7 : f32 to vector<32x128xf32>
    %10 = arith.maximumf %8, %9 : vector<32x128xf32>
    %11 = arith.truncf %10 : vector<32x128xf32> to vector<32x128xbf16>
    %c0_8 = arith.constant 0 : index
    %c0_9 = arith.constant 0 : index
    %12 = vector.load %arg5[%c0_8, %c0_9] : memref<32x128xbf16, #tpu.memory_space<vmem>>, vector<32x128xbf16>
    tpu.vector_store %arg5[%c0_8, %c0_9], %11 {strides = array<i32>} : memref<32x128xbf16, #tpu.memory_space<vmem>>, vector<32x128xbf16>,
    return
  }
  func.func @transform_0(%arg0: i32) -> (i32, i32) {
    %c0_i32 = arith.constant 0 : i32
    %c0_i32_0 = arith.constant 0 : i32
    return %arg0, %c0_i32 : i32, i32
  }
  func.func @transform_1(%arg0: i32) -> (i32, i32) {
    %c0_i32 = arith.constant 0 : i32
    %c0_i32_0 = arith.constant 0 : i32
    %c0_i32_1 = arith.constant 0 : i32
    return %c0_i32, %c0_i32_0 : i32, i32
  }
  func.func @transform_2(%arg0: i32) -> (i32, i32) {
    %c0_i32 = arith.constant 0 : i32
    %c0_i32_0 = arith.constant 0 : i32
    %c0_i32_1 = arith.constant 0 : i32
    return %c0_i32, %c0_i32_0 : i32, i32
  }
  func.func @transform_3(%arg0: i32) -> (i32, i32) {
    %c0_i32 = arith.constant 0 : i32
    %c0_i32_0 = arith.constant 0 : i32
    %c0_i32_1 = arith.constant 0 : i32
    return %c0_i32, %c0_i32_0 : i32, i32
  }
  func.func @transform_4(%arg0: i32) -> (i32, i32) {
    %c0_i32 = arith.constant 0 : i32
    %c0_i32_0 = arith.constant 0 : i32
    return %arg0, %c0_i32 : i32, i32
  }
}

module attributes {stable_mosaic.version = 11 : i64} {
  func.func @_mm_kernel(%arg0: i32, %arg1: memref<128x512xbf16, #tpu.memory_space<vmem>>, %arg2: memref<512x1xbf16, #tpu.memory_space<vmem>>, %arg3: memref<1x1xf32, #tpu.memory_space<vmem>>, %arg4: memref<1x1xf32, #tpu.memory_space<vmem>>, %arg5: memref<1x1xf32, #tpu.memory_space<vmem>>, %arg6: memref<1x1xf32, #tpu.memory_space<vmem>>, %arg7: memref<128x1xf32, #tpu.memory_space<vmem>>) attributes {dimension_semantics = [#tpu.dimension_semantics<parallel>], iteration_bounds = array<i64: 1>, scalar_prefetch = 0 : i64, scratch_operands = 0 : i64, tpu.core_type = #tpu.core_type<tc>, window_params = [{transform_indices = @transform_0, window_bounds = array<i64: 128, 512>}, {pipeline_mode = #tpu.pipeline_mode<synchronous>, transform_indices = @transform_1, window_bounds = array<i64: 512, 1>}, {pipeline_mode = #tpu.pipeline_mode<synchronous>, transform_indices = @transform_2, window_bounds = array<i64: 1, 1>}, {pipeline_mode = #tpu.pipeline_mode<synchronous>, transform_indices = @transform_3, window_bounds = array<i64: 1, 1>}, {pipeline_mode = #tpu.pipeline_mode<synchronous>, transform_indices = @transform_4, window_bounds = array<i64: 1, 1>}, {pipeline_mode = #tpu.pipeline_mode<synchronous>, transform_indices = @transform_5, window_bounds = array<i64: 1, 1>}, {transform_indices = @transform_6, window_bounds = array<i64: 128, 1>}]} {
    %c0 = arith.constant 0 : index
    %c0_0 = arith.constant 0 : index
    %0 = vector.load %arg1[%c0, %c0_0] : memref<128x512xbf16, #tpu.memory_space<vmem>>, vector<128x512xbf16>
    %c0_1 = arith.constant 0 : index
    %c0_2 = arith.constant 0 : index
    %1 = vector.load %arg2[%c0_1, %c0_2] : memref<512x1xbf16, #tpu.memory_space<vmem>>, vector<512x1xbf16>
    %cst = arith.constant dense<0.000000e+00> : vector<128x1xf32>
    %2 = tpu.matmul %0, %1, %cst {dimension_numbers = #tpu.dot_dimension_numbers<[1], [0], [0], [1], [0, 0, 1, 1], [], []>} : vector<128x512xbf16>, vector<512x1xbf16>, vector<128x1xf32> -> vector<128x1xf32>
    %c0_3 = arith.constant 0 : index
    %c0_4 = arith.constant 0 : index
    %3 = vector.load %arg3[%c0_3, %c0_4] : memref<1x1xf32, #tpu.memory_space<vmem>>, vector<1x1xf32>
    %4 = vector.broadcast %3 : vector<1x1xf32> to vector<128x1xf32>
    %5 = arith.mulf %2, %4 : vector<128x1xf32>
    %c0_5 = arith.constant 0 : index
    %c0_6 = arith.constant 0 : index
    %6 = vector.load %arg4[%c0_5, %c0_6] : memref<1x1xf32, #tpu.memory_space<vmem>>, vector<1x1xf32>
    %7 = vector.broadcast %6 : vector<1x1xf32> to vector<128x1xf32>
    %8 = arith.addf %5, %7 : vector<128x1xf32>
    %cst_7 = arith.constant 0.000000e+00 : f32
    %9 = vector.broadcast %cst_7 : f32 to vector<128x1xf32>
    %10 = arith.maximumf %8, %9 : vector<128x1xf32>
    %c0_8 = arith.constant 0 : index
    %c0_9 = arith.constant 0 : index
    %11 = vector.load %arg5[%c0_8, %c0_9] : memref<1x1xf32, #tpu.memory_space<vmem>>, vector<1x1xf32>
    %12 = vector.broadcast %11 : vector<1x1xf32> to vector<128x1xf32>
    %13 = arith.mulf %10, %12 : vector<128x1xf32>
    %c0_10 = arith.constant 0 : index
    %c0_11 = arith.constant 0 : index
    %14 = vector.load %arg6[%c0_10, %c0_11] : memref<1x1xf32, #tpu.memory_space<vmem>>, vector<1x1xf32>
    %15 = vector.broadcast %14 : vector<1x1xf32> to vector<128x1xf32>
    %16 = arith.addf %13, %15 : vector<128x1xf32>
    %c0_12 = arith.constant 0 : index
    %c0_13 = arith.constant 0 : index
    %17 = vector.load %arg7[%c0_12, %c0_13] : memref<128x1xf32, #tpu.memory_space<vmem>>, vector<128x1xf32>
    tpu.vector_store %arg7[%c0_12, %c0_13], %16 {strides = array<i32>} : memref<128x1xf32, #tpu.memory_space<vmem>>, vector<128x1xf32>,
    return
  }
  func.func @transform_0(%arg0: i32) -> (i32, i32) {
    %c0_i32 = arith.constant 0 : i32
    %c0_i32_0 = arith.constant 0 : i32
    return %arg0, %c0_i32 : i32, i32
  }
  func.func @transform_1(%arg0: i32) -> (i32, i32) {
    %c0_i32 = arith.constant 0 : i32
    %c0_i32_0 = arith.constant 0 : i32
    %c0_i32_1 = arith.constant 0 : i32
    return %c0_i32, %c0_i32_0 : i32, i32
  }
  func.func @transform_2(%arg0: i32) -> (i32, i32) {
    %c0_i32 = arith.constant 0 : i32
    %c0_i32_0 = arith.constant 0 : i32
    %c0_i32_1 = arith.constant 0 : i32
    return %c0_i32, %c0_i32_0 : i32, i32
  }
  func.func @transform_3(%arg0: i32) -> (i32, i32) {
    %c0_i32 = arith.constant 0 : i32
    %c0_i32_0 = arith.constant 0 : i32
    %c0_i32_1 = arith.constant 0 : i32
    return %c0_i32, %c0_i32_0 : i32, i32
  }
  func.func @transform_4(%arg0: i32) -> (i32, i32) {
    %c0_i32 = arith.constant 0 : i32
    %c0_i32_0 = arith.constant 0 : i32
    %c0_i32_1 = arith.constant 0 : i32
    return %c0_i32, %c0_i32_0 : i32, i32
  }
  func.func @transform_5(%arg0: i32) -> (i32, i32) {
    %c0_i32 = arith.constant 0 : i32
    %c0_i32_0 = arith.constant 0 : i32
    %c0_i32_1 = arith.constant 0 : i32
    return %c0_i32, %c0_i32_0 : i32, i32
  }
  func.func @transform_6(%arg0: i32) -> (i32, i32) {
    %c0_i32 = arith.constant 0 : i32
    %c0_i32_0 = arith.constant 0 : i32
    return %arg0, %c0_i32 : i32, i32
  }
}

</mosaic_0001>

<bundles_post_ra>
// kernel: net_forward.21
= control target key start
LH: loop header
LB: loop body
LE: loop exit
PB: predicated region body
PF: predicated region fallthrough
CT: control target
= control target key end

     0   :  { %9 = vsyncpa [#allocation3], 0  ;;  %s363_s18 = smov [#allocation2]   ;;  %s522_s0 = inlined_call_operand.vmem [shape: bf16[128,49], index: 0, kind: input, shape index: {}]   ;;  %s523_s1 = inlined_call_operand.vmem [shape: bf16[49,64], index: 1, kind: input, shape index: {}]   ;;  %s524_s2 = inlined_call_operand.vmem [shape: f32[1,64], index: 2, kind: input, shape index: {}]   ;;  %s525_s3 = inlined_call_operand.hbm [shape: f32[1,64], index: 3, kind: input, shape index: {}]   ;;  %s526_s4 = inlined_call_operand.vmem [shape: f32[128,64], index: 4, kind: output, shape index: {}]  }
   0x1   :  { %s21_s17 = sshll.u32 %s525_s3, 4  ;;  %s23_s19 = sshll.u32 %s363_s18, 4  ;;  %s22_s17 = int_to_ptr.hbm [resolvable:$true] %s21_s17  ;;  %s24_s19 = int_to_ptr.vmem [resolvable:$true] %s23_s19 }
   0x2   :  { %26 = dma.hbm_to_vmem [thread:$0]  %s22_s17, 16, %s24_s19, [#allocation3]  }
   0x3   :  { %361 = dma.done.wait [#allocation3], 16  }
   0x4   :  { %362 = vsyncadd [#allocation3], 4294967280  ;;  %vm141_vm0 = vcmask 1040384   ;;  %v54_v0 = vld [vmem:[%s523_s1 + $0x18] sm:$0x1]  ;;  %v364_v2 = vmov 0  }
   0x5   :  { %v108_v1 = vunpack.c.l.b16 %v54_v0  ;;  %v143_v3 = vsel %vm141_vm0, 65535, %v364_v2  ;;  %v320_v6 = vld [vmem:[%s523_s1 + $0x10] sm:$0xff]  ;;  %v319_v7 = vld [vmem:[%s523_s1 + $0x8] sm:$0xff]  ;;  %v318_v8 = vld [vmem:[%s523_s1] sm:$0xff]  ;;  %vm116_vm1 = vcmask 400384   ;;  %vm236_vm2 = vcmask 523264  }
   0x6   :  { %v310_v9 = vld [vmem:[%s522_s0] sm:$0xff]  ;;  %v312_v10 = vld [vmem:[%s522_s0 + $0x10] sm:$0xff]  ;;  %v311_v13 = vld [vmem:[%s522_s0 + $0x8] sm:$0xff] }
   0x7   :  { %v112_v4 = vpack.c.b16 %v108_v1, %v108_v1  ;;  %v314_v11 = vld [vmem:[%s522_s0 + $0x20] sm:$0xff]  ;;  %v316_v12 = vld [vmem:[%s522_s0 + $0x30] sm:$0xff]  ;;  %v313_v14 = vld [vmem:[%s522_s0 + $0x18] sm:$0xff] }
   0x8   :  { %v315_v15 = vld [vmem:[%s522_s0 + $0x28] sm:$0xff]  ;;  %v317_v16 = vld [vmem:[%s522_s0 + $0x38] sm:$0xff]  ;;  %v335_v17 = vld [vmem:[%s524_s2] ss:$0 sm:$0xff] }
   0x9   :  { %v145_v5 = vand.u32 %v143_v3, %v112_v4  ;;  %v440_v18 = vld [vmem:[#allocation2] ss:$0 sm:$0xff] }
   0xb   :  { %151 = vmatpush.bf16.msra.mxu0 %v145_v5  ;;  %321 = vmatpush.bf16.msra.mxu1 %v145_v5 }
   0xc   :  { %322 = vmatpush.bf16.msra.mxu2 %v145_v5  ;;  %323 = vmatpush.bf16.msra.mxu3 %v145_v5 }
   0xf   :  { %152 = vmatpush.bf16.msra.mxu0 %v320_v6  ;;  %324 = vmatpush.bf16.msra.mxu1 %v320_v6 }
  0x10   :  { %325 = vmatpush.bf16.msra.mxu2 %v320_v6  ;;  %326 = vmatpush.bf16.msra.mxu3 %v320_v6 }
  0x13   :  { %153 = vmatpush.bf16.msra.mxu0 %v319_v7  ;;  %327 = vmatpush.bf16.msra.mxu1 %v319_v7 }
  0x14   :  { %328 = vmatpush.bf16.msra.mxu2 %v319_v7  ;;  %329 = vmatpush.bf16.msra.mxu3 %v319_v7 }
  0x17   :  { %154 = vmatpush.bf16.msra.mxu0 %v318_v8  ;;  %330 = vmatpush.bf16.msra.mxu1 %v318_v8 }
  0x18   :  { %331 = vmatpush.bf16.msra.mxu2 %v318_v8  ;;  %332 = vmatpush.bf16.msra.mxu3 %v318_v8 }
  0x1a   :  { %302 = vmatmul.msk.bf16.vlgmr.msra.gmra.mxu0 %vm116_vm1, %v310_v9  ;;  %304 = vmatmul.msk.bf16.vlgmr.msra.gmra.mxu1 %vm116_vm1, %v312_v10 }
  0x1b   :  { %306 = vmatmul.msk.bf16.vlgmr.msra.gmra.mxu2 %vm116_vm1, %v314_v11  ;;  %308 = vmatmul.msk.bf16.vlgmr.msra.gmra.mxu3 %vm116_vm1, %v316_v12 }
  0x2a   :  { %303 = vmatmul.msk.bf16.gmra.mxu0 %vm116_vm1, %v311_v13  ;;  %305 = vmatmul.msk.bf16.gmra.mxu1 %vm116_vm1, %v313_v14 }
  0x2b   :  { %307 = vmatmul.msk.bf16.gmra.mxu2 %vm116_vm1, %v315_v15  ;;  %309 = vmatmul.msk.bf16.gmra.mxu3 %vm116_vm1, %v317_v16 }
  0x97   :  { %v156_v19 = vpop.f32.mrf.mxu0  ;;  %v166_v20 = vpop.f32.mrf.mxu1 }
  0x98   :  { %v200_v21 = vmul.f32 %v335_v17, %v156_v19  ;;  %v204_v22 = vmul.f32 %v335_v17, %v166_v20 }
  0x9a   :  { %v220_v23 = vadd.f32 %v440_v18, %v200_v21  ;;  %v224_v24 = vadd.f32 %v440_v18, %v204_v22 }
  0x9c   :  { %237 = vst.msk [vmem:[%s526_s4] sm:$0xff] %vm236_vm2, %v220_v23 }
  0x9d   :  { %241 = vst.msk [vmem:[%s526_s4 + $0x20] sm:$0xff] %vm236_vm2, %v224_v24 }
  0x9e   :  { %v176_v25 = vpop.f32.mrf.mxu2  ;;  %v186_v26 = vpop.f32.mrf.mxu3 }
  0x9f   :  { %v208_v27 = vmul.f32 %v335_v17, %v176_v25  ;;  %v212_v28 = vmul.f32 %v335_v17, %v186_v26  ;;  %v158_v29 = vpop.f32.mrf.mxu0  ;;  %v168_v30 = vpop.f32.mrf.mxu1 }
  0xa0   :  { %v201_v31 = vmul.f32 %v335_v17, %v158_v29  ;;  %v205_v32 = vmul.f32 %v335_v17, %v168_v30 }
  0xa1   :  { %v228_v33 = vadd.f32 %v440_v18, %v208_v27  ;;  %v232_v34 = vadd.f32 %v440_v18, %v212_v28 }
  0xa2   :  { %v221_v35 = vadd.f32 %v440_v18, %v201_v31  ;;  %v225_v36 = vadd.f32 %v440_v18, %v205_v32 }
  0xa3   :  { %245 = vst.msk [vmem:[%s526_s4 + $0x40] sm:$0xff] %vm236_vm2, %v228_v33 }
  0xa4   :  { %249 = vst.msk [vmem:[%s526_s4 + $0x60] sm:$0xff] %vm236_vm2, %v232_v34 }
  0xa5   :  { %238 = vst.msk [vmem:[%s526_s4 + $0x8] sm:$0xff] %vm236_vm2, %v221_v35 }
  0xa6   :  { %242 = vst.msk [vmem:[%s526_s4 + $0x28] sm:$0xff] %vm236_vm2, %v225_v36  ;;  %v178_v37 = vpop.f32.mrf.mxu2  ;;  %v188_v38 = vpop.f32.mrf.mxu3 }
  0xa7   :  { %v209_v39 = vmul.f32 %v335_v17, %v178_v37  ;;  %v213_v40 = vmul.f32 %v335_v17, %v188_v38  ;;  %v161_v41 = vpop.f32.mrf.mxu0  ;;  %v171_v42 = vpop.f32.mrf.mxu1 }
  0xa8   :  { %v202_v43 = vmul.f32 %v335_v17, %v161_v41  ;;  %v206_v44 = vmul.f32 %v335_v17, %v171_v42 }
  0xa9   :  { %v229_v45 = vadd.f32 %v440_v18, %v209_v39  ;;  %v233_v46 = vadd.f32 %v440_v18, %v213_v40 }
  0xaa   :  { %v222_v47 = vadd.f32 %v440_v18, %v202_v43  ;;  %v226_v48 = vadd.f32 %v440_v18, %v206_v44 }
  0xab   :  { %246 = vst.msk [vmem:[%s526_s4 + $0x48] sm:$0xff] %vm236_vm2, %v229_v45 }
  0xac   :  { %250 = vst.msk [vmem:[%s526_s4 + $0x68] sm:$0xff] %vm236_vm2, %v233_v46 }
  0xad   :  { %239 = vst.msk [vmem:[%s526_s4 + $0x10] sm:$0xff] %vm236_vm2, %v222_v47 }
  0xae   :  { %243 = vst.msk [vmem:[%s526_s4 + $0x30] sm:$0xff] %vm236_vm2, %v226_v48  ;;  %v181_v49 = vpop.f32.mrf.mxu2  ;;  %v191_v50 = vpop.f32.mrf.mxu3 }
  0xaf   :  { %v210_v51 = vmul.f32 %v335_v17, %v181_v49  ;;  %v214_v52 = vmul.f32 %v335_v17, %v191_v50  ;;  %v163_v53 = vpop.f32.mrf.mxu0  ;;  %v173_v54 = vpop.f32.mrf.mxu1 }
  0xb0   :  { %v203_v55 = vmul.f32 %v335_v17, %v163_v53  ;;  %v207_v56 = vmul.f32 %v335_v17, %v173_v54 }
  0xb1   :  { %v230_v57 = vadd.f32 %v440_v18, %v210_v51  ;;  %v234_v58 = vadd.f32 %v440_v18, %v214_v52 }
  0xb2   :  { %v223_v59 = vadd.f32 %v440_v18, %v203_v55  ;;  %v227_v60 = vadd.f32 %v440_v18, %v207_v56 }
  0xb3   :  { %247 = vst.msk [vmem:[%s526_s4 + $0x50] sm:$0xff] %vm236_vm2, %v230_v57 }
  0xb4   :  { %251 = vst.msk [vmem:[%s526_s4 + $0x70] sm:$0xff] %vm236_vm2, %v234_v58 }
  0xb5   :  { %240 = vst.msk [vmem:[%s526_s4 + $0x18] sm:$0xff] %vm236_vm2, %v223_v59 }
  0xb6   :  { %244 = vst.msk [vmem:[%s526_s4 + $0x38] sm:$0xff] %vm236_vm2, %v227_v60  ;;  %v183_v61 = vpop.f32.mrf.mxu2  ;;  %v193_v62 = vpop.f32.mrf.mxu3 }
  0xb7   :  { %v211_v63 = vmul.f32 %v335_v17, %v183_v61  ;;  %v215_v0 = vmul.f32 %v335_v17, %v193_v62 }
  0xb9   :  { %v231_v1 = vadd.f32 %v440_v18, %v211_v63  ;;  %v235_v2 = vadd.f32 %v440_v18, %v215_v0 }
  0xbb   :  { %248 = vst.msk [vmem:[%s526_s4 + $0x58] sm:$0xff] %vm236_vm2, %v231_v1 }
  0xbc   :  { %252 = vst.msk [vmem:[%s526_s4 + $0x78] sm:$0xff] %vm236_vm2, %v235_v2 }
  0xbd   :  { %257 = vsyncpa [#allocation3], 1 }

// kernel: net_forward.22
= control target key start
LH: loop header
LB: loop body
LE: loop exit
PB: predicated region body
PF: predicated region fallthrough
CT: control target
= control target key end

     0   :  { %11 = vsyncpa [#allocation3], 0  ;;  %s723_s0 = inlined_call_operand.vmem [shape: f32[128,64], index: 0, kind: input, shape index: {}]   ;;  %s724_s1 = inlined_call_operand.vmem [shape: bf16[64,64], index: 1, kind: input, shape index: {}]   ;;  %s725_s2 = inlined_call_operand.hbm [shape: f32[1,64], index: 2, kind: input, shape index: {}]   ;;  %s726_s3 = inlined_call_operand.vmem [shape: f32[1,64], index: 3, kind: input, shape index: {}]   ;;  %s727_s4 = inlined_call_operand.hbm [shape: f32[1,64], index: 4, kind: input, shape index: {}]   ;;  %s728_s5 = inlined_call_operand.hbm [shape: f32[1,64], index: 5, kind: input, shape index: {}]   ;;  %s729_s6 = inlined_call_operand.vmem [shape: bf16[128,64], index: 6, kind: output, shape index: {}]  }
   0x1   :  { %12 = vsyncpa [#allocation5], 0  ;;  %s35_s23 = sshll.u32 %s727_s4, 4  ;;  %s469_s24 = smov [#allocation4]   ;;  %s36_s23 = int_to_ptr.hbm [resolvable:$true] %s35_s23 }
   0x2   :  { %s37_s25 = sshll.u32 %s469_s24, 4  ;;  %s22_s28 = sshll.u32 %s725_s2, 4  ;;  %s38_s25 = int_to_ptr.vmem [resolvable:$true] %s37_s25  ;;  %s23_s28 = int_to_ptr.hbm [resolvable:$true] %s22_s28 }
   0x3   :  { %40 = dma.hbm_to_vmem [thread:$0]  %s36_s23, 16, %s38_s25, [#allocation5]  }
   0x4   :  { %s470_s29 = smov [#allocation2]   ;;  %s46_s9 = sshll.u32 %s728_s5, 4  ;;  %s47_s9 = int_to_ptr.hbm [resolvable:$true] %s46_s9 }
   0x5   :  { %s24_s30 = sshll.u32 %s470_s29, 4  ;;  %s471_s4 = smov [#allocation6]   ;;  %s25_s30 = int_to_ptr.vmem [resolvable:$true] %s24_s30 }
   0x6   :  { %27 = dma.hbm_to_vmem [thread:$0]  %s23_s28, 16, %s25_s30, [#allocation3]  }
   0x7   :  { %s48_s10 = sshll.u32 %s471_s4, 4  ;;  %s49_s10 = int_to_ptr.vmem [resolvable:$true] %s48_s10 }
   0x8   :  { %51 = dma.hbm_to_vmem [thread:$0]  %s47_s9, 16, %s49_s10, [#allocation5]  }
   0x9   :  { %465 = dma.done.wait [#allocation3], 16  }
   0xa   :  { %466 = vsyncadd [#allocation3], 4294967280 }
   0xb   :  { %467 = dma.done.wait [#allocation5], 32  }
   0xc   :  { %468 = vsyncadd [#allocation5], 4294967264  ;;  %v373_v0 = vld [vmem:[%s724_s1 + $0x18] sm:$0xff]  ;;  %v372_v1 = vld [vmem:[%s724_s1 + $0x10] sm:$0xff]  ;;  %vm177_vm0 = vcmask 523264   ;;  %vm323_vm1 = vcmask 519168  }
   0xd   :  { %v65_v2 = vld [vmem:[%s723_s0] sm:$0xff]  ;;  %v66_v3 = vld [vmem:[%s723_s0 + $0x8] sm:$0xff]  ;;  %206 = vmatpush.bf16.msra.mxu0 %v373_v0  ;;  %374 = vmatpush.bf16.msra.mxu1 %v373_v0  ;;  %v67_v40 = vld [vmem:[%s723_s0 + $0x10] sm:$0xff] }
   0xe   :  { %v528_v4 = vld [vmem:[#allocation4] ss:$0 sm:$0xff]  ;;  %375 = vmatpush.bf16.msra.mxu2 %v373_v0  ;;  %376 = vmatpush.bf16.msra.mxu3 %v373_v0  ;;  %v530_v5 = vld [vmem:[#allocation6] ss:$0 sm:$0xff]  ;;  %v70_v7 = vld [vmem:[%s723_s0 + $0x28] sm:$0xff] }
   0xf   :  { %v69_v6 = vld [vmem:[%s723_s0 + $0x20] sm:$0xff]  ;;  %v85_v8 = vmul.f32 %v528_v4, %v65_v2  ;;  %v86_v9 = vmul.f32 %v528_v4, %v66_v3  ;;  %v90_v11 = vmul.f32 %v528_v4, %v70_v7  ;;  %v74_v13 = vld [vmem:[%s723_s0 + $0x48] sm:$0xff]  ;;  %v68_v41 = vld [vmem:[%s723_s0 + $0x18] sm:$0xff]  ;;  %v87_v50 = vmul.f32 %v528_v4, %v67_v40 }
  0x10   :  { %v89_v10 = vmul.f32 %v528_v4, %v69_v6  ;;  %v73_v12 = vld [vmem:[%s723_s0 + $0x40] sm:$0xff]  ;;  %v94_v16 = vmul.f32 %v528_v4, %v74_v13  ;;  %v78_v17 = vld [vmem:[%s723_s0 + $0x68] sm:$0xff]  ;;  %v71_v44 = vld [vmem:[%s723_s0 + $0x30] sm:$0xff]  ;;  %v88_v51 = vmul.f32 %v528_v4, %v68_v41 }
  0x11   :  { %v77_v14 = vld [vmem:[%s723_s0 + $0x60] sm:$0xff]  ;;  %v93_v15 = vmul.f32 %v528_v4, %v73_v12  ;;  %207 = vmatpush.bf16.msra.mxu0 %v372_v1  ;;  %377 = vmatpush.bf16.msra.mxu1 %v372_v1  ;;  %v371_v19 = vld [vmem:[%s724_s1 + $0x8] sm:$0xff]  ;;  %v105_v20 = vadd.f32 %v530_v5, %v85_v8  ;;  %v106_v21 = vadd.f32 %v530_v5, %v86_v9  ;;  %v72_v45 = vld [vmem:[%s723_s0 + $0x38] sm:$0xff] }
  0x12   :  { %v97_v18 = vmul.f32 %v528_v4, %v77_v14  ;;  %v109_v22 = vadd.f32 %v530_v5, %v89_v10  ;;  %378 = vmatpush.bf16.msra.mxu2 %v372_v1  ;;  %379 = vmatpush.bf16.msra.mxu3 %v372_v1  ;;  %v110_v23 = vadd.f32 %v530_v5, %v90_v11  ;;  %v370_v32 = vld [vmem:[%s724_s1] sm:$0xff]  ;;  %v75_v46 = vld [vmem:[%s723_s0 + $0x50] sm:$0xff]  ;;  %v76_v47 = vld [vmem:[%s723_s0 + $0x58] sm:$0xff] }
  0x13   :  { %v113_v24 = vadd.f32 %v530_v5, %v93_v15  ;;  %v114_v25 = vadd.f32 %v530_v5, %v94_v16  ;;  %v121_v26 = vmax.f32 %v105_v20, 0.0  ;;  %v98_v27 = vmul.f32 %v528_v4, %v78_v17  ;;  %v79_v48 = vld [vmem:[%s723_s0 + $0x70] sm:$0xff]  ;;  %v80_v49 = vld [vmem:[%s723_s0 + $0x78] sm:$0xff]  ;;  %v625_v15 = vld [vmem:[%s726_s3] ss:$0 sm:$0xff] }
  0x14   :  { %v122_v28 = vmax.f32 %v106_v21, 0.0  ;;  %v125_v29 = vmax.f32 %v109_v22, 0.0  ;;  %v126_v30 = vmax.f32 %v110_v23, 0.0  ;;  %v117_v31 = vadd.f32 %v530_v5, %v97_v18 }
  0x15   :  { %208 = vmatpush.bf16.msra.mxu0 %v371_v19  ;;  %380 = vmatpush.bf16.msra.mxu1 %v371_v19  ;;  %v129_v33 = vmax.f32 %v113_v24, 0.0  ;;  %v130_v34 = vmax.f32 %v114_v25, 0.0  ;;  %v118_v35 = vadd.f32 %v530_v5, %v98_v27  ;;  %v91_v52 = vmul.f32 %v528_v4, %v71_v44 }
  0x16   :  { %381 = vmatpush.bf16.msra.mxu2 %v371_v19  ;;  %382 = vmatpush.bf16.msra.mxu3 %v371_v19  ;;  %v133_v36 = vmax.f32 %v117_v31, 0.0  ;;  %v137_v38 = vpack.c.bf16 %v122_v28, %v121_v26  ;;  %v139_v39 = vpack.c.bf16 %v126_v30, %v125_v29  ;;  %v92_v53 = vmul.f32 %v528_v4, %v72_v45 }
  0x17   :  { %v134_v37 = vmax.f32 %v118_v35, 0.0  ;;  %v141_v42 = vpack.c.bf16 %v130_v34, %v129_v33  ;;  %v95_v54 = vmul.f32 %v528_v4, %v75_v46  ;;  %v96_v55 = vmul.f32 %v528_v4, %v76_v47 }
  0x18   :  { %v99_v56 = vmul.f32 %v528_v4, %v79_v48  ;;  %v100_v57 = vmul.f32 %v528_v4, %v80_v49  ;;  %v107_v58 = vadd.f32 %v530_v5, %v87_v50  ;;  %v108_v59 = vadd.f32 %v530_v5, %v88_v51 }
  0x19   :  { %209 = vmatpush.bf16.msra.mxu0 %v370_v32  ;;  %383 = vmatpush.bf16.msra.mxu1 %v370_v32  ;;  %v143_v43 = vpack.c.bf16 %v134_v37, %v133_v36  ;;  %v111_v60 = vadd.f32 %v530_v5, %v91_v52  ;;  %v112_v61 = vadd.f32 %v530_v5, %v92_v53 }
  0x1a   :  { %384 = vmatpush.bf16.msra.mxu2 %v370_v32  ;;  %385 = vmatpush.bf16.msra.mxu3 %v370_v32  ;;  %v115_v62 = vadd.f32 %v530_v5, %v95_v54  ;;  %v116_v63 = vadd.f32 %v530_v5, %v96_v55  ;;  %v119_v0 = vadd.f32 %v530_v5, %v99_v56  ;;  %v123_v2 = vmax.f32 %v107_v58, 0.0 }
  0x1b   :  { %v120_v1 = vadd.f32 %v530_v5, %v100_v57  ;;  %v124_v3 = vmax.f32 %v108_v59, 0.0  ;;  %v127_v6 = vmax.f32 %v111_v60, 0.0  ;;  %v128_v4 = vmax.f32 %v112_v61, 0.0  ;;  %v620_v5 = vld [vmem:[#allocation2] ss:$0 sm:$0xff] }
  0x1c   :  { %362 = vmatmul.msk.bf16.vlgmr.msra.gmra.mxu0 %vm177_vm0, %v137_v38  ;;  %364 = vmatmul.msk.bf16.vlgmr.msra.gmra.mxu1 %vm177_vm0, %v139_v39  ;;  %v131_v7 = vmax.f32 %v115_v62, 0.0  ;;  %v132_v8 = vmax.f32 %v116_v63, 0.0  ;;  %v135_v9 = vmax.f32 %v119_v0, 0.0 }
  0x1d   :  { %366 = vmatmul.msk.bf16.vlgmr.msra.gmra.mxu2 %vm177_vm0, %v141_v42  ;;  %368 = vmatmul.msk.bf16.vlgmr.msra.gmra.mxu3 %vm177_vm0, %v143_v43  ;;  %v136_v10 = vmax.f32 %v120_v1, 0.0  ;;  %v138_v11 = vpack.c.bf16 %v124_v3, %v123_v2  ;;  %v140_v12 = vpack.c.bf16 %v128_v4, %v127_v6 }
  0x1e   :  { %v142_v13 = vpack.c.bf16 %v132_v8, %v131_v7 }
  0x1f   :  { %v144_v14 = vpack.c.bf16 %v136_v10, %v135_v9 }
  0x2c   :  { %363 = vmatmul.msk.bf16.gmra.mxu0 %vm177_vm0, %v138_v11  ;;  %365 = vmatmul.msk.bf16.gmra.mxu1 %vm177_vm0, %v140_v12 }
  0x2d   :  { %367 = vmatmul.msk.bf16.gmra.mxu2 %vm177_vm0, %v142_v13  ;;  %369 = vmatmul.msk.bf16.gmra.mxu3 %vm177_vm0, %v144_v14 }
  0x99   :  { %v211_v16 = vpop.f32.mrf.mxu0  ;;  %v221_v17 = vpop.f32.mrf.mxu1 }
  0x9a   :  { %v255_v18 = vmul.f32 %v620_v5, %v211_v16  ;;  %v259_v19 = vmul.f32 %v620_v5, %v221_v17 }
  0x9c   :  { %v275_v20 = vadd.f32 %v625_v15, %v255_v18  ;;  %v279_v21 = vadd.f32 %v625_v15, %v259_v19 }
  0x9e   :  { %v291_v22 = vmax.f32 %v275_v20, 0.0  ;;  %v295_v23 = vmax.f32 %v279_v21, 0.0 }
  0xa0   :  { %v307_v24 = vpack.c.bf16 %v291_v22, %v291_v22  ;;  %v311_v25 = vpack.c.bf16 %v295_v23, %v295_v23  ;;  %v231_v26 = vpop.f32.mrf.mxu2  ;;  %v241_v27 = vpop.f32.mrf.mxu3 }
  0xa1   :  { %v263_v28 = vmul.f32 %v620_v5, %v231_v26  ;;  %v267_v29 = vmul.f32 %v620_v5, %v241_v27  ;;  %v213_v30 = vpop.f32.mrf.mxu0  ;;  %v223_v31 = vpop.f32.mrf.mxu1 }
  0xa2   :  { %324 = vst.msk [vmem:[%s729_s6] sm:$0xf] %vm323_vm1, %v307_v24  ;;  %v256_v32 = vmul.f32 %v620_v5, %v213_v30  ;;  %v260_v33 = vmul.f32 %v620_v5, %v223_v31 }
  0xa3   :  { %328 = vst.msk [vmem:[%s729_s6 + $0x10] sm:$0xf] %vm323_vm1, %v311_v25  ;;  %v283_v34 = vadd.f32 %v625_v15, %v263_v28  ;;  %v287_v35 = vadd.f32 %v625_v15, %v267_v29 }
  0xa4   :  { %v276_v36 = vadd.f32 %v625_v15, %v256_v32  ;;  %v280_v37 = vadd.f32 %v625_v15, %v260_v33 }
  0xa5   :  { %v299_v38 = vmax.f32 %v283_v34, 0.0  ;;  %v303_v39 = vmax.f32 %v287_v35, 0.0 }
  0xa6   :  { %v292_v40 = vmax.f32 %v276_v36, 0.0  ;;  %v296_v41 = vmax.f32 %v280_v37, 0.0 }
  0xa7   :  { %v315_v42 = vpack.c.bf16 %v299_v38, %v299_v38  ;;  %v319_v43 = vpack.c.bf16 %v303_v39, %v303_v39 }
  0xa8   :  { %v308_v44 = vpack.c.bf16 %v292_v40, %v292_v40  ;;  %v312_v45 = vpack.c.bf16 %v296_v41, %v296_v41  ;;  %v233_v46 = vpop.f32.mrf.mxu2  ;;  %v243_v47 = vpop.f32.mrf.mxu3 }
  0xa9   :  { %332 = vst.msk [vmem:[%s729_s6 + $0x20] sm:$0xf] %vm323_vm1, %v315_v42  ;;  %v264_v48 = vmul.f32 %v620_v5, %v233_v46  ;;  %v268_v49 = vmul.f32 %v620_v5, %v243_v47  ;;  %v216_v50 = vpop.f32.mrf.mxu0  ;;  %v226_v51 = vpop.f32.mrf.mxu1 }
  0xaa   :  { %336 = vst.msk [vmem:[%s729_s6 + $0x30] sm:$0xf] %vm323_vm1, %v319_v43  ;;  %v257_v52 = vmul.f32 %v620_v5, %v216_v50  ;;  %v261_v53 = vmul.f32 %v620_v5, %v226_v51 }
  0xab   :  { %325 = vst.msk [vmem:[%s729_s6 + $0x4] sm:$0xf] %vm323_vm1, %v308_v44  ;;  %v284_v54 = vadd.f32 %v625_v15, %v264_v48  ;;  %v288_v55 = vadd.f32 %v625_v15, %v268_v49 }
  0xac   :  { %329 = vst.msk [vmem:[%s729_s6 + $0x14] sm:$0xf] %vm323_vm1, %v312_v45  ;;  %v277_v56 = vadd.f32 %v625_v15, %v257_v52  ;;  %v281_v57 = vadd.f32 %v625_v15, %v261_v53 }
  0xad   :  { %v300_v58 = vmax.f32 %v284_v54, 0.0  ;;  %v304_v59 = vmax.f32 %v288_v55, 0.0 }
  0xae   :  { %v293_v60 = vmax.f32 %v277_v56, 0.0  ;;  %v297_v61 = vmax.f32 %v281_v57, 0.0 }
  0xaf   :  { %v316_v62 = vpack.c.bf16 %v300_v58, %v300_v58  ;;  %v320_v63 = vpack.c.bf16 %v304_v59, %v304_v59 }
  0xb0   :  { %v309_v0 = vpack.c.bf16 %v293_v60, %v293_v60  ;;  %v313_v1 = vpack.c.bf16 %v297_v61, %v297_v61  ;;  %v236_v2 = vpop.f32.mrf.mxu2  ;;  %v246_v3 = vpop.f32.mrf.mxu3 }
  0xb1   :  { %333 = vst.msk [vmem:[%s729_s6 + $0x24] sm:$0xf] %vm323_vm1, %v316_v62  ;;  %v265_v6 = vmul.f32 %v620_v5, %v236_v2  ;;  %v269_v4 = vmul.f32 %v620_v5, %v246_v3  ;;  %v218_v7 = vpop.f32.mrf.mxu0  ;;  %v228_v8 = vpop.f32.mrf.mxu1 }
  0xb2   :  { %337 = vst.msk [vmem:[%s729_s6 + $0x34] sm:$0xf] %vm323_vm1, %v320_v63  ;;  %v258_v9 = vmul.f32 %v620_v5, %v218_v7  ;;  %v262_v10 = vmul.f32 %v620_v5, %v228_v8 }
  0xb3   :  { %326 = vst.msk [vmem:[%s729_s6 + $0x8] sm:$0xf] %vm323_vm1, %v309_v0  ;;  %v285_v11 = vadd.f32 %v625_v15, %v265_v6  ;;  %v289_v12 = vadd.f32 %v625_v15, %v269_v4 }
  0xb4   :  { %330 = vst.msk [vmem:[%s729_s6 + $0x18] sm:$0xf] %vm323_vm1, %v313_v1  ;;  %v278_v13 = vadd.f32 %v625_v15, %v258_v9  ;;  %v282_v14 = vadd.f32 %v625_v15, %v262_v10 }
  0xb5   :  { %v301_v16 = vmax.f32 %v285_v11, 0.0  ;;  %v305_v17 = vmax.f32 %v289_v12, 0.0 }
  0xb6   :  { %v294_v18 = vmax.f32 %v278_v13, 0.0  ;;  %v298_v19 = vmax.f32 %v282_v14, 0.0 }
  0xb7   :  { %v317_v20 = vpack.c.bf16 %v301_v16, %v301_v16  ;;  %v321_v21 = vpack.c.bf16 %v305_v17, %v305_v17 }
  0xb8   :  { %v310_v22 = vpack.c.bf16 %v294_v18, %v294_v18  ;;  %v314_v23 = vpack.c.bf16 %v298_v19, %v298_v19  ;;  %v238_v24 = vpop.f32.mrf.mxu2  ;;  %v248_v25 = vpop.f32.mrf.mxu3 }
  0xb9   :  { %334 = vst.msk [vmem:[%s729_s6 + $0x28] sm:$0xf] %vm323_vm1, %v317_v20  ;;  %v266_v26 = vmul.f32 %v620_v5, %v238_v24  ;;  %v270_v27 = vmul.f32 %v620_v5, %v248_v25 }
  0xba   :  { %338 = vst.msk [vmem:[%s729_s6 + $0x38] sm:$0xf] %vm323_vm1, %v321_v21 }
  0xbb   :  { %327 = vst.msk [vmem:[%s729_s6 + $0xc] sm:$0xf] %vm323_vm1, %v310_v22  ;;  %v286_v28 = vadd.f32 %v625_v15, %v266_v26  ;;  %v290_v29 = vadd.f32 %v625_v15, %v270_v27 }
  0xbc   :  { %331 = vst.msk [vmem:[%s729_s6 + $0x1c] sm:$0xf] %vm323_vm1, %v314_v23 }
  0xbd   :  { %v302_v5 = vmax.f32 %v286_v28, 0.0  ;;  %v306_v30 = vmax.f32 %v290_v29, 0.0 }
  0xbf   :  { %v318_v31 = vpack.c.bf16 %v302_v5, %v302_v5  ;;  %v322_v32 = vpack.c.bf16 %v306_v30, %v306_v30 }
  0xc1   :  { %335 = vst.msk [vmem:[%s729_s6 + $0x2c] sm:$0xf] %vm323_vm1, %v318_v31 }
  0xc2   :  { %339 = vst.msk [vmem:[%s729_s6 + $0x3c] sm:$0xf] %vm323_vm1, %v322_v32 }
  0xc3   :  { %344 = vsyncpa [#allocation3], 1 }
  0xc4   :  { %345 = vsyncpa [#allocation5], 1 }

// kernel: net_forward.24
= control target key start
LH: loop header
LB: loop body
LE: loop exit
PB: predicated region body
PF: predicated region fallthrough
CT: control target
= control target key end

     0   :  { %vm74_vm0 = vcmask 523264   ;;  %s415_s1 = inlined_call_operand.vmem [shape: bf16[64,128], index: 1, kind: input, shape index: {}]   ;;  %s416_s2 = inlined_call_operand.vmem [shape: f32[1,128], index: 2, kind: input, shape index: {}]   ;;  %s417_s0 = inlined_call_operand.vmem [shape: f32[128,64], index: 0, kind: input, shape index: {}]   ;;  %s418_s3 = inlined_call_operand.vmem [shape: f32[1,128], index: 3, kind: input, shape index: {}]   ;;  %s419_s4 = inlined_call_operand.vmem [shape: f32[128,128], index: 4, kind: output, shape index: {}]  }
   0x1   :  { %v235_v0 = vld [vmem:[%s415_s1 + $0x18] sm:$0xff]  ;;  %v234_v1 = vld [vmem:[%s415_s1 + $0x10] sm:$0xff]  ;;  %v233_v2 = vld [vmem:[%s415_s1 + $0x8] sm:$0xff] }
   0x2   :  { %103 = vmatpush.bf16.msra.mxu0 %v235_v0  ;;  %236 = vmatpush.bf16.msra.mxu1 %v235_v0  ;;  %v232_v3 = vld [vmem:[%s415_s1] sm:$0xff]  ;;  %v19_v5 = vld [vmem:[%s417_s0 + $0x8] sm:$0xff]  ;;  %v20_v16 = vld [vmem:[%s417_s0 + $0x10] sm:$0xff] }
   0x3   :  { %237 = vmatpush.bf16.msra.mxu2 %v235_v0  ;;  %238 = vmatpush.bf16.msra.mxu3 %v235_v0  ;;  %v18_v4 = vld [vmem:[%s417_s0] sm:$0xff]  ;;  %v23_v7 = vld [vmem:[%s417_s0 + $0x28] sm:$0xff]  ;;  %v21_v17 = vld [vmem:[%s417_s0 + $0x18] sm:$0xff] }
   0x4   :  { %v22_v6 = vld [vmem:[%s417_s0 + $0x20] sm:$0xff]  ;;  %v27_v9 = vld [vmem:[%s417_s0 + $0x48] sm:$0xff]  ;;  %v34_v12 = vpack.c.bf16 %v19_v5, %v18_v4  ;;  %v24_v18 = vld [vmem:[%s417_s0 + $0x30] sm:$0xff]  ;;  %v35_v24 = vpack.c.bf16 %v21_v17, %v20_v16 }
   0x5   :  { %v26_v8 = vld [vmem:[%s417_s0 + $0x40] sm:$0xff]  ;;  %v31_v11 = vld [vmem:[%s417_s0 + $0x68] sm:$0xff]  ;;  %v36_v13 = vpack.c.bf16 %v23_v7, %v22_v6  ;;  %v25_v19 = vld [vmem:[%s417_s0 + $0x38] sm:$0xff] }
   0x6   :  { %104 = vmatpush.bf16.msra.mxu0 %v234_v1  ;;  %239 = vmatpush.bf16.msra.mxu1 %v234_v1  ;;  %v30_v10 = vld [vmem:[%s417_s0 + $0x60] sm:$0xff]  ;;  %v38_v14 = vpack.c.bf16 %v27_v9, %v26_v8  ;;  %v28_v20 = vld [vmem:[%s417_s0 + $0x50] sm:$0xff]  ;;  %v29_v21 = vld [vmem:[%s417_s0 + $0x58] sm:$0xff]  ;;  %v37_v25 = vpack.c.bf16 %v25_v19, %v24_v18 }
   0x7   :  { %240 = vmatpush.bf16.msra.mxu2 %v234_v1  ;;  %241 = vmatpush.bf16.msra.mxu3 %v234_v1  ;;  %v40_v15 = vpack.c.bf16 %v31_v11, %v30_v10  ;;  %v32_v22 = vld [vmem:[%s417_s0 + $0x70] sm:$0xff]  ;;  %v33_v23 = vld [vmem:[%s417_s0 + $0x78] sm:$0xff]  ;;  %v39_v26 = vpack.c.bf16 %v29_v21, %v28_v20  ;;  %v248_v28 = vld [vmem:[%s416_s2] ss:$0 sm:$0xff] }
   0x8   :  { %v41_v27 = vpack.c.bf16 %v33_v23, %v32_v22  ;;  %v349_v29 = vld [vmem:[%s418_s3] ss:$0 sm:$0xff] }
   0xa   :  { %105 = vmatpush.bf16.msra.mxu0 %v233_v2  ;;  %242 = vmatpush.bf16.msra.mxu1 %v233_v2 }
   0xb   :  { %243 = vmatpush.bf16.msra.mxu2 %v233_v2  ;;  %244 = vmatpush.bf16.msra.mxu3 %v233_v2 }
   0xe   :  { %106 = vmatpush.bf16.msra.mxu0 %v232_v3  ;;  %245 = vmatpush.bf16.msra.mxu1 %v232_v3 }
   0xf   :  { %246 = vmatpush.bf16.msra.mxu2 %v232_v3  ;;  %247 = vmatpush.bf16.msra.mxu3 %v232_v3 }
  0x11   :  { %224 = vmatmul.msk.bf16.vlgmr.msra.gmra.mxu0 %vm74_vm0, %v34_v12  ;;  %226 = vmatmul.msk.bf16.vlgmr.msra.gmra.mxu1 %vm74_vm0, %v36_v13 }
  0x12   :  { %228 = vmatmul.msk.bf16.vlgmr.msra.gmra.mxu2 %vm74_vm0, %v38_v14  ;;  %230 = vmatmul.msk.bf16.vlgmr.msra.gmra.mxu3 %vm74_vm0, %v40_v15 }
  0x21   :  { %225 = vmatmul.msk.bf16.gmra.mxu0 %vm74_vm0, %v35_v24  ;;  %227 = vmatmul.msk.bf16.gmra.mxu1 %vm74_vm0, %v37_v25 }
  0x22   :  { %229 = vmatmul.msk.bf16.gmra.mxu2 %vm74_vm0, %v39_v26  ;;  %231 = vmatmul.msk.bf16.gmra.mxu3 %vm74_vm0, %v41_v27 }
  0x8e   :  { %v108_v30 = vpop.f32.mrf.mxu0  ;;  %v118_v31 = vpop.f32.mrf.mxu1 }
  0x8f   :  { %v152_v32 = vmul.f32 %v248_v28, %v108_v30  ;;  %v156_v33 = vmul.f32 %v248_v28, %v118_v31 }
  0x91   :  { %v172_v34 = vadd.f32 %v349_v29, %v152_v32  ;;  %v176_v35 = vadd.f32 %v349_v29, %v156_v33 }
  0x93   :  { %188 = vst [vmem:[%s419_s4] sm:$0xff] %v172_v34 }
  0x94   :  { %192 = vst [vmem:[%s419_s4 + $0x20] sm:$0xff] %v176_v35 }
  0x95   :  { %v128_v36 = vpop.f32.mrf.mxu2  ;;  %v138_v37 = vpop.f32.mrf.mxu3 }
  0x96   :  { %v160_v38 = vmul.f32 %v248_v28, %v128_v36  ;;  %v164_v39 = vmul.f32 %v248_v28, %v138_v37  ;;  %v110_v40 = vpop.f32.mrf.mxu0  ;;  %v120_v41 = vpop.f32.mrf.mxu1 }
  0x97   :  { %v153_v42 = vmul.f32 %v248_v28, %v110_v40  ;;  %v157_v43 = vmul.f32 %v248_v28, %v120_v41 }
  0x98   :  { %v180_v44 = vadd.f32 %v349_v29, %v160_v38  ;;  %v184_v45 = vadd.f32 %v349_v29, %v164_v39 }
  0x99   :  { %v173_v46 = vadd.f32 %v349_v29, %v153_v42  ;;  %v177_v47 = vadd.f32 %v349_v29, %v157_v43 }
  0x9a   :  { %196 = vst [vmem:[%s419_s4 + $0x40] sm:$0xff] %v180_v44 }
  0x9b   :  { %200 = vst [vmem:[%s419_s4 + $0x60] sm:$0xff] %v184_v45 }
  0x9c   :  { %189 = vst [vmem:[%s419_s4 + $0x8] sm:$0xff] %v173_v46 }
  0x9d   :  { %193 = vst [vmem:[%s419_s4 + $0x28] sm:$0xff] %v177_v47  ;;  %v130_v48 = vpop.f32.mrf.mxu2  ;;  %v140_v49 = vpop.f32.mrf.mxu3 }
  0x9e   :  { %v161_v50 = vmul.f32 %v248_v28, %v130_v48  ;;  %v165_v51 = vmul.f32 %v248_v28, %v140_v49  ;;  %v113_v52 = vpop.f32.mrf.mxu0  ;;  %v123_v53 = vpop.f32.mrf.mxu1 }
  0x9f   :  { %v154_v54 = vmul.f32 %v248_v28, %v113_v52  ;;  %v158_v55 = vmul.f32 %v248_v28, %v123_v53 }
  0xa0   :  { %v181_v56 = vadd.f32 %v349_v29, %v161_v50  ;;  %v185_v57 = vadd.f32 %v349_v29, %v165_v51 }
  0xa1   :  { %v174_v58 = vadd.f32 %v349_v29, %v154_v54  ;;  %v178_v59 = vadd.f32 %v349_v29, %v158_v55 }
  0xa2   :  { %197 = vst [vmem:[%s419_s4 + $0x48] sm:$0xff] %v181_v56 }
  0xa3   :  { %201 = vst [vmem:[%s419_s4 + $0x68] sm:$0xff] %v185_v57 }
  0xa4   :  { %190 = vst [vmem:[%s419_s4 + $0x10] sm:$0xff] %v174_v58 }
  0xa5   :  { %194 = vst [vmem:[%s419_s4 + $0x30] sm:$0xff] %v178_v59  ;;  %v133_v60 = vpop.f32.mrf.mxu2  ;;  %v143_v61 = vpop.f32.mrf.mxu3 }
  0xa6   :  { %v162_v62 = vmul.f32 %v248_v28, %v133_v60  ;;  %v166_v63 = vmul.f32 %v248_v28, %v143_v61  ;;  %v115_v0 = vpop.f32.mrf.mxu0  ;;  %v125_v1 = vpop.f32.mrf.mxu1 }
  0xa7   :  { %v155_v2 = vmul.f32 %v248_v28, %v115_v0  ;;  %v159_v3 = vmul.f32 %v248_v28, %v125_v1 }
  0xa8   :  { %v182_v4 = vadd.f32 %v349_v29, %v162_v62  ;;  %v186_v5 = vadd.f32 %v349_v29, %v166_v63 }
  0xa9   :  { %v175_v6 = vadd.f32 %v349_v29, %v155_v2  ;;  %v179_v7 = vadd.f32 %v349_v29, %v159_v3 }
  0xaa   :  { %198 = vst [vmem:[%s419_s4 + $0x50] sm:$0xff] %v182_v4 }
  0xab   :  { %202 = vst [vmem:[%s419_s4 + $0x70] sm:$0xff] %v186_v5 }
  0xac   :  { %191 = vst [vmem:[%s419_s4 + $0x18] sm:$0xff] %v175_v6 }
  0xad   :  { %195 = vst [vmem:[%s419_s4 + $0x38] sm:$0xff] %v179_v7  ;;  %v135_v8 = vpop.f32.mrf.mxu2  ;;  %v145_v9 = vpop.f32.mrf.mxu3 }
  0xae   :  { %v163_v10 = vmul.f32 %v248_v28, %v135_v8  ;;  %v167_v11 = vmul.f32 %v248_v28, %v145_v9 }
  0xb0   :  { %v183_v12 = vadd.f32 %v349_v29, %v163_v10  ;;  %v187_v13 = vadd.f32 %v349_v29, %v167_v11 }
  0xb2   :  { %199 = vst [vmem:[%s419_s4 + $0x58] sm:$0xff] %v183_v12 }
  0xb3   :  { %203 = vst [vmem:[%s419_s4 + $0x78] sm:$0xff] %v187_v13 }

// kernel: net_forward.23
= control target key start
LH: loop header
LB: loop body
LE: loop exit
PB: predicated region body
PF: predicated region fallthrough
CT: control target
= control target key end

     0   :  { %vm554_vm0 = vcmask 523264   ;;  %vm896_vm1 = vcmask 519168   ;;  %s1854_s1 = inlined_call_operand.vmem [shape: bf16[576,64], index: 1, kind: input, shape index: {}]   ;;  %s1855_s0 = inlined_call_operand.vmem [shape: bf16[128,576], index: 0, kind: input, shape index: {}]   ;;  %s1856_s2 = inlined_call_operand.vmem [shape: f32[1,64], index: 2, kind: input, shape index: {}]   ;;  %s1857_s3 = inlined_call_operand.vmem [shape: f32[1,64], index: 3, kind: input, shape index: {}]   ;;  %s1858_s4 = inlined_call_operand.vmem [shape: bf16[128,64], index: 4, kind: output, shape index: {}]  }
   0x1   :  { %v1276_v0 = vld [vmem:[%s1854_s1 + $0x38] sm:$0xff]  ;;  %v1275_v1 = vld [vmem:[%s1854_s1 + $0x30] sm:$0xff]  ;;  %v1274_v2 = vld [vmem:[%s1854_s1 + $0x28] sm:$0xff] }
   0x2   :  { %1305 = vmatpush.bf16.msra.mxu1 %v1276_v0  ;;  %1306 = vmatpush.bf16.msra.mxu2 %v1276_v0  ;;  %v1273_v3 = vld [vmem:[%s1854_s1 + $0x20] sm:$0xff]  ;;  %v1272_v4 = vld [vmem:[%s1854_s1 + $0x18] sm:$0xff]  ;;  %v1271_v5 = vld [vmem:[%s1854_s1 + $0x10] sm:$0xff] }
   0x3   :  { %1307 = vmatpush.bf16.msra.mxu3 %v1276_v0  ;;  %579 = vmatpush.bf16.msra.mxu0 %v1276_v0  ;;  %v1270_v6 = vld [vmem:[%s1854_s1 + $0x8] sm:$0xff]  ;;  %v1269_v7 = vld [vmem:[%s1854_s1] sm:$0xff]  ;;  %v959_v8 = vld [vmem:[%s1855_s0 + $0x50] sm:$0xf] }
   0x4   :  { %v1241_v9 = vld [vmem:[%s1855_s0 + $0x60] sm:$0xf0]  ;;  %v999_v10 = vld [vmem:[%s1855_s0 + $0xa0] sm:$0xf]  ;;  %v1251_v11 = vld [vmem:[%s1855_s0 + $0xb0] sm:$0xf0] }
   0x5   :  { %v1039_v12 = vld [vmem:[%s1855_s0 + $0xf0] sm:$0xf]  ;;  %v1261_v13 = vld [vmem:[%s1855_s0 + $0x100] sm:$0xf0]  ;;  %v919_v14 = vld [vmem:[%s1855_s0] sm:$0xf]  ;;  %v960_v18 = vor.u32 %v1241_v9, %v959_v8  ;;  %v1000_v19 = vor.u32 %v1251_v11, %v999_v10 }
   0x6   :  { %1308 = vmatpush.bf16.msra.mxu1 %v1275_v1  ;;  %1309 = vmatpush.bf16.msra.mxu2 %v1275_v1  ;;  %v1231_v15 = vld [vmem:[%s1855_s0 + $0x10] sm:$0xf0]  ;;  %v1292_v16 = vld [vmem:[%s1854_s1 + $0xb8] sm:$0xff]  ;;  %v1040_v20 = vor.u32 %v1261_v13, %v1039_v12  ;;  %v1290_v28 = vld [vmem:[%s1854_s1 + $0xa8] sm:$0xff] }
   0x7   :  { %1310 = vmatpush.bf16.msra.mxu3 %v1275_v1  ;;  %580 = vmatpush.bf16.msra.mxu0 %v1275_v1  ;;  %v1284_v17 = vld [vmem:[%s1854_s1 + $0x78] sm:$0xff]  ;;  %v920_v21 = vor.u32 %v1231_v15, %v919_v14  ;;  %v1291_v24 = vld [vmem:[%s1854_s1 + $0xb0] sm:$0xff]  ;;  %v1282_v29 = vld [vmem:[%s1854_s1 + $0x68] sm:$0xff] }
   0x8   :  { %v1300_v22 = vld [vmem:[%s1854_s1 + $0xf8] sm:$0xff]  ;;  %v1283_v25 = vld [vmem:[%s1854_s1 + $0x70] sm:$0xff]  ;;  %v1298_v30 = vld [vmem:[%s1854_s1 + $0xe8] sm:$0xff] }
   0x9   :  { %v1304_v23 = vld [vmem:[%s1854_s1 + $0x118] sm:$0xff]  ;;  %v1299_v26 = vld [vmem:[%s1854_s1 + $0xf0] sm:$0xff]  ;;  %v1302_v31 = vld [vmem:[%s1854_s1 + $0x108] sm:$0xff] }
   0xa   :  { %1311 = vmatpush.bf16.msra.mxu1 %v1274_v2  ;;  %1312 = vmatpush.bf16.msra.mxu2 %v1274_v2  ;;  %v1303_v27 = vld [vmem:[%s1854_s1 + $0x110] sm:$0xff]  ;;  %v1289_v32 = vld [vmem:[%s1854_s1 + $0xa0] sm:$0xff]  ;;  %v979_v35 = vld [vmem:[%s1855_s0 + $0x78] sm:$0xf] }
   0xb   :  { %1313 = vmatpush.bf16.msra.mxu3 %v1274_v2  ;;  %581 = vmatpush.bf16.msra.mxu0 %v1274_v2  ;;  %v1281_v33 = vld [vmem:[%s1854_s1 + $0x60] sm:$0xff]  ;;  %v1246_v36 = vld [vmem:[%s1855_s0 + $0x88] sm:$0xf0]  ;;  %v1019_v37 = vld [vmem:[%s1855_s0 + $0xc8] sm:$0xf] }
   0xc   :  { %v1297_v34 = vld [vmem:[%s1854_s1 + $0xe0] sm:$0xff]  ;;  %v1256_v38 = vld [vmem:[%s1855_s0 + $0xd8] sm:$0xf0]  ;;  %v1059_v39 = vld [vmem:[%s1855_s0 + $0x118] sm:$0xf]  ;;  %v980_v46 = vor.u32 %v1246_v36, %v979_v35 }
   0xd   :  { %v1266_v40 = vld [vmem:[%s1855_s0 + $0x128] sm:$0xf0]  ;;  %v939_v41 = vld [vmem:[%s1855_s0 + $0x28] sm:$0xf]  ;;  %v1236_v42 = vld [vmem:[%s1855_s0 + $0x38] sm:$0xf0]  ;;  %v1020_v47 = vor.u32 %v1256_v38, %v1019_v37 }
   0xe   :  { %1314 = vmatpush.bf16.msra.mxu1 %v1273_v3  ;;  %1315 = vmatpush.bf16.msra.mxu2 %v1273_v3  ;;  %v1301_v43 = vld [vmem:[%s1854_s1 + $0x100] sm:$0xff]  ;;  %v1288_v44 = vld [vmem:[%s1854_s1 + $0x98] sm:$0xff]  ;;  %v1060_v48 = vor.u32 %v1266_v40, %v1059_v39  ;;  %v940_v49 = vor.u32 %v1236_v42, %v939_v41  ;;  %v1287_v51 = vld [vmem:[%s1854_s1 + $0x90] sm:$0xff] }
   0xf   :  { %1316 = vmatpush.bf16.msra.mxu3 %v1273_v3  ;;  %582 = vmatpush.bf16.msra.mxu0 %v1273_v3  ;;  %v1280_v45 = vld [vmem:[%s1854_s1 + $0x58] sm:$0xff]  ;;  %v1279_v52 = vld [vmem:[%s1854_s1 + $0x50] sm:$0xff]  ;;  %v1286_v54 = vld [vmem:[%s1854_s1 + $0x88] sm:$0xff] }
  0x10   :  { %v1296_v50 = vld [vmem:[%s1854_s1 + $0xd8] sm:$0xff]  ;;  %v1295_v53 = vld [vmem:[%s1854_s1 + $0xd0] sm:$0xff]  ;;  %v1278_v55 = vld [vmem:[%s1854_s1 + $0x48] sm:$0xff] }
  0x11   :  { %v1294_v56 = vld [vmem:[%s1854_s1 + $0xc8] sm:$0xff]  ;;  %v1285_v57 = vld [vmem:[%s1854_s1 + $0x80] sm:$0xff]  ;;  %v921_v61 = vld [vmem:[%s1855_s0 + $0x14] sm:$0xf0] }
  0x12   :  { %1317 = vmatpush.bf16.msra.mxu1 %v1272_v4  ;;  %1318 = vmatpush.bf16.msra.mxu2 %v1272_v4  ;;  %v1277_v58 = vld [vmem:[%s1854_s1 + $0x40] sm:$0xff]  ;;  %v927_v62 = vld [vmem:[%s1855_s0 + $0x8] sm:$0xf]  ;;  %v1232_v63 = vld [vmem:[%s1855_s0 + $0x18] sm:$0xf0] }
  0x13   :  { %1319 = vmatpush.bf16.msra.mxu3 %v1272_v4  ;;  %583 = vmatpush.bf16.msra.mxu0 %v1272_v4  ;;  %v1293_v59 = vld [vmem:[%s1854_s1 + $0xc0] sm:$0xff]  ;;  %v1230_v0 = vld [vmem:[%s1855_s0 + $0xc] sm:$0xf]  ;;  %v935_v2 = vld [vmem:[%s1855_s0 + $0x10] sm:$0xf] }
  0x14   :  { %v1229_v60 = vld [vmem:[%s1855_s0 + $0x4] sm:$0xf]  ;;  %v929_v1 = vld [vmem:[%s1855_s0 + $0x1c] sm:$0xf0]  ;;  %v1234_v8 = vld [vmem:[%s1855_s0 + $0x2c] sm:$0xf] }
  0x15   :  { %v1233_v3 = vld [vmem:[%s1855_s0 + $0x20] sm:$0xf0]  ;;  %v924_v4 = vor.u32 %v1229_v60, %v921_v61  ;;  %v941_v9 = vld [vmem:[%s1855_s0 + $0x3c] sm:$0xf0]  ;;  %v947_v10 = vld [vmem:[%s1855_s0 + $0x30] sm:$0xf] }
  0x16   :  { %1320 = vmatpush.bf16.msra.mxu1 %v1271_v5  ;;  %1321 = vmatpush.bf16.msra.mxu2 %v1271_v5  ;;  %v1237_v11 = vld [vmem:[%s1855_s0 + $0x40] sm:$0xf0]  ;;  %v1235_v12 = vld [vmem:[%s1855_s0 + $0x34] sm:$0xf]  ;;  %v949_v13 = vld [vmem:[%s1855_s0 + $0x44] sm:$0xf0] }
  0x17   :  { %1322 = vmatpush.bf16.msra.mxu3 %v1271_v5  ;;  %584 = vmatpush.bf16.msra.mxu0 %v1271_v5  ;;  %v928_v5 = vor.u32 %v1232_v63, %v927_v62  ;;  %v955_v14 = vld [vmem:[%s1855_s0 + $0x38] sm:$0xf]  ;;  %v1238_v15 = vld [vmem:[%s1855_s0 + $0x48] sm:$0xf0]  ;;  %v1247_v35 = vld [vmem:[%s1855_s0 + $0x90] sm:$0xf0] }
  0x18   :  { %v1245_v36 = vld [vmem:[%s1855_s0 + $0x84] sm:$0xf]  ;;  %v989_v37 = vld [vmem:[%s1855_s0 + $0x94] sm:$0xf0]  ;;  %v995_v38 = vld [vmem:[%s1855_s0 + $0x88] sm:$0xf] }
  0x19   :  { %v1248_v39 = vld [vmem:[%s1855_s0 + $0x98] sm:$0xf0]  ;;  %v992_v42 = vor.u32 %v1245_v36, %v989_v37  ;;  %v1255_v60 = vld [vmem:[%s1855_s0 + $0xd4] sm:$0xf]  ;;  %v1029_v61 = vld [vmem:[%s1855_s0 + $0xe4] sm:$0xf0] }
  0x1a   :  { %1323 = vmatpush.bf16.msra.mxu1 %v1270_v6  ;;  %1324 = vmatpush.bf16.msra.mxu2 %v1270_v6  ;;  %v1035_v62 = vld [vmem:[%s1855_s0 + $0xd8] sm:$0xf]  ;;  %v1258_v63 = vld [vmem:[%s1855_s0 + $0xe8] sm:$0xf0] }
  0x1b   :  { %1325 = vmatpush.bf16.msra.mxu3 %v1270_v6  ;;  %585 = vmatpush.bf16.msra.mxu0 %v1270_v6  ;;  %v932_v6 = vor.u32 %v1230_v0, %v929_v1 }
  0x1e   :  { %1326 = vmatpush.bf16.msra.mxu1 %v1269_v7  ;;  %1327 = vmatpush.bf16.msra.mxu2 %v1269_v7 }
  0x1f   :  { %1328 = vmatpush.bf16.msra.mxu3 %v1269_v7  ;;  %586 = vmatpush.bf16.msra.mxu0 %v1269_v7  ;;  %v936_v7 = vor.u32 %v1233_v3, %v935_v2  ;;  %v1032_v2 = vor.u32 %v1255_v60, %v1029_v61  ;;  %v1036_v3 = vor.u32 %v1258_v63, %v1035_v62 }
  0x21   :  { %597 = vmatmul.bf16.vlgmr.msra.gmra.mxu1 %v960_v18  ;;  %607 = vmatmul.bf16.vlgmr.msra.gmra.mxu2 %v1000_v19  ;;  %v952_v18 = vor.u32 %v1235_v12, %v949_v13  ;;  %v956_v19 = vor.u32 %v1238_v15, %v955_v14 }
  0x22   :  { %677 = vmatpush.bf16.msrb.mxu2 %v1292_v16  ;;  %628 = vmatpush.bf16.msrb.mxu1 %v1284_v17  ;;  %v944_v16 = vor.u32 %v1234_v8, %v941_v9  ;;  %v948_v17 = vor.u32 %v1237_v11, %v947_v10  ;;  %v1260_v8 = vld [vmem:[%s1855_s0 + $0xfc] sm:$0xf]  ;;  %v1049_v9 = vld [vmem:[%s1855_s0 + $0x10c] sm:$0xf0]  ;;  %v1055_v10 = vld [vmem:[%s1855_s0 + $0x100] sm:$0xf] }
  0x23   :  { %617 = vmatmul.bf16.vlgmr.msra.gmra.mxu3 %v1040_v20  ;;  %587 = vmatmul.bf16.vlgmr.msra.gmra.mxu0 %v920_v21  ;;  %v1239_v20 = vld [vmem:[%s1855_s0 + $0x54] sm:$0xf]  ;;  %v961_v21 = vld [vmem:[%s1855_s0 + $0x64] sm:$0xf0]  ;;  %v1052_v15 = vor.u32 %v1260_v8, %v1049_v9 }
  0x24   :  { %726 = vmatpush.bf16.msrb.mxu3 %v1300_v22  ;;  %779 = vmatpush.bf16.msrb.mxu0 %v1304_v23  ;;  %v967_v22 = vld [vmem:[%s1855_s0 + $0x58] sm:$0xf]  ;;  %v1242_v23 = vld [vmem:[%s1855_s0 + $0x68] sm:$0xf0]  ;;  %v1263_v11 = vld [vmem:[%s1855_s0 + $0x110] sm:$0xf0] }
  0x26   :  { %678 = vmatpush.bf16.msrb.mxu2 %v1291_v24  ;;  %629 = vmatpush.bf16.msrb.mxu1 %v1283_v25  ;;  %v1240_v24 = vld [vmem:[%s1855_s0 + $0x5c] sm:$0xf]  ;;  %v969_v25 = vld [vmem:[%s1855_s0 + $0x6c] sm:$0xf0] }
  0x28   :  { %727 = vmatpush.bf16.msrb.mxu3 %v1299_v26  ;;  %780 = vmatpush.bf16.msrb.mxu0 %v1303_v27  ;;  %v975_v26 = vld [vmem:[%s1855_s0 + $0x60] sm:$0xf]  ;;  %v1243_v27 = vld [vmem:[%s1855_s0 + $0x70] sm:$0xf0] }
  0x2a   :  { %679 = vmatpush.bf16.msrb.mxu2 %v1290_v28  ;;  %630 = vmatpush.bf16.msrb.mxu1 %v1282_v29  ;;  %v964_v28 = vor.u32 %v1239_v20, %v961_v21  ;;  %v968_v29 = vor.u32 %v1242_v23, %v967_v22  ;;  %v1264_v22 = vld [vmem:[%s1855_s0 + $0x11c] sm:$0xf]  ;;  %v1061_v23 = vld [vmem:[%s1855_s0 + $0x12c] sm:$0xf0] }
  0x2c   :  { %728 = vmatpush.bf16.msrb.mxu3 %v1298_v30  ;;  %781 = vmatpush.bf16.msrb.mxu0 %v1302_v31  ;;  %v972_v30 = vor.u32 %v1240_v24, %v969_v25  ;;  %v976_v31 = vor.u32 %v1243_v27, %v975_v26  ;;  %v1067_v24 = vld [vmem:[%s1855_s0 + $0x120] sm:$0xf]  ;;  %v1267_v25 = vld [vmem:[%s1855_s0 + $0x130] sm:$0xf0]  ;;  %v1265_v26 = vld [vmem:[%s1855_s0 + $0x124] sm:$0xf] }
  0x2d   :  { %v1069_v27 = vld [vmem:[%s1855_s0 + $0x134] sm:$0xf0] }
  0x2e   :  { %680 = vmatpush.bf16.msrb.mxu2 %v1289_v32  ;;  %631 = vmatpush.bf16.msrb.mxu1 %v1281_v33  ;;  %v1244_v32 = vld [vmem:[%s1855_s0 + $0x7c] sm:$0xf]  ;;  %v981_v33 = vld [vmem:[%s1855_s0 + $0x8c] sm:$0xf0] }
  0x2f   :  { %v984_v40 = vor.u32 %v1244_v32, %v981_v33  ;;  %v1064_v32 = vor.u32 %v1264_v22, %v1061_v23  ;;  %v1068_v33 = vor.u32 %v1267_v25, %v1067_v24 }
  0x30   :  { %729 = vmatpush.bf16.msrb.mxu3 %v1297_v34  ;;  %782 = vmatpush.bf16.msrb.mxu0 %v1301_v43  ;;  %v987_v34 = vld [vmem:[%s1855_s0 + $0x80] sm:$0xf]  ;;  %v996_v43 = vor.u32 %v1248_v39, %v995_v38 }
  0x31   :  { %602 = vmatmul.bf16.gmra.mxu1 %v980_v46  ;;  %612 = vmatmul.bf16.gmra.mxu2 %v1020_v47  ;;  %v988_v41 = vor.u32 %v1247_v35, %v987_v34  ;;  %v1007_v46 = vld [vmem:[%s1855_s0 + $0xa8] sm:$0xf]  ;;  %v1252_v47 = vld [vmem:[%s1855_s0 + $0xb8] sm:$0xf0]  ;;  %v1072_v35 = vor.u32 %v1265_v26, %v1069_v27 }
  0x32   :  { %681 = vmatpush.bf16.msrb.mxu2 %v1288_v44  ;;  %632 = vmatpush.bf16.msrb.mxu1 %v1280_v45  ;;  %v1249_v44 = vld [vmem:[%s1855_s0 + $0xa4] sm:$0xf]  ;;  %v1001_v45 = vld [vmem:[%s1855_s0 + $0xb4] sm:$0xf0] }
  0x33   :  { %622 = vmatmul.bf16.gmra.mxu3 %v1060_v48  ;;  %592 = vmatmul.bf16.gmra.mxu0 %v940_v49  ;;  %v1250_v48 = vld [vmem:[%s1855_s0 + $0xac] sm:$0xf]  ;;  %v1009_v49 = vld [vmem:[%s1855_s0 + $0xbc] sm:$0xf0] }
  0x34   :  { %730 = vmatpush.bf16.msrb.mxu3 %v1296_v50  ;;  %v1015_v50 = vld [vmem:[%s1855_s0 + $0xb0] sm:$0xf] }
  0x36   :  { %682 = vmatpush.bf16.msrb.mxu2 %v1287_v51  ;;  %633 = vmatpush.bf16.msrb.mxu1 %v1279_v52  ;;  %v1253_v51 = vld [vmem:[%s1855_s0 + $0xc0] sm:$0xf0]  ;;  %v1004_v52 = vor.u32 %v1249_v44, %v1001_v45 }
  0x38   :  { %731 = vmatpush.bf16.msrb.mxu3 %v1295_v53  ;;  %v1008_v53 = vor.u32 %v1252_v47, %v1007_v46 }
  0x3a   :  { %683 = vmatpush.bf16.msrb.mxu2 %v1286_v54  ;;  %634 = vmatpush.bf16.msrb.mxu1 %v1278_v55  ;;  %v1012_v54 = vor.u32 %v1250_v48, %v1009_v49  ;;  %v1016_v55 = vor.u32 %v1253_v51, %v1015_v50 }
  0x3c   :  { %732 = vmatpush.bf16.msrb.mxu3 %v1294_v56  ;;  %v1254_v56 = vld [vmem:[%s1855_s0 + $0xcc] sm:$0xf] }
  0x3e   :  { %684 = vmatpush.bf16.msrb.mxu2 %v1285_v57  ;;  %635 = vmatpush.bf16.msrb.mxu1 %v1277_v58  ;;  %v1021_v57 = vld [vmem:[%s1855_s0 + $0xdc] sm:$0xf0]  ;;  %v1027_v58 = vld [vmem:[%s1855_s0 + $0xd0] sm:$0xf] }
  0x3f   :  { %v1024_v0 = vor.u32 %v1254_v56, %v1021_v57 }
  0x40   :  { %733 = vmatpush.bf16.msrb.mxu3 %v1293_v59  ;;  %v1257_v59 = vld [vmem:[%s1855_s0 + $0xe0] sm:$0xf0] }
  0x41   :  { %636 = vmatmul.bf16.vlgmr.msrb.gmra.mxu1 %v924_v4  ;;  %685 = vmatmul.bf16.vlgmr.msrb.gmra.mxu2 %v928_v5  ;;  %v1028_v1 = vor.u32 %v1257_v59, %v1027_v58  ;;  %v1259_v4 = vld [vmem:[%s1855_s0 + $0xf4] sm:$0xf]  ;;  %v1041_v5 = vld [vmem:[%s1855_s0 + $0x104] sm:$0xf0] }
  0x42   :  { %v1044_v12 = vor.u32 %v1259_v4, %v1041_v5 }
  0x43   :  { %734 = vmatmul.bf16.vlgmr.msrb.gmra.mxu3 %v932_v6  ;;  %1221 = vmatmul.msk.bf16.vlgmr.msrb.gmra.mxu0 %vm554_vm0, %v936_v7  ;;  %v1047_v6 = vld [vmem:[%s1855_s0 + $0xf8] sm:$0xf]  ;;  %v1262_v7 = vld [vmem:[%s1855_s0 + $0x108] sm:$0xf0] }
  0x44   :  { %v1048_v13 = vor.u32 %v1262_v7, %v1047_v6 }
  0x51   :  { %641 = vmatmul.bf16.gmra.mxu1 %v944_v16  ;;  %690 = vmatmul.bf16.gmra.mxu2 %v948_v17  ;;  %v1056_v16 = vor.u32 %v1263_v11, %v1055_v10 }
  0x53   :  { %739 = vmatmul.bf16.gmra.mxu3 %v952_v18  ;;  %1222 = vmatmul.msk.bf16.gmra.mxu0 %vm554_vm0, %v956_v19 }
  0x61   :  { %646 = vmatmul.bf16.gmra.mxu1 %v964_v28  ;;  %695 = vmatmul.bf16.gmra.mxu2 %v968_v29  ;;  %v1075_v28 = vld [vmem:[%s1855_s0 + $0x128] sm:$0xf]  ;;  %v1268_v29 = vld [vmem:[%s1855_s0 + $0x138] sm:$0xf0] }
  0x62   :  { %v1076_v36 = vor.u32 %v1268_v29, %v1075_v28 }
  0x63   :  { %744 = vmatmul.bf16.gmra.mxu3 %v972_v30  ;;  %1223 = vmatmul.msk.bf16.gmra.mxu0 %vm554_vm0, %v976_v31 }
  0x71   :  { %651 = vmatmul.bf16.gmra.mxu1 %v984_v40  ;;  %700 = vmatmul.bf16.gmra.mxu2 %v988_v41 }
  0x73   :  { %749 = vmatmul.bf16.gmra.mxu3 %v992_v42  ;;  %1224 = vmatmul.msk.bf16.gmra.mxu0 %vm554_vm0, %v996_v43 }
  0x81   :  { %656 = vmatmul.bf16.gmra.mxu1 %v1004_v52  ;;  %705 = vmatmul.bf16.gmra.mxu2 %v1008_v53  ;;  %v1739_v52 = vld [vmem:[%s1856_s2] ss:$0 sm:$0xff] }
  0x83   :  { %754 = vmatmul.bf16.gmra.mxu3 %v1012_v54  ;;  %1225 = vmatmul.msk.bf16.gmra.mxu0 %vm554_vm0, %v1016_v55  ;;  %v1744_v55 = vld [vmem:[%s1857_s3] ss:$0 sm:$0xff] }
  0x91   :  { %661 = vmatmul.bf16.gmra.mxu1 %v1024_v0  ;;  %710 = vmatmul.bf16.gmra.mxu2 %v1028_v1 }
  0x93   :  { %759 = vmatmul.bf16.gmra.mxu3 %v1032_v2  ;;  %1226 = vmatmul.msk.bf16.gmra.mxu0 %vm554_vm0, %v1036_v3 }
  0x9e   :  { %v1686_v14 = vpop.f32.mrf.mxu1 }
  0xa0   :  { %v588_v17 = vpop.f32.mrf.mxu0 }
  0xa1   :  { %666 = vmatmul.bf16.gmra.mxu1 %v1044_v12  ;;  %715 = vmatmul.bf16.gmra.mxu2 %v1048_v13 }
  0xa3   :  { %764 = vmatmul.bf16.gmra.mxu3 %v1052_v15  ;;  %1227 = vmatmul.msk.bf16.gmra.mxu0 %vm554_vm0, %v1056_v16 }
  0xa4   :  { %v1689_v18 = vpop.f32.mrf.mxu2 }
  0xa6   :  { %v1691_v19 = vpop.f32.mrf.mxu3  ;;  %v1693_v20 = vpop.f32.mrf.mxu1 }
  0xa8   :  { %v590_v21 = vpop.f32.mrf.mxu0 }
  0xac   :  { %v1719_v30 = vpop.f32.mrf.mxu2 }
  0xae   :  { %v1721_v31 = vpop.f32.mrf.mxu3  ;;  %v1723_v34 = vpop.f32.mrf.mxu1 }
  0xb0   :  { %v593_v37 = vpop.f32.mrf.mxu0 }
  0xb1   :  { %671 = vmatmul.bf16.gmra.mxu1 %v1064_v32  ;;  %720 = vmatmul.bf16.gmra.mxu2 %v1068_v33 }
  0xb3   :  { %769 = vmatmul.bf16.gmra.mxu3 %v1072_v35  ;;  %1228 = vmatmul.msk.bf16.gmra.mxu0 %vm554_vm0, %v1076_v36 }
  0xb4   :  { %v1726_v38 = vpop.f32.mrf.mxu2 }
  0xb6   :  { %v1728_v39 = vpop.f32.mrf.mxu3  ;;  %v1730_v40 = vpop.f32.mrf.mxu1 }
  0xb8   :  { %v595_v41 = vpop.f32.mrf.mxu0 }
  0xbc   :  { %v1732_v42 = vpop.f32.mrf.mxu2 }
  0xbe   :  { %v1734_v43 = vpop.f32.mrf.mxu3  ;;  %v637_v44 = vpop.f32.mrf.mxu1 }
  0xbf   :  { %v638_v46 = vadd.f32 %v637_v44, %v588_v17 }
  0xc0   :  { %v784_v45 = vpop.f32.mrf.mxu0 }
  0xc4   :  { %v686_v47 = vpop.f32.mrf.mxu2 }
  0xc5   :  { %v687_v48 = vadd.f32 %v686_v47, %v638_v46 }
  0xc6   :  { %v735_v49 = vpop.f32.mrf.mxu3  ;;  %v639_v50 = vpop.f32.mrf.mxu1 }
  0xc7   :  { %v736_v51 = vadd.f32 %v735_v49, %v687_v48  ;;  %v640_v57 = vadd.f32 %v639_v50, %v590_v21 }
  0xc8   :  { %v786_v53 = vpop.f32.mrf.mxu0 }
  0xc9   :  { %v785_v54 = vadd.f32 %v784_v45, %v736_v51 }
  0xcb   :  { %v828_v56 = vmul.f32 %v1739_v52, %v785_v54 }
  0xcc   :  { %v688_v58 = vpop.f32.mrf.mxu2 }
  0xcd   :  { %v848_v59 = vadd.f32 %v1744_v55, %v828_v56  ;;  %v689_v60 = vadd.f32 %v688_v58, %v640_v57 }
  0xce   :  { %v737_v61 = vpop.f32.mrf.mxu3  ;;  %v642_v62 = vpop.f32.mrf.mxu1 }
  0xcf   :  { %v864_v63 = vmax.f32 %v848_v59, 0.0  ;;  %v738_v0 = vadd.f32 %v737_v61, %v689_v60  ;;  %v643_v5 = vadd.f32 %v642_v62, %v593_v37 }
  0xd0   :  { %v789_v1 = vpop.f32.mrf.mxu0 }
  0xd1   :  { %v880_v2 = vpack.c.bf16 %v864_v63, %v864_v63  ;;  %v787_v3 = vadd.f32 %v786_v53, %v738_v0 }
  0xd3   :  { %897 = vst.msk [vmem:[%s1858_s4] sm:$0xf] %vm896_vm1, %v880_v2  ;;  %v829_v4 = vmul.f32 %v1739_v52, %v787_v3 }
  0xd4   :  { %v691_v6 = vpop.f32.mrf.mxu2 }
  0xd5   :  { %v849_v7 = vadd.f32 %v1744_v55, %v829_v4  ;;  %v692_v8 = vadd.f32 %v691_v6, %v643_v5 }
  0xd6   :  { %v740_v9 = vpop.f32.mrf.mxu3  ;;  %v644_v10 = vpop.f32.mrf.mxu1 }
  0xd7   :  { %v865_v11 = vmax.f32 %v849_v7, 0.0  ;;  %v741_v12 = vadd.f32 %v740_v9, %v692_v8  ;;  %v645_v21 = vadd.f32 %v644_v10, %v595_v41 }
  0xd8   :  { %v791_v13 = vpop.f32.mrf.mxu0 }
  0xd9   :  { %v881_v15 = vpack.c.bf16 %v865_v11, %v865_v11  ;;  %v790_v16 = vadd.f32 %v789_v1, %v741_v12 }
  0xdb   :  { %898 = vst.msk [vmem:[%s1858_s4 + $0x4] sm:$0xf] %vm896_vm1, %v881_v15  ;;  %v830_v17 = vmul.f32 %v1739_v52, %v790_v16 }
  0xdc   :  { %v693_v22 = vpop.f32.mrf.mxu2 }
  0xdd   :  { %v850_v23 = vadd.f32 %v1744_v55, %v830_v17  ;;  %v694_v24 = vadd.f32 %v693_v22, %v645_v21 }
  0xde   :  { %v742_v25 = vpop.f32.mrf.mxu3  ;;  %v647_v26 = vpop.f32.mrf.mxu1 }
  0xdf   :  { %v866_v27 = vmax.f32 %v850_v23, 0.0  ;;  %v743_v28 = vadd.f32 %v742_v25, %v694_v24  ;;  %v648_v36 = vadd.f32 %v647_v26, %v1686_v14 }
  0xe0   :  { %v794_v29 = vpop.f32.mrf.mxu0 }
  0xe1   :  { %v882_v32 = vpack.c.bf16 %v866_v27, %v866_v27  ;;  %v792_v33 = vadd.f32 %v791_v13, %v743_v28 }
  0xe3   :  { %899 = vst.msk [vmem:[%s1858_s4 + $0x8] sm:$0xf] %vm896_vm1, %v882_v32  ;;  %v831_v35 = vmul.f32 %v1739_v52, %v792_v33 }
  0xe4   :  { %v696_v37 = vpop.f32.mrf.mxu2 }
  0xe5   :  { %v851_v41 = vadd.f32 %v1744_v55, %v831_v35  ;;  %v697_v44 = vadd.f32 %v696_v37, %v648_v36 }
  0xe6   :  { %v745_v45 = vpop.f32.mrf.mxu3  ;;  %v649_v46 = vpop.f32.mrf.mxu1 }
  0xe7   :  { %v867_v47 = vmax.f32 %v851_v41, 0.0  ;;  %v746_v48 = vadd.f32 %v745_v45, %v697_v44  ;;  %v650_v14 = vadd.f32 %v649_v46, %v1693_v20 }
  0xe8   :  { %v796_v49 = vpop.f32.mrf.mxu0 }
  0xe9   :  { %v883_v50 = vpack.c.bf16 %v867_v47, %v867_v47  ;;  %v795_v51 = vadd.f32 %v794_v29, %v746_v48 }
  0xeb   :  { %900 = vst.msk [vmem:[%s1858_s4 + $0xc] sm:$0xf] %vm896_vm1, %v883_v50  ;;  %v832_v53 = vmul.f32 %v1739_v52, %v795_v51 }
  0xec   :  { %v698_v54 = vpop.f32.mrf.mxu2 }
  0xed   :  { %v852_v56 = vadd.f32 %v1744_v55, %v832_v53  ;;  %v699_v57 = vadd.f32 %v698_v54, %v650_v14 }
  0xee   :  { %v747_v58 = vpop.f32.mrf.mxu3  ;;  %v652_v59 = vpop.f32.mrf.mxu1 }
  0xef   :  { %v868_v60 = vmax.f32 %v852_v56, 0.0  ;;  %v748_v61 = vadd.f32 %v747_v58, %v699_v57  ;;  %v653_v20 = vadd.f32 %v652_v59, %v1723_v34 }
  0xf0   :  { %v799_v62 = vpop.f32.mrf.mxu0 }
  0xf1   :  { %v884_v63 = vpack.c.bf16 %v868_v60, %v868_v60  ;;  %v797_v0 = vadd.f32 %v796_v49, %v748_v61 }
  0xf3   :  { %901 = vst.msk [vmem:[%s1858_s4 + $0x10] sm:$0xf] %vm896_vm1, %v884_v63  ;;  %v833_v1 = vmul.f32 %v1739_v52, %v797_v0 }
  0xf4   :  { %v701_v2 = vpop.f32.mrf.mxu2 }
  0xf5   :  { %v853_v3 = vadd.f32 %v1744_v55, %v833_v1  ;;  %v702_v4 = vadd.f32 %v701_v2, %v653_v20 }
  0xf6   :  { %v750_v5 = vpop.f32.mrf.mxu3  ;;  %v654_v6 = vpop.f32.mrf.mxu1 }
  0xf7   :  { %v869_v7 = vmax.f32 %v853_v3, 0.0  ;;  %v751_v8 = vadd.f32 %v750_v5, %v702_v4  ;;  %v655_v34 = vadd.f32 %v654_v6, %v1730_v40 }
  0xf8   :  { %v801_v9 = vpop.f32.mrf.mxu0 }
  0xf9   :  { %v885_v10 = vpack.c.bf16 %v869_v7, %v869_v7  ;;  %v800_v11 = vadd.f32 %v799_v62, %v751_v8 }
  0xfb   :  { %902 = vst.msk [vmem:[%s1858_s4 + $0x14] sm:$0xf] %vm896_vm1, %v885_v10  ;;  %v834_v12 = vmul.f32 %v1739_v52, %v800_v11 }
  0xfc   :  { %v703_v13 = vpop.f32.mrf.mxu2 }
  0xfd   :  { %v854_v15 = vadd.f32 %v1744_v55, %v834_v12  ;;  %v704_v16 = vadd.f32 %v703_v13, %v655_v34 }
  0xfe   :  { %v752_v17 = vpop.f32.mrf.mxu3  ;;  %v657_v21 = vpop.f32.mrf.mxu1 }
  0xff   :  { %v870_v22 = vmax.f32 %v854_v15, 0.0  ;;  %v753_v23 = vadd.f32 %v752_v17, %v704_v16  ;;  %v658_v40 = vadd.f32 %v657_v21, %v1689_v18 }
 0x100   :  { %v804_v24 = vpop.f32.mrf.mxu0 }
 0x101   :  { %v886_v25 = vpack.c.bf16 %v870_v22, %v870_v22  ;;  %v802_v26 = vadd.f32 %v801_v9, %v753_v23 }
 0x103   :  { %903 = vst.msk [vmem:[%s1858_s4 + $0x18] sm:$0xf] %vm896_vm1, %v886_v25  ;;  %v835_v27 = vmul.f32 %v1739_v52, %v802_v26 }
 0x104   :  { %v706_v28 = vpop.f32.mrf.mxu2 }
 0x105   :  { %v855_v29 = vadd.f32 %v1744_v55, %v835_v27  ;;  %v707_v32 = vadd.f32 %v706_v28, %v658_v40 }
 0x106   :  { %v755_v33 = vpop.f32.mrf.mxu3  ;;  %v659_v35 = vpop.f32.mrf.mxu1 }
 0x107   :  { %v871_v36 = vmax.f32 %v855_v29, 0.0  ;;  %v756_v37 = vadd.f32 %v755_v33, %v707_v32  ;;  %v660_v18 = vadd.f32 %v659_v35, %v1719_v30 }
 0x108   :  { %v806_v41 = vpop.f32.mrf.mxu0 }
 0x109   :  { %v887_v44 = vpack.c.bf16 %v871_v36, %v871_v36  ;;  %v805_v45 = vadd.f32 %v804_v24, %v756_v37 }
 0x10b   :  { %904 = vst.msk [vmem:[%s1858_s4 + $0x1c] sm:$0xf] %vm896_vm1, %v887_v44  ;;  %v836_v46 = vmul.f32 %v1739_v52, %v805_v45 }
 0x10c   :  { %v708_v47 = vpop.f32.mrf.mxu2 }
 0x10d   :  { %v856_v48 = vadd.f32 %v1744_v55, %v836_v46  ;;  %v709_v49 = vadd.f32 %v708_v47, %v660_v18 }
 0x10e   :  { %v757_v50 = vpop.f32.mrf.mxu3  ;;  %v662_v51 = vpop.f32.mrf.mxu1 }
 0x10f   :  { %v872_v53 = vmax.f32 %v856_v48, 0.0  ;;  %v758_v14 = vadd.f32 %v757_v50, %v709_v49  ;;  %v663_v30 = vadd.f32 %v662_v51, %v1726_v38 }
 0x110   :  { %v809_v54 = vpop.f32.mrf.mxu0 }
 0x111   :  { %v888_v56 = vpack.c.bf16 %v872_v53, %v872_v53  ;;  %v807_v57 = vadd.f32 %v806_v41, %v758_v14 }
 0x113   :  { %905 = vst.msk [vmem:[%s1858_s4 + $0x20] sm:$0xf] %vm896_vm1, %v888_v56  ;;  %v837_v58 = vmul.f32 %v1739_v52, %v807_v57 }
 0x114   :  { %v711_v59 = vpop.f32.mrf.mxu2 }
 0x115   :  { %v857_v60 = vadd.f32 %v1744_v55, %v837_v58  ;;  %v712_v61 = vadd.f32 %v711_v59, %v663_v30 }
 0x116   :  { %v760_v62 = vpop.f32.mrf.mxu3  ;;  %v664_v63 = vpop.f32.mrf.mxu1 }
 0x117   :  { %v873_v0 = vmax.f32 %v857_v60, 0.0  ;;  %v761_v1 = vadd.f32 %v760_v62, %v712_v61  ;;  %v665_v38 = vadd.f32 %v664_v63, %v1732_v42 }
 0x118   :  { %v811_v20 = vpop.f32.mrf.mxu0 }
 0x119   :  { %v889_v2 = vpack.c.bf16 %v873_v0, %v873_v0  ;;  %v810_v3 = vadd.f32 %v809_v54, %v761_v1 }
 0x11b   :  { %906 = vst.msk [vmem:[%s1858_s4 + $0x24] sm:$0xf] %vm896_vm1, %v889_v2  ;;  %v838_v4 = vmul.f32 %v1739_v52, %v810_v3 }
 0x11c   :  { %v713_v5 = vpop.f32.mrf.mxu2 }
 0x11d   :  { %v858_v6 = vadd.f32 %v1744_v55, %v838_v4  ;;  %v714_v7 = vadd.f32 %v713_v5, %v665_v38 }
 0x11e   :  { %v762_v8 = vpop.f32.mrf.mxu3  ;;  %v667_v9 = vpop.f32.mrf.mxu1 }
 0x11f   :  { %v874_v10 = vmax.f32 %v858_v6, 0.0  ;;  %v763_v11 = vadd.f32 %v762_v8, %v714_v7  ;;  %v668_v42 = vadd.f32 %v667_v9, %v1691_v19 }
 0x120   :  { %v814_v13 = vpop.f32.mrf.mxu0 }
 0x121   :  { %v890_v12 = vpack.c.bf16 %v874_v10, %v874_v10  ;;  %v812_v34 = vadd.f32 %v811_v20, %v763_v11 }
 0x123   :  { %907 = vst.msk [vmem:[%s1858_s4 + $0x28] sm:$0xf] %vm896_vm1, %v890_v12  ;;  %v839_v15 = vmul.f32 %v1739_v52, %v812_v34 }
 0x124   :  { %v716_v16 = vpop.f32.mrf.mxu2 }
 0x125   :  { %v859_v17 = vadd.f32 %v1744_v55, %v839_v15  ;;  %v717_v21 = vadd.f32 %v716_v16, %v668_v42 }
 0x126   :  { %v765_v22 = vpop.f32.mrf.mxu3  ;;  %v669_v23 = vpop.f32.mrf.mxu1 }
 0x127   :  { %v875_v24 = vmax.f32 %v859_v17, 0.0  ;;  %v766_v25 = vadd.f32 %v765_v22, %v717_v21  ;;  %v670_v28 = vadd.f32 %v669_v23, %v1721_v31 }
 0x128   :  { %v816_v19 = vpop.f32.mrf.mxu0 }
 0x129   :  { %v891_v26 = vpack.c.bf16 %v875_v24, %v875_v24  ;;  %v815_v27 = vadd.f32 %v814_v13, %v766_v25 }
 0x12b   :  { %908 = vst.msk [vmem:[%s1858_s4 + $0x2c] sm:$0xf] %vm896_vm1, %v891_v26  ;;  %v840_v40 = vmul.f32 %v1739_v52, %v815_v27 }
 0x12c   :  { %v718_v29 = vpop.f32.mrf.mxu2 }
 0x12d   :  { %v860_v32 = vadd.f32 %v1744_v55, %v840_v40  ;;  %v719_v33 = vadd.f32 %v718_v29, %v670_v28 }
 0x12e   :  { %v767_v35 = vpop.f32.mrf.mxu3  ;;  %v672_v36 = vpop.f32.mrf.mxu1 }
 0x12f   :  { %v876_v37 = vmax.f32 %v860_v32, 0.0  ;;  %v768_v41 = vadd.f32 %v767_v35, %v719_v33  ;;  %v673_v31 = vadd.f32 %v672_v36, %v1728_v39 }
 0x130   :  { %v819_v50 = vpop.f32.mrf.mxu0 }
 0x131   :  { %v892_v44 = vpack.c.bf16 %v876_v37, %v876_v37  ;;  %v817_v45 = vadd.f32 %v816_v19, %v768_v41 }
 0x133   :  { %909 = vst.msk [vmem:[%s1858_s4 + $0x30] sm:$0xf] %vm896_vm1, %v892_v44  ;;  %v841_v46 = vmul.f32 %v1739_v52, %v817_v45 }
 0x134   :  { %v721_v18 = vpop.f32.mrf.mxu2 }
 0x135   :  { %v861_v47 = vadd.f32 %v1744_v55, %v841_v46  ;;  %v722_v48 = vadd.f32 %v721_v18, %v673_v31 }
 0x136   :  { %v770_v49 = vpop.f32.mrf.mxu3  ;;  %v674_v14 = vpop.f32.mrf.mxu1 }
 0x137   :  { %v877_v51 = vmax.f32 %v861_v47, 0.0  ;;  %v771_v53 = vadd.f32 %v770_v49, %v722_v48  ;;  %v675_v39 = vadd.f32 %v674_v14, %v1734_v43 }
 0x138   :  { %v821_v63 = vpop.f32.mrf.mxu0 }
 0x139   :  { %v893_v54 = vpack.c.bf16 %v877_v51, %v877_v51  ;;  %v820_v56 = vadd.f32 %v819_v50, %v771_v53 }
 0x13b   :  { %910 = vst.msk [vmem:[%s1858_s4 + $0x34] sm:$0xf] %vm896_vm1, %v893_v54  ;;  %v842_v57 = vmul.f32 %v1739_v52, %v820_v56 }
 0x13c   :  { %v723_v58 = vpop.f32.mrf.mxu2 }
 0x13d   :  { %v862_v30 = vadd.f32 %v1744_v55, %v842_v57  ;;  %v724_v59 = vadd.f32 %v723_v58, %v675_v39 }
 0x13e   :  { %v772_v60 = vpop.f32.mrf.mxu3 }
 0x13f   :  { %v878_v61 = vmax.f32 %v862_v30, 0.0  ;;  %v773_v62 = vadd.f32 %v772_v60, %v724_v59 }
 0x141   :  { %v894_v0 = vpack.c.bf16 %v878_v61, %v878_v61  ;;  %v822_v1 = vadd.f32 %v821_v63, %v773_v62 }
 0x143   :  { %911 = vst.msk [vmem:[%s1858_s4 + $0x38] sm:$0xf] %vm896_vm1, %v894_v0  ;;  %v843_v20 = vmul.f32 %v1739_v52, %v822_v1 }
 0x145   :  { %v863_v2 = vadd.f32 %v1744_v55, %v843_v20 }
 0x147   :  { %v879_v43 = vmax.f32 %v863_v2, 0.0 }
 0x149   :  { %v895_v3 = vpack.c.bf16 %v879_v43, %v879_v43 }
 0x14b   :  { %912 = vst.msk [vmem:[%s1858_s4 + $0x3c] sm:$0xf] %vm896_vm1, %v895_v3 }

// kernel: net_forward.26
= control target key start
LH: loop header
LB: loop body
LE: loop exit
PB: predicated region body
PF: predicated region fallthrough
CT: control target
= control target key end

     0   :  { %s158_s0 = inlined_call_operand.vmem [shape: f32[8,2,4,256], index: 0, kind: input, shape index: {}]   ;;  %s159_s1 = inlined_call_operand.vmem [shape: f32[8,4,128], index: 1, kind: output, shape index: {}]  }
   0x1   :  { %v8_v0 = vld [vmem:[%s158_s0] sm:$0xff]  ;;  %v9_v1 = vld [vmem:[%s158_s0 + $0x8] sm:$0xff]  ;;  %v10_v2 = vld [vmem:[%s158_s0 + $0x10] sm:$0xff] }
   0x2   :  { %v24_v3 = vmax.f32 %v8_v0, %v9_v1  ;;  %v11_v4 = vld [vmem:[%s158_s0 + $0x18] sm:$0xff]  ;;  %v12_v5 = vld [vmem:[%s158_s0 + $0x20] sm:$0xff]  ;;  %v13_v6 = vld [vmem:[%s158_s0 + $0x28] sm:$0xff] }
   0x3   :  { %v25_v7 = vmax.f32 %v10_v2, %v11_v4  ;;  %v26_v8 = vmax.f32 %v12_v5, %v13_v6  ;;  %v14_v9 = vld [vmem:[%s158_s0 + $0x30] sm:$0xff]  ;;  %v15_v10 = vld [vmem:[%s158_s0 + $0x38] sm:$0xff]  ;;  %v16_v11 = vld [vmem:[%s158_s0 + $0x40] sm:$0xff] }
   0x4   :  { %v40_v12 = vrot.slane %v24_v3, 4  ;;  %v27_v13 = vmax.f32 %v14_v9, %v15_v10  ;;  %v17_v14 = vld [vmem:[%s158_s0 + $0x48] sm:$0xff]  ;;  %v18_v15 = vld [vmem:[%s158_s0 + $0x50] sm:$0xff]  ;;  %v19_v16 = vld [vmem:[%s158_s0 + $0x58] sm:$0xff] }
   0x5   :  { %v41_v17 = vrot.slane %v25_v7, 4  ;;  %v42_v18 = vrot.slane %v26_v8, 4  ;;  %v28_v19 = vmax.f32 %v16_v11, %v17_v14  ;;  %v29_v20 = vmax.f32 %v18_v15, %v19_v16  ;;  %v20_v21 = vld [vmem:[%s158_s0 + $0x60] sm:$0xff]  ;;  %v21_v22 = vld [vmem:[%s158_s0 + $0x68] sm:$0xff]  ;;  %v22_v23 = vld [vmem:[%s158_s0 + $0x70] sm:$0xff] }
   0x6   :  { %v56_v24 = vmax.f32 %v24_v3, %v40_v12  ;;  %v43_v25 = vrot.slane %v27_v13, 4  ;;  %v30_v26 = vmax.f32 %v20_v21, %v21_v22  ;;  %v23_v27 = vld [vmem:[%s158_s0 + $0x78] sm:$0xff] }
   0x7   :  { %v57_v28 = vmax.f32 %v25_v7, %v41_v17  ;;  %v58_v29 = vmax.f32 %v26_v8, %v42_v18  ;;  %v44_v30 = vrot.slane %v28_v19, 4  ;;  %v45_v31 = vrot.slane %v29_v20, 4 }
   0x8   :  { %64 = vst [vmem:[%s159_s1] sm:$0xf] %v56_v24  ;;  %v59_v32 = vmax.f32 %v27_v13, %v43_v25  ;;  %v46_v33 = vrot.slane %v30_v26, 4  ;;  %v31_v34 = vmax.f32 %v22_v23, %v23_v27 }
   0x9   :  { %65 = vst [vmem:[%s159_s1 + $0x4] sm:$0xf] %v57_v28  ;;  %v60_v35 = vmax.f32 %v28_v19, %v44_v30  ;;  %v61_v36 = vmax.f32 %v29_v20, %v45_v31 }
   0xa   :  { %66 = vst [vmem:[%s159_s1 + $0x8] sm:$0xf] %v58_v29  ;;  %v62_v37 = vmax.f32 %v30_v26, %v46_v33  ;;  %v47_v38 = vrot.slane %v31_v34, 4 }
   0xb   :  { %67 = vst [vmem:[%s159_s1 + $0xc] sm:$0xf] %v59_v32 }
   0xc   :  { %68 = vst [vmem:[%s159_s1 + $0x10] sm:$0xf] %v60_v35  ;;  %v63_v39 = vmax.f32 %v31_v34, %v47_v38 }
   0xd   :  { %69 = vst [vmem:[%s159_s1 + $0x14] sm:$0xf] %v61_v36 }
   0xe   :  { %70 = vst [vmem:[%s159_s1 + $0x18] sm:$0xf] %v62_v37 }
   0xf   :  { %71 = vst [vmem:[%s159_s1 + $0x1c] sm:$0xf] %v63_v39 }

// kernel: net_forward.25
= control target key start
LH: loop header
LB: loop body
LE: loop exit
PB: predicated region body
PF: predicated region fallthrough
CT: control target
= control target key end

     0   :  { %vm109_vm0 = vcmask 523264   ;;  %s569_s1 = inlined_call_operand.vmem [shape: bf16[64,128], index: 1, kind: input, shape index: {}]   ;;  %s570_s2 = inlined_call_operand.vmem [shape: f32[1,128], index: 2, kind: input, shape index: {}]   ;;  %s571_s3 = inlined_call_operand.vmem [shape: f32[1,128], index: 3, kind: input, shape index: {}]   ;;  %s572_s0 = inlined_call_operand.vmem [shape: bf16[128,64], index: 0, kind: input, shape index: {}]   ;;  %s573_s4 = inlined_call_operand.vmem [shape: f32[128,128], index: 4, kind: input, shape index: {}]   ;;  %s574_s5 = inlined_call_operand.vmem [shape: f32[128,128], index: 5, kind: output, shape index: {}]  }
   0x1   :  { %v342_v0 = vld [vmem:[%s569_s1 + $0x18] sm:$0xff]  ;;  %v341_v1 = vld [vmem:[%s569_s1 + $0x10] sm:$0xff]  ;;  %v340_v2 = vld [vmem:[%s569_s1 + $0x8] sm:$0xff] }
   0x2   :  { %138 = vmatpush.bf16.msra.mxu0 %v342_v0  ;;  %343 = vmatpush.bf16.msra.mxu1 %v342_v0  ;;  %v339_v3 = vld [vmem:[%s569_s1] sm:$0xff]  ;;  %v333_v5 = vld [vmem:[%s572_s0 + $0x10] sm:$0xff]  ;;  %v332_v8 = vld [vmem:[%s572_s0 + $0x8] sm:$0xff] }
   0x3   :  { %344 = vmatpush.bf16.msra.mxu2 %v342_v0  ;;  %345 = vmatpush.bf16.msra.mxu3 %v342_v0  ;;  %v331_v4 = vld [vmem:[%s572_s0] sm:$0xff]  ;;  %v337_v7 = vld [vmem:[%s572_s0 + $0x30] sm:$0xff]  ;;  %v334_v9 = vld [vmem:[%s572_s0 + $0x18] sm:$0xff] }
   0x4   :  { %v335_v6 = vld [vmem:[%s572_s0 + $0x20] sm:$0xff]  ;;  %v336_v10 = vld [vmem:[%s572_s0 + $0x28] sm:$0xff]  ;;  %v338_v11 = vld [vmem:[%s572_s0 + $0x38] sm:$0xff] }
   0x5   :  { %v434_v12 = vld [vmem:[%s570_s2] ss:$0 sm:$0xff]  ;;  %v224_v36 = vld [vmem:[%s573_s4 + $0x8] sm:$0xff]  ;;  %v225_v56 = vld [vmem:[%s573_s4 + $0x10] sm:$0xff] }
   0x6   :  { %139 = vmatpush.bf16.msra.mxu0 %v341_v1  ;;  %346 = vmatpush.bf16.msra.mxu1 %v341_v1  ;;  %v439_v13 = vld [vmem:[%s571_s3] ss:$0 sm:$0xff]  ;;  %v228_v37 = vld [vmem:[%s573_s4 + $0x28] sm:$0xff]  ;;  %v229_v57 = vld [vmem:[%s573_s4 + $0x30] sm:$0xff] }
   0x7   :  { %347 = vmatpush.bf16.msra.mxu2 %v341_v1  ;;  %348 = vmatpush.bf16.msra.mxu3 %v341_v1  ;;  %v223_v18 = vld [vmem:[%s573_s4] sm:$0xff]  ;;  %v232_v50 = vld [vmem:[%s573_s4 + $0x48] sm:$0xff] }
   0x8   :  { %v227_v19 = vld [vmem:[%s573_s4 + $0x20] sm:$0xff]  ;;  %v236_v51 = vld [vmem:[%s573_s4 + $0x68] sm:$0xff] }
   0x9   :  { %v231_v30 = vld [vmem:[%s573_s4 + $0x40] sm:$0xff] }
   0xa   :  { %140 = vmatpush.bf16.msra.mxu0 %v340_v2  ;;  %349 = vmatpush.bf16.msra.mxu1 %v340_v2  ;;  %v235_v31 = vld [vmem:[%s573_s4 + $0x60] sm:$0xff] }
   0xb   :  { %350 = vmatpush.bf16.msra.mxu2 %v340_v2  ;;  %351 = vmatpush.bf16.msra.mxu3 %v340_v2 }
   0xe   :  { %141 = vmatpush.bf16.msra.mxu0 %v339_v3  ;;  %352 = vmatpush.bf16.msra.mxu1 %v339_v3 }
   0xf   :  { %353 = vmatpush.bf16.msra.mxu2 %v339_v3  ;;  %354 = vmatpush.bf16.msra.mxu3 %v339_v3 }
  0x11   :  { %323 = vmatmul.msk.bf16.vlgmr.msra.gmra.mxu0 %vm109_vm0, %v331_v4  ;;  %325 = vmatmul.msk.bf16.vlgmr.msra.gmra.mxu1 %vm109_vm0, %v333_v5 }
  0x12   :  { %327 = vmatmul.msk.bf16.vlgmr.msra.gmra.mxu2 %vm109_vm0, %v335_v6  ;;  %329 = vmatmul.msk.bf16.vlgmr.msra.gmra.mxu3 %vm109_vm0, %v337_v7  ;;  %v233_v6 = vld [vmem:[%s573_s4 + $0x50] sm:$0xff] }
  0x13   :  { %v237_v7 = vld [vmem:[%s573_s4 + $0x70] sm:$0xff] }
  0x21   :  { %324 = vmatmul.msk.bf16.gmra.mxu0 %vm109_vm0, %v332_v8  ;;  %326 = vmatmul.msk.bf16.gmra.mxu1 %vm109_vm0, %v334_v9 }
  0x22   :  { %328 = vmatmul.msk.bf16.gmra.mxu2 %vm109_vm0, %v336_v10  ;;  %330 = vmatmul.msk.bf16.gmra.mxu3 %vm109_vm0, %v338_v11 }
  0x8e   :  { %v143_v14 = vpop.f32.mrf.mxu0  ;;  %v153_v15 = vpop.f32.mrf.mxu1 }
  0x8f   :  { %v187_v16 = vmul.f32 %v434_v12, %v143_v14  ;;  %v191_v17 = vmul.f32 %v434_v12, %v153_v15  ;;  %v226_v14 = vld [vmem:[%s573_s4 + $0x18] sm:$0xff] }
  0x90   :  { %v230_v15 = vld [vmem:[%s573_s4 + $0x38] sm:$0xff] }
  0x91   :  { %v207_v20 = vadd.f32 %v439_v13, %v187_v16  ;;  %v211_v21 = vadd.f32 %v439_v13, %v191_v17 }
  0x93   :  { %v239_v22 = vadd.f32 %v223_v18, %v207_v20  ;;  %v243_v23 = vadd.f32 %v227_v19, %v211_v21 }
  0x95   :  { %255 = vst [vmem:[%s574_s5] sm:$0xff] %v239_v22  ;;  %v163_v24 = vpop.f32.mrf.mxu2  ;;  %v173_v25 = vpop.f32.mrf.mxu3 }
  0x96   :  { %259 = vst [vmem:[%s574_s5 + $0x20] sm:$0xff] %v243_v23  ;;  %v195_v26 = vmul.f32 %v434_v12, %v163_v24  ;;  %v199_v27 = vmul.f32 %v434_v12, %v173_v25  ;;  %v145_v28 = vpop.f32.mrf.mxu0  ;;  %v155_v29 = vpop.f32.mrf.mxu1 }
  0x97   :  { %v188_v32 = vmul.f32 %v434_v12, %v145_v28  ;;  %v192_v33 = vmul.f32 %v434_v12, %v155_v29 }
  0x98   :  { %v215_v34 = vadd.f32 %v439_v13, %v195_v26  ;;  %v219_v35 = vadd.f32 %v439_v13, %v199_v27  ;;  %v234_v26 = vld [vmem:[%s573_s4 + $0x58] sm:$0xff] }
  0x99   :  { %v208_v38 = vadd.f32 %v439_v13, %v188_v32  ;;  %v212_v39 = vadd.f32 %v439_v13, %v192_v33  ;;  %v238_v27 = vld [vmem:[%s573_s4 + $0x78] sm:$0xff] }
  0x9a   :  { %v247_v40 = vadd.f32 %v231_v30, %v215_v34  ;;  %v251_v41 = vadd.f32 %v235_v31, %v219_v35 }
  0x9b   :  { %v240_v42 = vadd.f32 %v224_v36, %v208_v38  ;;  %v244_v43 = vadd.f32 %v228_v37, %v212_v39 }
  0x9c   :  { %263 = vst [vmem:[%s574_s5 + $0x40] sm:$0xff] %v247_v40 }
  0x9d   :  { %267 = vst [vmem:[%s574_s5 + $0x60] sm:$0xff] %v251_v41  ;;  %v165_v44 = vpop.f32.mrf.mxu2  ;;  %v175_v45 = vpop.f32.mrf.mxu3 }
  0x9e   :  { %256 = vst [vmem:[%s574_s5 + $0x8] sm:$0xff] %v240_v42  ;;  %v196_v46 = vmul.f32 %v434_v12, %v165_v44  ;;  %v200_v47 = vmul.f32 %v434_v12, %v175_v45  ;;  %v148_v48 = vpop.f32.mrf.mxu0  ;;  %v158_v49 = vpop.f32.mrf.mxu1 }
  0x9f   :  { %260 = vst [vmem:[%s574_s5 + $0x28] sm:$0xff] %v244_v43  ;;  %v189_v52 = vmul.f32 %v434_v12, %v148_v48  ;;  %v193_v53 = vmul.f32 %v434_v12, %v158_v49 }
  0xa0   :  { %v216_v54 = vadd.f32 %v439_v13, %v196_v46  ;;  %v220_v55 = vadd.f32 %v439_v13, %v200_v47 }
  0xa1   :  { %v209_v58 = vadd.f32 %v439_v13, %v189_v52  ;;  %v213_v59 = vadd.f32 %v439_v13, %v193_v53 }
  0xa2   :  { %v248_v60 = vadd.f32 %v232_v50, %v216_v54  ;;  %v252_v61 = vadd.f32 %v236_v51, %v220_v55 }
  0xa3   :  { %v241_v62 = vadd.f32 %v225_v56, %v209_v58  ;;  %v245_v63 = vadd.f32 %v229_v57, %v213_v59 }
  0xa4   :  { %264 = vst [vmem:[%s574_s5 + $0x48] sm:$0xff] %v248_v60 }
  0xa5   :  { %268 = vst [vmem:[%s574_s5 + $0x68] sm:$0xff] %v252_v61  ;;  %v168_v0 = vpop.f32.mrf.mxu2  ;;  %v178_v1 = vpop.f32.mrf.mxu3 }
  0xa6   :  { %257 = vst [vmem:[%s574_s5 + $0x10] sm:$0xff] %v241_v62  ;;  %v197_v2 = vmul.f32 %v434_v12, %v168_v0  ;;  %v201_v3 = vmul.f32 %v434_v12, %v178_v1  ;;  %v150_v4 = vpop.f32.mrf.mxu0  ;;  %v160_v5 = vpop.f32.mrf.mxu1 }
  0xa7   :  { %261 = vst [vmem:[%s574_s5 + $0x30] sm:$0xff] %v245_v63  ;;  %v190_v8 = vmul.f32 %v434_v12, %v150_v4  ;;  %v194_v9 = vmul.f32 %v434_v12, %v160_v5 }
  0xa8   :  { %v217_v10 = vadd.f32 %v439_v13, %v197_v2  ;;  %v221_v11 = vadd.f32 %v439_v13, %v201_v3 }
  0xa9   :  { %v210_v16 = vadd.f32 %v439_v13, %v190_v8  ;;  %v214_v17 = vadd.f32 %v439_v13, %v194_v9 }
  0xaa   :  { %v249_v18 = vadd.f32 %v233_v6, %v217_v10  ;;  %v253_v19 = vadd.f32 %v237_v7, %v221_v11 }
  0xab   :  { %v242_v20 = vadd.f32 %v226_v14, %v210_v16  ;;  %v246_v21 = vadd.f32 %v230_v15, %v214_v17 }
  0xac   :  { %265 = vst [vmem:[%s574_s5 + $0x50] sm:$0xff] %v249_v18 }
  0xad   :  { %269 = vst [vmem:[%s574_s5 + $0x70] sm:$0xff] %v253_v19  ;;  %v170_v22 = vpop.f32.mrf.mxu2  ;;  %v180_v23 = vpop.f32.mrf.mxu3 }
  0xae   :  { %258 = vst [vmem:[%s574_s5 + $0x18] sm:$0xff] %v242_v20  ;;  %v198_v24 = vmul.f32 %v434_v12, %v170_v22  ;;  %v202_v25 = vmul.f32 %v434_v12, %v180_v23 }
  0xaf   :  { %262 = vst [vmem:[%s574_s5 + $0x38] sm:$0xff] %v246_v21 }
  0xb0   :  { %v218_v28 = vadd.f32 %v439_v13, %v198_v24  ;;  %v222_v29 = vadd.f32 %v439_v13, %v202_v25 }
  0xb2   :  { %v250_v30 = vadd.f32 %v234_v26, %v218_v28  ;;  %v254_v31 = vadd.f32 %v238_v27, %v222_v29 }
  0xb4   :  { %266 = vst [vmem:[%s574_s5 + $0x58] sm:$0xff] %v250_v30 }
  0xb5   :  { %270 = vst [vmem:[%s574_s5 + $0x78] sm:$0xff] %v254_v31 }

// kernel: net_forward.27
= control target key start
LH: loop header
LB: loop body
LE: loop exit
PB: predicated region body
PF: predicated region fallthrough
CT: control target
= control target key end

     0   :  { %s316_s1 = inlined_call_operand.vmem [shape: bf16[128,128], index: 1, kind: input, shape index: {}]   ;;  %s317_s4 = inlined_call_operand.vmem [shape: f32[1,128], index: 4, kind: input, shape index: {}]   ;;  %s318_s5 = inlined_call_operand.vmem [shape: f32[1,128], index: 5, kind: input, shape index: {}]   ;;  %s319_s2 = inlined_call_operand.vmem [shape: f32[1,128], index: 2, kind: input, shape index: {}]   ;;  %s320_s3 = inlined_call_operand.vmem [shape: f32[1,128], index: 3, kind: input, shape index: {}]   ;;  %s321_s0 = inlined_call_operand.vmem [shape: f32[32,128], index: 0, kind: input, shape index: {}]   ;;  %s322_s6 = inlined_call_operand.vmem [shape: bf16[32,128], index: 6, kind: output, shape index: {}]  }
   0x1   :  { %v203_v0 = vld [vmem:[%s316_s1 + $0x38] sm:$0xff]  ;;  %v202_v1 = vld [vmem:[%s316_s1 + $0x30] sm:$0xff]  ;;  %v201_v2 = vld [vmem:[%s316_s1 + $0x28] sm:$0xff] }
   0x2   :  { %113 = vmatpush.bf16.msra.mxu0 %v203_v0  ;;  %215 = vmatpush.bf16.msra.mxu1 %v203_v0  ;;  %v200_v3 = vld [vmem:[%s316_s1 + $0x20] sm:$0xff]  ;;  %v199_v4 = vld [vmem:[%s316_s1 + $0x18] sm:$0xff]  ;;  %v24_v7 = vld [vmem:[%s321_s0 + $0x8] sm:$0xff] }
   0x3   :  { %v23_v5 = vld [vmem:[%s321_s0] sm:$0xff]  ;;  %v25_v8 = vld [vmem:[%s321_s0 + $0x10] sm:$0xff]  ;;  %v26_v9 = vld [vmem:[%s321_s0 + $0x18] sm:$0xff] }
   0x4   :  { %v223_v6 = vld [vmem:[%s317_s4] ss:$0 sm:$0xff]  ;;  %v198_v15 = vld [vmem:[%s316_s1 + $0x10] sm:$0xff]  ;;  %v197_v20 = vld [vmem:[%s316_s1 + $0x8] sm:$0xff] }
   0x5   :  { %v31_v10 = vmul.f32 %v223_v6, %v23_v5  ;;  %v32_v11 = vmul.f32 %v223_v6, %v24_v7  ;;  %v224_v12 = vld [vmem:[%s318_s5] ss:$0 sm:$0xff]  ;;  %v33_v13 = vmul.f32 %v223_v6, %v25_v8  ;;  %v34_v14 = vmul.f32 %v223_v6, %v26_v9 }
   0x6   :  { %114 = vmatpush.bf16.msra.mxu0 %v202_v1  ;;  %216 = vmatpush.bf16.msra.mxu1 %v202_v1  ;;  %v196_v25 = vld [vmem:[%s316_s1] sm:$0xff] }
   0x7   :  { %v39_v16 = vadd.f32 %v224_v12, %v31_v10  ;;  %v40_v17 = vadd.f32 %v224_v12, %v32_v11  ;;  %v41_v18 = vadd.f32 %v224_v12, %v33_v13  ;;  %v42_v19 = vadd.f32 %v224_v12, %v34_v14  ;;  %v225_v30 = vld [vmem:[%s319_s2] ss:$0 sm:$0xff] }
   0x8   :  { %v226_v32 = vld [vmem:[%s320_s3] ss:$0 sm:$0xff] }
   0x9   :  { %v43_v21 = vmax.f32 %v39_v16, 0.0  ;;  %v44_v22 = vmax.f32 %v40_v17, 0.0  ;;  %v45_v23 = vmax.f32 %v41_v18, 0.0  ;;  %v46_v24 = vmax.f32 %v42_v19, 0.0 }
   0xa   :  { %115 = vmatpush.bf16.msra.mxu0 %v201_v2  ;;  %217 = vmatpush.bf16.msra.mxu1 %v201_v2 }
   0xb   :  { %v47_v26 = vpack.c.bf16 %v44_v22, %v43_v21  ;;  %v48_v27 = vpack.c.bf16 %v46_v24, %v45_v23 }
   0xe   :  { %116 = vmatpush.bf16.msra.mxu0 %v200_v3  ;;  %218 = vmatpush.bf16.msra.mxu1 %v200_v3 }
  0x12   :  { %117 = vmatpush.bf16.msra.mxu0 %v199_v4  ;;  %219 = vmatpush.bf16.msra.mxu1 %v199_v4 }
  0x16   :  { %118 = vmatpush.bf16.msra.mxu0 %v198_v15  ;;  %220 = vmatpush.bf16.msra.mxu1 %v198_v15 }
  0x1a   :  { %119 = vmatpush.bf16.msra.mxu0 %v197_v20  ;;  %221 = vmatpush.bf16.msra.mxu1 %v197_v20 }
  0x1e   :  { %120 = vmatpush.bf16.msra.mxu0 %v196_v25  ;;  %222 = vmatpush.bf16.msra.mxu1 %v196_v25 }
  0x21   :  { %121 = vmatmul.bf16.vlgmr.msra.gmra.mxu0 %v47_v26  ;;  %126 = vmatmul.bf16.vlgmr.msra.gmra.mxu1 %v48_v27 }
  0x9e   :  { %v122_v28 = vpop.f32.mrf.mxu0  ;;  %v127_v29 = vpop.f32.mrf.mxu1 }
  0x9f   :  { %v136_v31 = vmul.f32 %v225_v30, %v122_v28  ;;  %v138_v33 = vmul.f32 %v225_v30, %v127_v29 }
  0xa1   :  { %v144_v36 = vadd.f32 %v226_v32, %v136_v31  ;;  %v146_v37 = vadd.f32 %v226_v32, %v138_v33 }
  0xa3   :  { %v148_v42 = vmax.f32 %v144_v36, 0.0  ;;  %v150_v43 = vmax.f32 %v146_v37, 0.0 }
  0xa6   :  { %v124_v34 = vpop.f32.mrf.mxu0  ;;  %v129_v35 = vpop.f32.mrf.mxu1 }
  0xa7   :  { %v137_v38 = vmul.f32 %v225_v30, %v124_v34  ;;  %v139_v39 = vmul.f32 %v225_v30, %v129_v35 }
  0xa9   :  { %v145_v40 = vadd.f32 %v226_v32, %v137_v38  ;;  %v147_v41 = vadd.f32 %v226_v32, %v139_v39 }
  0xab   :  { %v149_v44 = vmax.f32 %v145_v40, 0.0  ;;  %v151_v45 = vmax.f32 %v147_v41, 0.0 }
  0xad   :  { %v207_v46 = vpack.c.bf16 %v149_v44, %v148_v42  ;;  %v212_v47 = vpack.c.bf16 %v151_v45, %v150_v43 }
  0xaf   :  { %208 = vst [vmem:[%s322_s6] sm:$0xff] %v207_v46  }
  0xb0   :  { %214 = vst [vmem:[%s322_s6 + $0x8] sm:$0xff] %v212_v47  }

// kernel: net_forward.29
= control target key start
LH: loop header
LB: loop body
LE: loop exit
PB: predicated region body
PF: predicated region fallthrough
CT: control target
= control target key end

     0   :  { %s456_s1 = inlined_call_operand.vmem [shape: bf16[128,256], index: 1, kind: input, shape index: {}]   ;;  %s457_s0 = inlined_call_operand.vmem [shape: f32[32,128], index: 0, kind: input, shape index: {}]   ;;  %s458_s2 = inlined_call_operand.vmem [shape: f32[1,256], index: 2, kind: input, shape index: {}]   ;;  %s459_s3 = inlined_call_operand.vmem [shape: f32[1,256], index: 3, kind: input, shape index: {}]   ;;  %s460_s4 = inlined_call_operand.vmem [shape: f32[32,256], index: 4, kind: output, shape index: {}]  }
   0x1   :  { %v255_v0 = vld [vmem:[%s456_s1 + $0x70] sm:$0xf]  ;;  %v276_v1 = vld [vmem:[%s456_s1 + $0x74] sm:$0xf0]  ;;  %v275_v2 = vld [vmem:[%s456_s1 + $0x74] sm:$0xf] }
   0x2   :  { %v256_v3 = vor.u32 %v276_v1, %v255_v0  ;;  %v257_v4 = vld [vmem:[%s456_s1 + $0x78] sm:$0xf0]  ;;  %v247_v5 = vld [vmem:[%s456_s1 + $0x60] sm:$0xf]  ;;  %v274_v6 = vld [vmem:[%s456_s1 + $0x64] sm:$0xf0] }
   0x3   :  { %v260_v7 = vor.u32 %v275_v2, %v257_v4  ;;  %v273_v8 = vld [vmem:[%s456_s1 + $0x64] sm:$0xf]  ;;  %v249_v9 = vld [vmem:[%s456_s1 + $0x68] sm:$0xf0]  ;;  %v248_v10 = vor.u32 %v274_v6, %v247_v5  ;;  %v239_v12 = vld [vmem:[%s456_s1 + $0x50] sm:$0xf] }
   0x4   :  { %119 = vmatpush.bf16.msra.mxu0 %v256_v3  ;;  %277 = vmatpush.bf16.msra.mxu2 %v256_v3  ;;  %v252_v11 = vor.u32 %v273_v8, %v249_v9  ;;  %v272_v13 = vld [vmem:[%s456_s1 + $0x54] sm:$0xf0]  ;;  %v271_v14 = vld [vmem:[%s456_s1 + $0x54] sm:$0xf]  ;;  %v241_v15 = vld [vmem:[%s456_s1 + $0x58] sm:$0xf0] }
   0x5   :  { %138 = vmatpush.bf16.msra.mxu1 %v260_v7  ;;  %285 = vmatpush.bf16.msra.mxu3 %v260_v7  ;;  %v240_v16 = vor.u32 %v272_v13, %v239_v12  ;;  %v244_v17 = vor.u32 %v271_v14, %v241_v15  ;;  %v231_v18 = vld [vmem:[%s456_s1 + $0x40] sm:$0xf]  ;;  %v270_v19 = vld [vmem:[%s456_s1 + $0x44] sm:$0xf0]  ;;  %v269_v20 = vld [vmem:[%s456_s1 + $0x44] sm:$0xf] }
   0x6   :  { %v233_v21 = vld [vmem:[%s456_s1 + $0x48] sm:$0xf0]  ;;  %v232_v22 = vor.u32 %v270_v19, %v231_v18  ;;  %v223_v24 = vld [vmem:[%s456_s1 + $0x30] sm:$0xf]  ;;  %v268_v25 = vld [vmem:[%s456_s1 + $0x34] sm:$0xf0] }
   0x7   :  { %v236_v23 = vor.u32 %v269_v20, %v233_v21  ;;  %v267_v26 = vld [vmem:[%s456_s1 + $0x34] sm:$0xf]  ;;  %v225_v27 = vld [vmem:[%s456_s1 + $0x38] sm:$0xf0]  ;;  %v224_v28 = vor.u32 %v268_v25, %v223_v24  ;;  %v215_v30 = vld [vmem:[%s456_s1 + $0x20] sm:$0xf] }
   0x8   :  { %120 = vmatpush.bf16.msra.mxu0 %v248_v10  ;;  %278 = vmatpush.bf16.msra.mxu2 %v248_v10  ;;  %v228_v29 = vor.u32 %v267_v26, %v225_v27  ;;  %v266_v31 = vld [vmem:[%s456_s1 + $0x24] sm:$0xf0]  ;;  %v265_v32 = vld [vmem:[%s456_s1 + $0x24] sm:$0xf]  ;;  %v217_v33 = vld [vmem:[%s456_s1 + $0x28] sm:$0xf0] }
   0x9   :  { %139 = vmatpush.bf16.msra.mxu1 %v252_v11  ;;  %286 = vmatpush.bf16.msra.mxu3 %v252_v11  ;;  %v216_v34 = vor.u32 %v266_v31, %v215_v30  ;;  %v220_v35 = vor.u32 %v265_v32, %v217_v33  ;;  %v207_v36 = vld [vmem:[%s456_s1 + $0x10] sm:$0xf]  ;;  %v264_v37 = vld [vmem:[%s456_s1 + $0x14] sm:$0xf0]  ;;  %v263_v38 = vld [vmem:[%s456_s1 + $0x14] sm:$0xf] }
   0xa   :  { %v209_v39 = vld [vmem:[%s456_s1 + $0x18] sm:$0xf0]  ;;  %v208_v40 = vor.u32 %v264_v37, %v207_v36  ;;  %v199_v42 = vld [vmem:[%s456_s1] sm:$0xf]  ;;  %v262_v43 = vld [vmem:[%s456_s1 + $0x4] sm:$0xf0] }
   0xb   :  { %v212_v41 = vor.u32 %v263_v38, %v209_v39  ;;  %v261_v44 = vld [vmem:[%s456_s1 + $0x4] sm:$0xf]  ;;  %v201_v45 = vld [vmem:[%s456_s1 + $0x8] sm:$0xf0]  ;;  %v200_v47 = vor.u32 %v262_v43, %v199_v42  ;;  %v19_v49 = vld [vmem:[%s457_s0 + $0x10] sm:$0xff] }
   0xc   :  { %121 = vmatpush.bf16.msra.mxu0 %v240_v16  ;;  %279 = vmatpush.bf16.msra.mxu2 %v240_v16  ;;  %v17_v46 = vld [vmem:[%s457_s0] sm:$0xff]  ;;  %v18_v48 = vld [vmem:[%s457_s0 + $0x8] sm:$0xff]  ;;  %v20_v50 = vld [vmem:[%s457_s0 + $0x18] sm:$0xff]  ;;  %v204_v51 = vor.u32 %v261_v44, %v201_v45 }
   0xd   :  { %140 = vmatpush.bf16.msra.mxu1 %v244_v17  ;;  %287 = vmatpush.bf16.msra.mxu3 %v244_v17  ;;  %v21_v52 = vpack.c.bf16 %v18_v48, %v17_v46  ;;  %v22_v53 = vpack.c.bf16 %v20_v50, %v19_v49  ;;  %v157_v54 = vld [vmem:[%s458_s2] sm:$0x3] }
   0xe   :  { %v171_v55 = vld [vmem:[%s459_s3] sm:$0x3]  ;;  %v159_v56 = vperm.slane %v157_v54, 0  ;;  %v160_v57 = vperm.slane %v157_v54, 1 }
   0xf   :  { %v173_v58 = vperm.slane %v171_v55, 0  ;;  %v174_v60 = vperm.slane %v171_v55, 1 }
  0x10   :  { %122 = vmatpush.bf16.msra.mxu0 %v232_v22  ;;  %280 = vmatpush.bf16.msra.mxu2 %v232_v22 }
  0x11   :  { %141 = vmatpush.bf16.msra.mxu1 %v236_v23  ;;  %288 = vmatpush.bf16.msra.mxu3 %v236_v23 }
  0x14   :  { %123 = vmatpush.bf16.msra.mxu0 %v224_v28  ;;  %281 = vmatpush.bf16.msra.mxu2 %v224_v28 }
  0x15   :  { %142 = vmatpush.bf16.msra.mxu1 %v228_v29  ;;  %289 = vmatpush.bf16.msra.mxu3 %v228_v29 }
  0x18   :  { %124 = vmatpush.bf16.msra.mxu0 %v216_v34  ;;  %282 = vmatpush.bf16.msra.mxu2 %v216_v34 }
  0x19   :  { %143 = vmatpush.bf16.msra.mxu1 %v220_v35  ;;  %290 = vmatpush.bf16.msra.mxu3 %v220_v35 }
  0x1c   :  { %125 = vmatpush.bf16.msra.mxu0 %v208_v40  ;;  %283 = vmatpush.bf16.msra.mxu2 %v208_v40 }
  0x1d   :  { %144 = vmatpush.bf16.msra.mxu1 %v212_v41  ;;  %291 = vmatpush.bf16.msra.mxu3 %v212_v41 }
  0x20   :  { %126 = vmatpush.bf16.msra.mxu0 %v200_v47  ;;  %284 = vmatpush.bf16.msra.mxu2 %v200_v47 }
  0x21   :  { %145 = vmatpush.bf16.msra.mxu1 %v204_v51  ;;  %292 = vmatpush.bf16.msra.mxu3 %v204_v51 }
  0x23   :  { %127 = vmatmul.bf16.vlgmr.msra.gmra.mxu0 %v21_v52  ;;  %132 = vmatmul.bf16.vlgmr.msra.gmra.mxu2 %v22_v53 }
  0x24   :  { %146 = vmatmul.bf16.vlgmr.msra.gmra.mxu1 %v21_v52  ;;  %151 = vmatmul.bf16.vlgmr.msra.gmra.mxu3 %v22_v53 }
  0xa0   :  { %v128_v59 = vpop.f32.mrf.mxu0 }
  0xa1   :  { %v163_v61 = vmul.f32 %v159_v56, %v128_v59  ;;  %v147_v62 = vpop.f32.mrf.mxu1 }
  0xa2   :  { %v164_v63 = vmul.f32 %v160_v57, %v147_v62 }
  0xa3   :  { %v177_v0 = vadd.f32 %v173_v58, %v163_v61 }
  0xa4   :  { %v178_v1 = vadd.f32 %v174_v60, %v164_v63 }
  0xa5   :  { %185 = vst [vmem:[%s460_s4] sm:$0xff] %v177_v0 }
  0xa6   :  { %186 = vst [vmem:[%s460_s4 + $0x8] sm:$0xff] %v178_v1  ;;  %v133_v2 = vpop.f32.mrf.mxu2 }
  0xa7   :  { %v167_v3 = vmul.f32 %v159_v56, %v133_v2  ;;  %v152_v4 = vpop.f32.mrf.mxu3 }
  0xa8   :  { %v168_v5 = vmul.f32 %v160_v57, %v152_v4  ;;  %v130_v6 = vpop.f32.mrf.mxu0 }
  0xa9   :  { %v181_v7 = vadd.f32 %v173_v58, %v167_v3  ;;  %v165_v8 = vmul.f32 %v159_v56, %v130_v6  ;;  %v149_v9 = vpop.f32.mrf.mxu1 }
  0xaa   :  { %v182_v10 = vadd.f32 %v174_v60, %v168_v5  ;;  %v166_v11 = vmul.f32 %v160_v57, %v149_v9 }
  0xab   :  { %189 = vst [vmem:[%s460_s4 + $0x20] sm:$0xff] %v181_v7  ;;  %v179_v12 = vadd.f32 %v173_v58, %v165_v8 }
  0xac   :  { %190 = vst [vmem:[%s460_s4 + $0x28] sm:$0xff] %v182_v10  ;;  %v180_v13 = vadd.f32 %v174_v60, %v166_v11 }
  0xad   :  { %187 = vst [vmem:[%s460_s4 + $0x10] sm:$0xff] %v179_v12 }
  0xae   :  { %188 = vst [vmem:[%s460_s4 + $0x18] sm:$0xff] %v180_v13  ;;  %v135_v14 = vpop.f32.mrf.mxu2 }
  0xaf   :  { %v169_v15 = vmul.f32 %v159_v56, %v135_v14  ;;  %v154_v16 = vpop.f32.mrf.mxu3 }
  0xb0   :  { %v170_v17 = vmul.f32 %v160_v57, %v154_v16 }
  0xb1   :  { %v183_v18 = vadd.f32 %v173_v58, %v169_v15 }
  0xb2   :  { %v184_v19 = vadd.f32 %v174_v60, %v170_v17 }
  0xb3   :  { %191 = vst [vmem:[%s460_s4 + $0x30] sm:$0xff] %v183_v18 }
  0xb4   :  { %192 = vst [vmem:[%s460_s4 + $0x38] sm:$0xff] %v184_v19 }

// kernel: net_forward.30
= control target key start
LH: loop header
LB: loop body
LE: loop exit
PB: predicated region body
PF: predicated region fallthrough
CT: control target
= control target key end

     0   :  { %s518_s1 = inlined_call_operand.vmem [shape: bf16[128,256], index: 1, kind: input, shape index: {}]   ;;  %s519_s0 = inlined_call_operand.vmem [shape: bf16[32,128], index: 0, kind: input, shape index: {}]   ;;  %s520_s2 = inlined_call_operand.vmem [shape: f32[1,256], index: 2, kind: input, shape index: {}]   ;;  %s521_s3 = inlined_call_operand.vmem [shape: f32[1,256], index: 3, kind: input, shape index: {}]   ;;  %s522_s4 = inlined_call_operand.vmem [shape: f32[32,256], index: 4, kind: input, shape index: {}]   ;;  %s523_s5 = inlined_call_operand.vmem [shape: f32[32,256], index: 5, kind: output, shape index: {}]  }
   0x1   :  { %v292_v0 = vld [vmem:[%s518_s1 + $0x70] sm:$0xf]  ;;  %v315_v1 = vld [vmem:[%s518_s1 + $0x74] sm:$0xf0]  ;;  %v314_v2 = vld [vmem:[%s518_s1 + $0x74] sm:$0xf] }
   0x2   :  { %v293_v3 = vor.u32 %v315_v1, %v292_v0  ;;  %v294_v4 = vld [vmem:[%s518_s1 + $0x78] sm:$0xf0]  ;;  %v284_v5 = vld [vmem:[%s518_s1 + $0x60] sm:$0xf]  ;;  %v313_v6 = vld [vmem:[%s518_s1 + $0x64] sm:$0xf0] }
   0x3   :  { %v297_v7 = vor.u32 %v314_v2, %v294_v4  ;;  %v312_v8 = vld [vmem:[%s518_s1 + $0x64] sm:$0xf]  ;;  %v286_v9 = vld [vmem:[%s518_s1 + $0x68] sm:$0xf0]  ;;  %v285_v10 = vor.u32 %v313_v6, %v284_v5  ;;  %v276_v12 = vld [vmem:[%s518_s1 + $0x50] sm:$0xf] }
   0x4   :  { %132 = vmatpush.bf16.msra.mxu0 %v293_v3  ;;  %316 = vmatpush.bf16.msra.mxu2 %v293_v3  ;;  %v289_v11 = vor.u32 %v312_v8, %v286_v9  ;;  %v311_v13 = vld [vmem:[%s518_s1 + $0x54] sm:$0xf0]  ;;  %v310_v14 = vld [vmem:[%s518_s1 + $0x54] sm:$0xf]  ;;  %v278_v15 = vld [vmem:[%s518_s1 + $0x58] sm:$0xf0] }
   0x5   :  { %151 = vmatpush.bf16.msra.mxu1 %v297_v7  ;;  %324 = vmatpush.bf16.msra.mxu3 %v297_v7  ;;  %v277_v16 = vor.u32 %v311_v13, %v276_v12  ;;  %v281_v17 = vor.u32 %v310_v14, %v278_v15  ;;  %v268_v18 = vld [vmem:[%s518_s1 + $0x40] sm:$0xf]  ;;  %v309_v19 = vld [vmem:[%s518_s1 + $0x44] sm:$0xf0]  ;;  %v308_v20 = vld [vmem:[%s518_s1 + $0x44] sm:$0xf] }
   0x6   :  { %v270_v21 = vld [vmem:[%s518_s1 + $0x48] sm:$0xf0]  ;;  %v269_v22 = vor.u32 %v309_v19, %v268_v18  ;;  %v260_v24 = vld [vmem:[%s518_s1 + $0x30] sm:$0xf]  ;;  %v307_v25 = vld [vmem:[%s518_s1 + $0x34] sm:$0xf0] }
   0x7   :  { %v273_v23 = vor.u32 %v308_v20, %v270_v21  ;;  %v306_v26 = vld [vmem:[%s518_s1 + $0x34] sm:$0xf]  ;;  %v262_v27 = vld [vmem:[%s518_s1 + $0x38] sm:$0xf0]  ;;  %v261_v28 = vor.u32 %v307_v25, %v260_v24  ;;  %v252_v30 = vld [vmem:[%s518_s1 + $0x20] sm:$0xf] }
   0x8   :  { %133 = vmatpush.bf16.msra.mxu0 %v285_v10  ;;  %317 = vmatpush.bf16.msra.mxu2 %v285_v10  ;;  %v265_v29 = vor.u32 %v306_v26, %v262_v27  ;;  %v305_v31 = vld [vmem:[%s518_s1 + $0x24] sm:$0xf0]  ;;  %v304_v32 = vld [vmem:[%s518_s1 + $0x24] sm:$0xf]  ;;  %v254_v33 = vld [vmem:[%s518_s1 + $0x28] sm:$0xf0] }
   0x9   :  { %152 = vmatpush.bf16.msra.mxu1 %v289_v11  ;;  %325 = vmatpush.bf16.msra.mxu3 %v289_v11  ;;  %v253_v34 = vor.u32 %v305_v31, %v252_v30  ;;  %v257_v35 = vor.u32 %v304_v32, %v254_v33  ;;  %v244_v36 = vld [vmem:[%s518_s1 + $0x10] sm:$0xf]  ;;  %v303_v37 = vld [vmem:[%s518_s1 + $0x14] sm:$0xf0]  ;;  %v302_v38 = vld [vmem:[%s518_s1 + $0x14] sm:$0xf] }
   0xa   :  { %v246_v39 = vld [vmem:[%s518_s1 + $0x18] sm:$0xf0]  ;;  %v245_v40 = vor.u32 %v303_v37, %v244_v36  ;;  %v236_v42 = vld [vmem:[%s518_s1] sm:$0xf]  ;;  %v301_v43 = vld [vmem:[%s518_s1 + $0x4] sm:$0xf0] }
   0xb   :  { %v249_v41 = vor.u32 %v302_v38, %v246_v39  ;;  %v300_v44 = vld [vmem:[%s518_s1 + $0x4] sm:$0xf]  ;;  %v238_v45 = vld [vmem:[%s518_s1 + $0x8] sm:$0xf0]  ;;  %v237_v46 = vor.u32 %v301_v43, %v236_v42  ;;  %v170_v50 = vld [vmem:[%s520_s2] sm:$0x3] }
   0xc   :  { %134 = vmatpush.bf16.msra.mxu0 %v277_v16  ;;  %318 = vmatpush.bf16.msra.mxu2 %v277_v16  ;;  %v241_v47 = vor.u32 %v300_v44, %v238_v45  ;;  %v298_v48 = vld [vmem:[%s519_s0] sm:$0xff]  ;;  %v299_v49 = vld [vmem:[%s519_s0 + $0x8] sm:$0xff]  ;;  %v172_v52 = vperm.slane %v170_v50, 0  ;;  %v173_v53 = vperm.slane %v170_v50, 1  ;;  %v200_v13 = vld [vmem:[%s522_s4 + $0x10] sm:$0xff] }
   0xd   :  { %153 = vmatpush.bf16.msra.mxu1 %v281_v17  ;;  %326 = vmatpush.bf16.msra.mxu3 %v281_v17  ;;  %v184_v51 = vld [vmem:[%s521_s3] sm:$0x3]  ;;  %v199_v62 = vld [vmem:[%s522_s4 + $0x8] sm:$0xff]  ;;  %v201_v17 = vld [vmem:[%s522_s4 + $0x18] sm:$0xff] }
   0xe   :  { %v186_v54 = vperm.slane %v184_v51, 0  ;;  %v187_v56 = vperm.slane %v184_v51, 1  ;;  %v198_v59 = vld [vmem:[%s522_s4] sm:$0xff]  ;;  %v203_v9 = vld [vmem:[%s522_s4 + $0x28] sm:$0xff]  ;;  %v204_v25 = vld [vmem:[%s522_s4 + $0x30] sm:$0xff] }
   0xf   :  { %v202_v5 = vld [vmem:[%s522_s4 + $0x20] sm:$0xff] }
  0x10   :  { %135 = vmatpush.bf16.msra.mxu0 %v269_v22  ;;  %319 = vmatpush.bf16.msra.mxu2 %v269_v22 }
  0x11   :  { %154 = vmatpush.bf16.msra.mxu1 %v273_v23  ;;  %327 = vmatpush.bf16.msra.mxu3 %v273_v23 }
  0x14   :  { %136 = vmatpush.bf16.msra.mxu0 %v261_v28  ;;  %320 = vmatpush.bf16.msra.mxu2 %v261_v28  ;;  %v205_v28 = vld [vmem:[%s522_s4 + $0x38] sm:$0xff] }
  0x15   :  { %155 = vmatpush.bf16.msra.mxu1 %v265_v29  ;;  %328 = vmatpush.bf16.msra.mxu3 %v265_v29 }
  0x18   :  { %137 = vmatpush.bf16.msra.mxu0 %v253_v34  ;;  %321 = vmatpush.bf16.msra.mxu2 %v253_v34 }
  0x19   :  { %156 = vmatpush.bf16.msra.mxu1 %v257_v35  ;;  %329 = vmatpush.bf16.msra.mxu3 %v257_v35 }
  0x1c   :  { %138 = vmatpush.bf16.msra.mxu0 %v245_v40  ;;  %322 = vmatpush.bf16.msra.mxu2 %v245_v40 }
  0x1d   :  { %157 = vmatpush.bf16.msra.mxu1 %v249_v41  ;;  %330 = vmatpush.bf16.msra.mxu3 %v249_v41 }
  0x20   :  { %139 = vmatpush.bf16.msra.mxu0 %v237_v46  ;;  %323 = vmatpush.bf16.msra.mxu2 %v237_v46 }
  0x21   :  { %158 = vmatpush.bf16.msra.mxu1 %v241_v47  ;;  %331 = vmatpush.bf16.msra.mxu3 %v241_v47 }
  0x23   :  { %140 = vmatmul.bf16.vlgmr.msra.gmra.mxu0 %v298_v48  ;;  %145 = vmatmul.bf16.vlgmr.msra.gmra.mxu2 %v299_v49 }
  0x24   :  { %159 = vmatmul.bf16.vlgmr.msra.gmra.mxu1 %v298_v48  ;;  %164 = vmatmul.bf16.vlgmr.msra.gmra.mxu3 %v299_v49 }
  0xa0   :  { %v141_v55 = vpop.f32.mrf.mxu0 }
  0xa1   :  { %v176_v57 = vmul.f32 %v172_v52, %v141_v55  ;;  %v160_v58 = vpop.f32.mrf.mxu1 }
  0xa2   :  { %v177_v60 = vmul.f32 %v173_v53, %v160_v58 }
  0xa3   :  { %v190_v61 = vadd.f32 %v186_v54, %v176_v57 }
  0xa4   :  { %v191_v63 = vadd.f32 %v187_v56, %v177_v60 }
  0xa5   :  { %v206_v0 = vadd.f32 %v198_v59, %v190_v61 }
  0xa6   :  { %v207_v1 = vadd.f32 %v199_v62, %v191_v63  ;;  %v146_v2 = vpop.f32.mrf.mxu2 }
  0xa7   :  { %214 = vst [vmem:[%s523_s5] sm:$0xff] %v206_v0  ;;  %v180_v3 = vmul.f32 %v172_v52, %v146_v2  ;;  %v165_v4 = vpop.f32.mrf.mxu3 }
  0xa8   :  { %215 = vst [vmem:[%s523_s5 + $0x8] sm:$0xff] %v207_v1  ;;  %v181_v6 = vmul.f32 %v173_v53, %v165_v4  ;;  %v143_v7 = vpop.f32.mrf.mxu0 }
  0xa9   :  { %v194_v8 = vadd.f32 %v186_v54, %v180_v3  ;;  %v178_v10 = vmul.f32 %v172_v52, %v143_v7  ;;  %v162_v11 = vpop.f32.mrf.mxu1 }
  0xaa   :  { %v195_v12 = vadd.f32 %v187_v56, %v181_v6  ;;  %v179_v14 = vmul.f32 %v173_v53, %v162_v11 }
  0xab   :  { %v210_v15 = vadd.f32 %v202_v5, %v194_v8  ;;  %v192_v16 = vadd.f32 %v186_v54, %v178_v10 }
  0xac   :  { %v211_v18 = vadd.f32 %v203_v9, %v195_v12  ;;  %v193_v19 = vadd.f32 %v187_v56, %v179_v14 }
  0xad   :  { %218 = vst [vmem:[%s523_s5 + $0x20] sm:$0xff] %v210_v15  ;;  %v208_v20 = vadd.f32 %v200_v13, %v192_v16 }
  0xae   :  { %219 = vst [vmem:[%s523_s5 + $0x28] sm:$0xff] %v211_v18  ;;  %v209_v21 = vadd.f32 %v201_v17, %v193_v19  ;;  %v148_v22 = vpop.f32.mrf.mxu2 }
  0xaf   :  { %216 = vst [vmem:[%s523_s5 + $0x10] sm:$0xff] %v208_v20  ;;  %v182_v23 = vmul.f32 %v172_v52, %v148_v22  ;;  %v167_v24 = vpop.f32.mrf.mxu3 }
  0xb0   :  { %217 = vst [vmem:[%s523_s5 + $0x18] sm:$0xff] %v209_v21  ;;  %v183_v26 = vmul.f32 %v173_v53, %v167_v24 }
  0xb1   :  { %v196_v27 = vadd.f32 %v186_v54, %v182_v23 }
  0xb2   :  { %v197_v29 = vadd.f32 %v187_v56, %v183_v26 }
  0xb3   :  { %v212_v30 = vadd.f32 %v204_v25, %v196_v27 }
  0xb4   :  { %v213_v31 = vadd.f32 %v205_v28, %v197_v29 }
  0xb5   :  { %220 = vst [vmem:[%s523_s5 + $0x30] sm:$0xff] %v212_v30 }
  0xb6   :  { %221 = vst [vmem:[%s523_s5 + $0x38] sm:$0xff] %v213_v31 }

// kernel: net_forward.28
= control target key start
LH: loop header
LB: loop body
LE: loop exit
PB: predicated region body
PF: predicated region fallthrough
CT: control target
= control target key end

     0   :  { %s1740_s1 = inlined_call_operand.vmem [shape: bf16[1152,128], index: 1, kind: input, shape index: {}]   ;;  %s1741_s0 = inlined_call_operand.vmem [shape: bf16[32,1152], index: 0, kind: input, shape index: {}]   ;;  %s1742_s2 = inlined_call_operand.vmem [shape: f32[1,128], index: 2, kind: input, shape index: {}]   ;;  %s1743_s3 = inlined_call_operand.vmem [shape: f32[1,128], index: 3, kind: input, shape index: {}]   ;;  %s1744_s4 = inlined_call_operand.vmem [shape: bf16[32,128], index: 4, kind: output, shape index: {}]  }
   0x1   :  { %v1293_v0 = vld [vmem:[%s1740_s1 + $0x38] sm:$0xff]  ;;  %v1292_v4 = vld [vmem:[%s1740_s1 + $0x30] sm:$0xff]  ;;  %v1291_v8 = vld [vmem:[%s1740_s1 + $0x28] sm:$0xff] }
   0x2   :  { %v1301_v1 = vld [vmem:[%s1740_s1 + $0x78] sm:$0xff]  ;;  %705 = vmatpush.bf16.msra.mxu0 %v1293_v0  ;;  %v1300_v5 = vld [vmem:[%s1740_s1 + $0x70] sm:$0xff]  ;;  %v1299_v9 = vld [vmem:[%s1740_s1 + $0x68] sm:$0xff] }
   0x3   :  { %v1309_v2 = vld [vmem:[%s1740_s1 + $0xb8] sm:$0xff]  ;;  %724 = vmatpush.bf16.msra.mxu1 %v1301_v1  ;;  %v1308_v6 = vld [vmem:[%s1740_s1 + $0xb0] sm:$0xff]  ;;  %v1307_v10 = vld [vmem:[%s1740_s1 + $0xa8] sm:$0xff] }
   0x4   :  { %v1317_v3 = vld [vmem:[%s1740_s1 + $0xf8] sm:$0xff]  ;;  %743 = vmatpush.bf16.msra.mxu2 %v1309_v2  ;;  %v1316_v7 = vld [vmem:[%s1740_s1 + $0xf0] sm:$0xff]  ;;  %v1315_v11 = vld [vmem:[%s1740_s1 + $0xe8] sm:$0xff] }
   0x5   :  { %762 = vmatpush.bf16.msra.mxu3 %v1317_v3  ;;  %v1290_v12 = vld [vmem:[%s1740_s1 + $0x20] sm:$0xff]  ;;  %v1289_v16 = vld [vmem:[%s1740_s1 + $0x18] sm:$0xff]  ;;  %v1288_v20 = vld [vmem:[%s1740_s1 + $0x10] sm:$0xff] }
   0x6   :  { %706 = vmatpush.bf16.msra.mxu0 %v1292_v4  ;;  %v1298_v13 = vld [vmem:[%s1740_s1 + $0x60] sm:$0xff]  ;;  %v1297_v17 = vld [vmem:[%s1740_s1 + $0x58] sm:$0xff]  ;;  %v1296_v21 = vld [vmem:[%s1740_s1 + $0x50] sm:$0xff] }
   0x7   :  { %725 = vmatpush.bf16.msra.mxu1 %v1300_v5  ;;  %v1306_v14 = vld [vmem:[%s1740_s1 + $0xa0] sm:$0xff]  ;;  %v1305_v18 = vld [vmem:[%s1740_s1 + $0x98] sm:$0xff]  ;;  %v1304_v22 = vld [vmem:[%s1740_s1 + $0x90] sm:$0xff] }
   0x8   :  { %744 = vmatpush.bf16.msra.mxu2 %v1308_v6  ;;  %v1314_v15 = vld [vmem:[%s1740_s1 + $0xe0] sm:$0xff]  ;;  %v1313_v19 = vld [vmem:[%s1740_s1 + $0xd8] sm:$0xff]  ;;  %v1312_v23 = vld [vmem:[%s1740_s1 + $0xd0] sm:$0xff] }
   0x9   :  { %763 = vmatpush.bf16.msra.mxu3 %v1316_v7  ;;  %v1287_v24 = vld [vmem:[%s1740_s1 + $0x8] sm:$0xff]  ;;  %v1286_v28 = vld [vmem:[%s1740_s1] sm:$0xff]  ;;  %v920_v39 = vld [vmem:[%s1741_s0 + $0x2c] sm:$0xf0] }
   0xa   :  { %707 = vmatpush.bf16.msra.mxu0 %v1291_v8  ;;  %v1295_v25 = vld [vmem:[%s1740_s1 + $0x48] sm:$0xff]  ;;  %v1294_v29 = vld [vmem:[%s1740_s1 + $0x40] sm:$0xff]  ;;  %v1325_v40 = vld [vmem:[%s1740_s1 + $0x138] sm:$0xff] }
   0xb   :  { %726 = vmatpush.bf16.msra.mxu1 %v1299_v9  ;;  %v1303_v26 = vld [vmem:[%s1740_s1 + $0x88] sm:$0xff]  ;;  %v1302_v30 = vld [vmem:[%s1740_s1 + $0x80] sm:$0xff]  ;;  %v1333_v41 = vld [vmem:[%s1740_s1 + $0x178] sm:$0xff] }
   0xc   :  { %745 = vmatpush.bf16.msra.mxu2 %v1307_v10  ;;  %v1311_v27 = vld [vmem:[%s1740_s1 + $0xc8] sm:$0xff]  ;;  %v1310_v31 = vld [vmem:[%s1740_s1 + $0xc0] sm:$0xff]  ;;  %v1341_v46 = vld [vmem:[%s1740_s1 + $0x1b8] sm:$0xff] }
   0xd   :  { %764 = vmatpush.bf16.msra.mxu3 %v1315_v11  ;;  %v910_v32 = vld [vmem:[%s1741_s0] sm:$0xf]  ;;  %v1272_v33 = vld [vmem:[%s1741_s0 + $0x20] sm:$0xf0]  ;;  %v912_v35 = vld [vmem:[%s1741_s0 + $0x24] sm:$0xf0] }
   0xe   :  { %708 = vmatpush.bf16.msra.mxu0 %v1290_v12  ;;  %v1268_v34 = vld [vmem:[%s1741_s0 + $0x4] sm:$0xf]  ;;  %v918_v36 = vld [vmem:[%s1741_s0 + $0x8] sm:$0xf]  ;;  %v1273_v37 = vld [vmem:[%s1741_s0 + $0x28] sm:$0xf0]  ;;  %v911_v42 = vor.u32 %v1272_v33, %v910_v32 }
   0xf   :  { %727 = vmatpush.bf16.msra.mxu1 %v1298_v13  ;;  %v1269_v38 = vld [vmem:[%s1741_s0 + $0xc] sm:$0xf]  ;;  %v915_v43 = vor.u32 %v1268_v34, %v912_v35  ;;  %v919_v44 = vor.u32 %v1273_v37, %v918_v36  ;;  %v1349_v47 = vld [vmem:[%s1740_s1 + $0x1f8] sm:$0xff]  ;;  %v1324_v48 = vld [vmem:[%s1740_s1 + $0x130] sm:$0xff] }
  0x10   :  { %746 = vmatpush.bf16.msra.mxu2 %v1306_v14  ;;  %v923_v45 = vor.u32 %v1269_v38, %v920_v39  ;;  %v1332_v49 = vld [vmem:[%s1740_s1 + $0x170] sm:$0xff]  ;;  %v1323_v52 = vld [vmem:[%s1740_s1 + $0x128] sm:$0xff]  ;;  %v1322_v56 = vld [vmem:[%s1740_s1 + $0x120] sm:$0xff] }
  0x11   :  { %765 = vmatpush.bf16.msra.mxu3 %v1314_v15  ;;  %v1340_v50 = vld [vmem:[%s1740_s1 + $0x1b0] sm:$0xff]  ;;  %v1331_v53 = vld [vmem:[%s1740_s1 + $0x168] sm:$0xff]  ;;  %v1330_v57 = vld [vmem:[%s1740_s1 + $0x160] sm:$0xff] }
  0x12   :  { %709 = vmatpush.bf16.msra.mxu0 %v1289_v16  ;;  %v1348_v51 = vld [vmem:[%s1740_s1 + $0x1f0] sm:$0xff]  ;;  %v1339_v54 = vld [vmem:[%s1740_s1 + $0x1a8] sm:$0xff]  ;;  %v1338_v58 = vld [vmem:[%s1740_s1 + $0x1a0] sm:$0xff] }
  0x13   :  { %728 = vmatpush.bf16.msra.mxu1 %v1297_v17  ;;  %v1347_v55 = vld [vmem:[%s1740_s1 + $0x1e8] sm:$0xff]  ;;  %v1346_v59 = vld [vmem:[%s1740_s1 + $0x1e0] sm:$0xff]  ;;  %v948_v63 = vld [vmem:[%s1741_s0 + $0x6c] sm:$0xf0] }
  0x14   :  { %747 = vmatpush.bf16.msra.mxu2 %v1305_v18  ;;  %v946_v60 = vld [vmem:[%s1741_s0 + $0x48] sm:$0xf]  ;;  %v1281_v61 = vld [vmem:[%s1741_s0 + $0x68] sm:$0xf0]  ;;  %v954_v0 = vld [vmem:[%s1741_s0 + $0x50] sm:$0xf] }
  0x15   :  { %766 = vmatpush.bf16.msra.mxu3 %v1313_v19  ;;  %v1277_v62 = vld [vmem:[%s1741_s0 + $0x4c] sm:$0xf]  ;;  %v1282_v1 = vld [vmem:[%s1741_s0 + $0x70] sm:$0xf0]  ;;  %v956_v3 = vld [vmem:[%s1741_s0 + $0x74] sm:$0xf0]  ;;  %v947_v6 = vor.u32 %v1281_v61, %v946_v60 }
  0x16   :  { %710 = vmatpush.bf16.msra.mxu0 %v1288_v20  ;;  %v1278_v2 = vld [vmem:[%s1741_s0 + $0x54] sm:$0xf]  ;;  %v1321_v4 = vld [vmem:[%s1740_s1 + $0x118] sm:$0xff]  ;;  %v951_v7 = vor.u32 %v1277_v62, %v948_v63  ;;  %v955_v8 = vor.u32 %v1282_v1, %v954_v0  ;;  %v1319_v16 = vld [vmem:[%s1740_s1 + $0x108] sm:$0xff] }
  0x17   :  { %729 = vmatpush.bf16.msra.mxu1 %v1296_v21  ;;  %v1329_v5 = vld [vmem:[%s1740_s1 + $0x158] sm:$0xff]  ;;  %v959_v9 = vor.u32 %v1278_v2, %v956_v3  ;;  %v1320_v12 = vld [vmem:[%s1740_s1 + $0x110] sm:$0xff]  ;;  %v1327_v17 = vld [vmem:[%s1740_s1 + $0x148] sm:$0xff] }
  0x18   :  { %748 = vmatpush.bf16.msra.mxu2 %v1304_v22  ;;  %v1337_v10 = vld [vmem:[%s1740_s1 + $0x198] sm:$0xff]  ;;  %v1328_v13 = vld [vmem:[%s1740_s1 + $0x150] sm:$0xff]  ;;  %v1335_v18 = vld [vmem:[%s1740_s1 + $0x188] sm:$0xff] }
  0x19   :  { %767 = vmatpush.bf16.msra.mxu3 %v1312_v23  ;;  %v1345_v11 = vld [vmem:[%s1740_s1 + $0x1d8] sm:$0xff]  ;;  %v1336_v14 = vld [vmem:[%s1740_s1 + $0x190] sm:$0xff]  ;;  %v1343_v19 = vld [vmem:[%s1740_s1 + $0x1c8] sm:$0xff] }
  0x1a   :  { %711 = vmatpush.bf16.msra.mxu0 %v1287_v24  ;;  %v1344_v15 = vld [vmem:[%s1740_s1 + $0x1d0] sm:$0xff]  ;;  %v1318_v20 = vld [vmem:[%s1740_s1 + $0x100] sm:$0xff]  ;;  %v1355_v38 = vld [vmem:[%s1740_s1 + $0x228] sm:$0xff] }
  0x1b   :  { %730 = vmatpush.bf16.msra.mxu1 %v1295_v25  ;;  %v1326_v21 = vld [vmem:[%s1740_s1 + $0x140] sm:$0xff]  ;;  %v926_v24 = vld [vmem:[%s1741_s0 + $0x10] sm:$0xf]  ;;  %v1274_v25 = vld [vmem:[%s1741_s0 + $0x30] sm:$0xf0] }
  0x1c   :  { %749 = vmatpush.bf16.msra.mxu2 %v1303_v26  ;;  %v1334_v22 = vld [vmem:[%s1740_s1 + $0x180] sm:$0xff]  ;;  %v1357_v26 = vld [vmem:[%s1740_s1 + $0x238] sm:$0xff]  ;;  %v927_v33 = vor.u32 %v1274_v25, %v926_v24  ;;  %v1356_v37 = vld [vmem:[%s1740_s1 + $0x230] sm:$0xff] }
  0x1d   :  { %768 = vmatpush.bf16.msra.mxu3 %v1311_v27  ;;  %v1342_v23 = vld [vmem:[%s1740_s1 + $0x1c0] sm:$0xff]  ;;  %v1270_v27 = vld [vmem:[%s1741_s0 + $0x14] sm:$0xf] }
  0x1e   :  { %712 = vmatpush.bf16.msra.mxu0 %v1286_v28  ;;  %v928_v28 = vld [vmem:[%s1741_s0 + $0x34] sm:$0xf0]  ;;  %v936_v32 = vld [vmem:[%s1741_s0 + $0x3c] sm:$0xf0] }
  0x1f   :  { %731 = vmatpush.bf16.msra.mxu1 %v1294_v29  ;;  %v934_v29 = vld [vmem:[%s1741_s0 + $0x18] sm:$0xf]  ;;  %v931_v34 = vor.u32 %v1270_v27, %v928_v28  ;;  %v1354_v39 = vld [vmem:[%s1740_s1 + $0x220] sm:$0xff] }
  0x20   :  { %750 = vmatpush.bf16.msra.mxu2 %v1302_v30  ;;  %v1275_v30 = vld [vmem:[%s1741_s0 + $0x38] sm:$0xf0] }
  0x21   :  { %769 = vmatpush.bf16.msra.mxu3 %v1310_v31  ;;  %713 = vmatmul.bf16.vlgmr.msra.gmra.mxu0 %v911_v42  ;;  %v1271_v31 = vld [vmem:[%s1741_s0 + $0x1c] sm:$0xf]  ;;  %v935_v35 = vor.u32 %v1275_v30, %v934_v29 }
  0x22   :  { %781 = vmatpush.bf16.msrb.mxu0 %v1325_v40  ;;  %732 = vmatmul.bf16.vlgmr.msra.gmra.mxu1 %v915_v43  ;;  %v939_v36 = vor.u32 %v1271_v31, %v936_v32  ;;  %v962_v40 = vld [vmem:[%s1741_s0 + $0x58] sm:$0xf]  ;;  %v1279_v42 = vld [vmem:[%s1741_s0 + $0x5c] sm:$0xf]  ;;  %v964_v43 = vld [vmem:[%s1741_s0 + $0x7c] sm:$0xf0] }
  0x23   :  { %800 = vmatpush.bf16.msrb.mxu1 %v1333_v41  ;;  %751 = vmatmul.bf16.vlgmr.msra.gmra.mxu2 %v919_v44  ;;  %v1283_v41 = vld [vmem:[%s1741_s0 + $0x78] sm:$0xf0]  ;;  %v970_v44 = vld [vmem:[%s1741_s0 + $0x60] sm:$0xf] }
  0x24   :  { %770 = vmatmul.bf16.vlgmr.msra.gmra.mxu3 %v923_v45  ;;  %819 = vmatpush.bf16.msrb.mxu2 %v1341_v46  ;;  %v1284_v45 = vld [vmem:[%s1741_s0 + $0x80] sm:$0xf0] }
  0x25   :  { %838 = vmatpush.bf16.msrb.mxu3 %v1349_v47  ;;  %v1280_v46 = vld [vmem:[%s1741_s0 + $0x64] sm:$0xf]  ;;  %v972_v47 = vld [vmem:[%s1741_s0 + $0x84] sm:$0xf0] }
  0x26   :  { %782 = vmatpush.bf16.msrb.mxu0 %v1324_v48  ;;  %v1353_v48 = vld [vmem:[%s1740_s1 + $0x218] sm:$0xff] }
  0x27   :  { %801 = vmatpush.bf16.msrb.mxu1 %v1332_v49  ;;  %v963_v49 = vor.u32 %v1283_v41, %v962_v40 }
  0x28   :  { %820 = vmatpush.bf16.msrb.mxu2 %v1340_v50  ;;  %v967_v50 = vor.u32 %v1279_v42, %v964_v43 }
  0x29   :  { %839 = vmatpush.bf16.msrb.mxu3 %v1348_v51  ;;  %v971_v51 = vor.u32 %v1284_v45, %v970_v44 }
  0x2a   :  { %783 = vmatpush.bf16.msrb.mxu0 %v1323_v52  ;;  %v975_v52 = vor.u32 %v1280_v46, %v972_v47 }
  0x2b   :  { %802 = vmatpush.bf16.msrb.mxu1 %v1331_v53  ;;  %v1352_v53 = vld [vmem:[%s1740_s1 + $0x210] sm:$0xff] }
  0x2c   :  { %821 = vmatpush.bf16.msrb.mxu2 %v1339_v54  ;;  %v1351_v54 = vld [vmem:[%s1740_s1 + $0x208] sm:$0xff] }
  0x2d   :  { %840 = vmatpush.bf16.msrb.mxu3 %v1347_v55  ;;  %v1350_v55 = vld [vmem:[%s1740_s1 + $0x200] sm:$0xff] }
  0x2e   :  { %784 = vmatpush.bf16.msrb.mxu0 %v1322_v56  ;;  %v942_v56 = vld [vmem:[%s1741_s0 + $0x20] sm:$0xf] }
  0x2f   :  { %803 = vmatpush.bf16.msrb.mxu1 %v1330_v57  ;;  %v1276_v57 = vld [vmem:[%s1741_s0 + $0x40] sm:$0xf0] }
  0x30   :  { %822 = vmatpush.bf16.msrb.mxu2 %v1338_v58  ;;  %v978_v58 = vld [vmem:[%s1741_s0 + $0x68] sm:$0xf]  ;;  %v943_v60 = vor.u32 %v1276_v57, %v942_v56 }
  0x31   :  { %841 = vmatpush.bf16.msrb.mxu3 %v1346_v59  ;;  %718 = vmatmul.bf16.gmra.mxu0 %v947_v6  ;;  %v1285_v59 = vld [vmem:[%s1741_s0 + $0x88] sm:$0xf0] }
  0x32   :  { %785 = vmatpush.bf16.msrb.mxu0 %v1321_v4  ;;  %737 = vmatmul.bf16.gmra.mxu1 %v951_v7  ;;  %v979_v61 = vor.u32 %v1285_v59, %v978_v58  ;;  %v1377_v58 = vld [vmem:[%s1742_s2] ss:$0 sm:$0xff] }
  0x33   :  { %804 = vmatpush.bf16.msrb.mxu1 %v1329_v5  ;;  %756 = vmatmul.bf16.gmra.mxu2 %v955_v8 }
  0x34   :  { %775 = vmatmul.bf16.gmra.mxu3 %v959_v9  ;;  %823 = vmatpush.bf16.msrb.mxu2 %v1337_v10 }
  0x35   :  { %842 = vmatpush.bf16.msrb.mxu3 %v1345_v11 }
  0x36   :  { %786 = vmatpush.bf16.msrb.mxu0 %v1320_v12 }
  0x37   :  { %805 = vmatpush.bf16.msrb.mxu1 %v1328_v13 }
  0x38   :  { %824 = vmatpush.bf16.msrb.mxu2 %v1336_v14 }
  0x39   :  { %843 = vmatpush.bf16.msrb.mxu3 %v1344_v15 }
  0x3a   :  { %787 = vmatpush.bf16.msrb.mxu0 %v1319_v16 }
  0x3b   :  { %806 = vmatpush.bf16.msrb.mxu1 %v1327_v17 }
  0x3c   :  { %825 = vmatpush.bf16.msrb.mxu2 %v1335_v18 }
  0x3d   :  { %844 = vmatpush.bf16.msrb.mxu3 %v1343_v19 }
  0x3e   :  { %788 = vmatpush.bf16.msrb.mxu0 %v1318_v20 }
  0x3f   :  { %807 = vmatpush.bf16.msrb.mxu1 %v1326_v21 }
  0x40   :  { %826 = vmatpush.bf16.msrb.mxu2 %v1334_v22 }
  0x41   :  { %845 = vmatpush.bf16.msrb.mxu3 %v1342_v23  ;;  %789 = vmatmul.bf16.vlgmr.msrb.gmra.mxu0 %v927_v33 }
  0x42   :  { %857 = vmatpush.bf16.msra.mxu0 %v1357_v26  ;;  %808 = vmatmul.bf16.vlgmr.msrb.gmra.mxu1 %v931_v34 }
  0x43   :  { %1369 = vmatpush.bf16.msra.mxu1 %v1357_v26  ;;  %827 = vmatmul.bf16.vlgmr.msrb.gmra.mxu2 %v935_v35 }
  0x44   :  { %846 = vmatmul.bf16.vlgmr.msrb.gmra.mxu3 %v939_v36 }
  0x46   :  { %858 = vmatpush.bf16.msra.mxu0 %v1356_v37 }
  0x47   :  { %1370 = vmatpush.bf16.msra.mxu1 %v1356_v37 }
  0x4a   :  { %859 = vmatpush.bf16.msra.mxu0 %v1355_v38 }
  0x4b   :  { %1371 = vmatpush.bf16.msra.mxu1 %v1355_v38 }
  0x4e   :  { %860 = vmatpush.bf16.msra.mxu0 %v1354_v39 }
  0x4f   :  { %1372 = vmatpush.bf16.msra.mxu1 %v1354_v39 }
  0x51   :  { %794 = vmatmul.bf16.gmra.mxu0 %v963_v49 }
  0x52   :  { %861 = vmatpush.bf16.msra.mxu0 %v1353_v48  ;;  %813 = vmatmul.bf16.gmra.mxu1 %v967_v50 }
  0x53   :  { %1373 = vmatpush.bf16.msra.mxu1 %v1353_v48  ;;  %832 = vmatmul.bf16.gmra.mxu2 %v971_v51 }
  0x54   :  { %851 = vmatmul.bf16.gmra.mxu3 %v975_v52 }
  0x56   :  { %862 = vmatpush.bf16.msra.mxu0 %v1352_v53 }
  0x57   :  { %1374 = vmatpush.bf16.msra.mxu1 %v1352_v53 }
  0x5a   :  { %863 = vmatpush.bf16.msra.mxu0 %v1351_v54 }
  0x5b   :  { %1375 = vmatpush.bf16.msra.mxu1 %v1351_v54 }
  0x5e   :  { %864 = vmatpush.bf16.msra.mxu0 %v1350_v55 }
  0x5f   :  { %1376 = vmatpush.bf16.msra.mxu1 %v1350_v55 }
  0x61   :  { %865 = vmatmul.bf16.vlgmr.msra.gmra.mxu0 %v943_v60 }
  0x62   :  { %870 = vmatmul.bf16.vlgmr.msra.gmra.mxu1 %v979_v61 }
  0x9e   :  { %v714_v62 = vpop.f32.mrf.mxu0 }
  0x9f   :  { %v733_v63 = vpop.f32.mrf.mxu1 }
  0xa0   :  { %v734_v20 = vadd.f32 %v733_v63, %v714_v62 }
  0xa6   :  { %v752_v0 = vpop.f32.mrf.mxu2  ;;  %v716_v2 = vpop.f32.mrf.mxu0 }
  0xa7   :  { %v771_v1 = vpop.f32.mrf.mxu3  ;;  %v735_v3 = vpop.f32.mrf.mxu1  ;;  %v753_v25 = vadd.f32 %v752_v0, %v734_v20  ;;  %v1378_v0 = vld [vmem:[%s1743_s3] ss:$0 sm:$0xff] }
  0xa8   :  { %v736_v29 = vadd.f32 %v735_v3, %v716_v2 }
  0xa9   :  { %v772_v28 = vadd.f32 %v771_v1, %v753_v25 }
  0xae   :  { %v754_v4 = vpop.f32.mrf.mxu2  ;;  %v719_v6 = vpop.f32.mrf.mxu0 }
  0xaf   :  { %v773_v5 = vpop.f32.mrf.mxu3  ;;  %v738_v7 = vpop.f32.mrf.mxu1  ;;  %v755_v32 = vadd.f32 %v754_v4, %v736_v29 }
  0xb0   :  { %v739_v21 = vadd.f32 %v738_v7, %v719_v6 }
  0xb1   :  { %v774_v39 = vadd.f32 %v773_v5, %v755_v32 }
  0xb6   :  { %v757_v8 = vpop.f32.mrf.mxu2  ;;  %v721_v10 = vpop.f32.mrf.mxu0 }
  0xb7   :  { %v776_v9 = vpop.f32.mrf.mxu3  ;;  %v740_v11 = vpop.f32.mrf.mxu1  ;;  %v758_v26 = vadd.f32 %v757_v8, %v739_v21 }
  0xb8   :  { %v741_v31 = vadd.f32 %v740_v11, %v721_v10 }
  0xb9   :  { %v777_v30 = vadd.f32 %v776_v9, %v758_v26 }
  0xbe   :  { %v759_v12 = vpop.f32.mrf.mxu2  ;;  %v790_v14 = vpop.f32.mrf.mxu0 }
  0xbf   :  { %v778_v13 = vpop.f32.mrf.mxu3  ;;  %v809_v15 = vpop.f32.mrf.mxu1  ;;  %v760_v33 = vadd.f32 %v759_v12, %v741_v31  ;;  %v791_v34 = vadd.f32 %v790_v14, %v772_v28 }
  0xc1   :  { %v779_v40 = vadd.f32 %v778_v13, %v760_v33  ;;  %v810_v41 = vadd.f32 %v809_v15, %v791_v34 }
  0xc6   :  { %v828_v16 = vpop.f32.mrf.mxu2  ;;  %v792_v18 = vpop.f32.mrf.mxu0 }
  0xc7   :  { %v847_v17 = vpop.f32.mrf.mxu3  ;;  %v811_v19 = vpop.f32.mrf.mxu1  ;;  %v829_v44 = vadd.f32 %v828_v16, %v810_v41  ;;  %v793_v45 = vadd.f32 %v792_v18, %v774_v39 }
  0xc9   :  { %v848_v51 = vadd.f32 %v847_v17, %v829_v44  ;;  %v812_v52 = vadd.f32 %v811_v19, %v793_v45 }
  0xce   :  { %v830_v22 = vpop.f32.mrf.mxu2  ;;  %v795_v23 = vpop.f32.mrf.mxu0 }
  0xcf   :  { %v814_v24 = vpop.f32.mrf.mxu1  ;;  %v849_v27 = vpop.f32.mrf.mxu3  ;;  %v796_v35 = vadd.f32 %v795_v23, %v777_v30  ;;  %v831_v55 = vadd.f32 %v830_v22, %v812_v52 }
  0xd1   :  { %v815_v42 = vadd.f32 %v814_v24, %v796_v35  ;;  %v850_v61 = vadd.f32 %v849_v27, %v831_v55 }
  0xd6   :  { %v833_v36 = vpop.f32.mrf.mxu2  ;;  %v797_v37 = vpop.f32.mrf.mxu0 }
  0xd7   :  { %v816_v38 = vpop.f32.mrf.mxu1  ;;  %v852_v43 = vpop.f32.mrf.mxu3  ;;  %v834_v46 = vadd.f32 %v833_v36, %v815_v42  ;;  %v798_v47 = vadd.f32 %v797_v37, %v779_v40 }
  0xd9   :  { %v853_v53 = vadd.f32 %v852_v43, %v834_v46  ;;  %v817_v54 = vadd.f32 %v816_v38, %v798_v47 }
  0xde   :  { %v835_v48 = vpop.f32.mrf.mxu2  ;;  %v866_v49 = vpop.f32.mrf.mxu0 }
  0xdf   :  { %v871_v50 = vpop.f32.mrf.mxu1  ;;  %v836_v56 = vadd.f32 %v835_v48, %v817_v54  ;;  %v867_v57 = vadd.f32 %v866_v49, %v848_v51  ;;  %v854_v60 = vpop.f32.mrf.mxu3 }
  0xe0   :  { %v872_v59 = vadd.f32 %v871_v50, %v853_v53 }
  0xe1   :  { %v855_v62 = vadd.f32 %v854_v60, %v836_v56  ;;  %v880_v63 = vmul.f32 %v1377_v58, %v867_v57 }
  0xe2   :  { %v882_v1 = vmul.f32 %v1377_v58, %v872_v59 }
  0xe3   :  { %v888_v6 = vadd.f32 %v1378_v0, %v880_v63 }
  0xe4   :  { %v890_v7 = vadd.f32 %v1378_v0, %v882_v1 }
  0xe5   :  { %v892_v12 = vmax.f32 %v888_v6, 0.0 }
  0xe6   :  { %v868_v2 = vpop.f32.mrf.mxu0  ;;  %v894_v13 = vmax.f32 %v890_v7, 0.0 }
  0xe7   :  { %v873_v3 = vpop.f32.mrf.mxu1  ;;  %v869_v4 = vadd.f32 %v868_v2, %v850_v61 }
  0xe8   :  { %v874_v5 = vadd.f32 %v873_v3, %v855_v62 }
  0xe9   :  { %v881_v8 = vmul.f32 %v1377_v58, %v869_v4 }
  0xea   :  { %v883_v9 = vmul.f32 %v1377_v58, %v874_v5 }
  0xeb   :  { %v889_v10 = vadd.f32 %v1378_v0, %v881_v8 }
  0xec   :  { %v891_v11 = vadd.f32 %v1378_v0, %v883_v9 }
  0xed   :  { %v893_v14 = vmax.f32 %v889_v10, 0.0 }
  0xee   :  { %v895_v15 = vmax.f32 %v891_v11, 0.0 }
  0xef   :  { %v1361_v16 = vpack.c.bf16 %v893_v14, %v892_v12 }
  0xf0   :  { %v1366_v17 = vpack.c.bf16 %v895_v15, %v894_v13 }
  0xf1   :  { %1362 = vst [vmem:[%s1744_s4] sm:$0xff] %v1361_v16  }
  0xf2   :  { %1368 = vst [vmem:[%s1744_s4 + $0x8] sm:$0xff] %v1366_v17  }

// kernel: net_forward.31
= control target key start
LH: loop header
LB: loop body
LE: loop exit
PB: predicated region body
PF: predicated region fallthrough
CT: control target
= control target key end

     0   :  { %s503_s1 = inlined_call_operand.vmem [shape: bf16[256,128], index: 1, kind: input, shape index: {}]   ;;  %s504_s4 = inlined_call_operand.vmem [shape: f32[1,256], index: 4, kind: input, shape index: {}]   ;;  %s505_s0 = inlined_call_operand.vmem [shape: f32[32,256], index: 0, kind: input, shape index: {}]   ;;  %s506_s5 = inlined_call_operand.vmem [shape: f32[1,256], index: 5, kind: input, shape index: {}]   ;;  %s507_s2 = inlined_call_operand.vmem [shape: f32[1,128], index: 2, kind: input, shape index: {}]   ;;  %s508_s3 = inlined_call_operand.vmem [shape: f32[1,128], index: 3, kind: input, shape index: {}]   ;;  %s509_s6 = inlined_call_operand.vmem [shape: bf16[32,128], index: 6, kind: output, shape index: {}]  }
   0x1   :  { %v340_v0 = vld [vmem:[%s503_s1 + $0x38] sm:$0xff]  ;;  %v339_v2 = vld [vmem:[%s503_s1 + $0x30] sm:$0xff]  ;;  %v338_v4 = vld [vmem:[%s503_s1 + $0x28] sm:$0xff] }
   0x2   :  { %v348_v1 = vld [vmem:[%s503_s1 + $0x78] sm:$0xff]  ;;  %199 = vmatpush.bf16.msra.mxu0 %v340_v0  ;;  %360 = vmatpush.bf16.msra.mxu2 %v340_v0  ;;  %v347_v3 = vld [vmem:[%s503_s1 + $0x70] sm:$0xff]  ;;  %v346_v5 = vld [vmem:[%s503_s1 + $0x68] sm:$0xff] }
   0x3   :  { %218 = vmatpush.bf16.msra.mxu1 %v348_v1  ;;  %368 = vmatpush.bf16.msra.mxu3 %v348_v1  ;;  %v31_v6 = vld [vmem:[%s504_s4] sm:$0x3]  ;;  %v336_v9 = vld [vmem:[%s503_s1 + $0x18] sm:$0xff]  ;;  %v25_v13 = vld [vmem:[%s505_s0 + $0x10] sm:$0xff] }
   0x4   :  { %v337_v7 = vld [vmem:[%s503_s1 + $0x20] sm:$0xff]  ;;  %v33_v10 = vperm.slane %v31_v6, 0  ;;  %v344_v11 = vld [vmem:[%s503_s1 + $0x58] sm:$0xff]  ;;  %v34_v15 = vperm.slane %v31_v6, 1  ;;  %v29_v17 = vld [vmem:[%s505_s0 + $0x30] sm:$0xff] }
   0x5   :  { %v345_v8 = vld [vmem:[%s503_s1 + $0x60] sm:$0xff]  ;;  %v24_v18 = vld [vmem:[%s505_s0 + $0x8] sm:$0xff]  ;;  %v26_v19 = vld [vmem:[%s505_s0 + $0x18] sm:$0xff] }
   0x6   :  { %200 = vmatpush.bf16.msra.mxu0 %v339_v2  ;;  %361 = vmatpush.bf16.msra.mxu2 %v339_v2  ;;  %v23_v12 = vld [vmem:[%s505_s0] sm:$0xff]  ;;  %v28_v20 = vld [vmem:[%s505_s0 + $0x28] sm:$0xff]  ;;  %v30_v21 = vld [vmem:[%s505_s0 + $0x38] sm:$0xff]  ;;  %v39_v25 = vmul.f32 %v33_v10, %v25_v13  ;;  %v43_v27 = vmul.f32 %v33_v10, %v29_v17  ;;  %v38_v28 = vmul.f32 %v34_v15, %v24_v18 }
   0x7   :  { %219 = vmatpush.bf16.msra.mxu1 %v347_v3  ;;  %369 = vmatpush.bf16.msra.mxu3 %v347_v3  ;;  %v45_v14 = vld [vmem:[%s506_s5] sm:$0x3]  ;;  %v37_v22 = vmul.f32 %v33_v10, %v23_v12  ;;  %v335_v29 = vld [vmem:[%s503_s1 + $0x10] sm:$0xff]  ;;  %v40_v30 = vmul.f32 %v34_v15, %v26_v19  ;;  %v42_v31 = vmul.f32 %v34_v15, %v28_v20  ;;  %v334_v39 = vld [vmem:[%s503_s1 + $0x8] sm:$0xff] }
   0x8   :  { %v27_v16 = vld [vmem:[%s505_s0 + $0x20] sm:$0xff]  ;;  %v47_v23 = vperm.slane %v45_v14, 0  ;;  %v48_v24 = vperm.slane %v45_v14, 1  ;;  %v44_v32 = vmul.f32 %v34_v15, %v30_v21  ;;  %v343_v33 = vld [vmem:[%s503_s1 + $0x50] sm:$0xff]  ;;  %v342_v43 = vld [vmem:[%s503_s1 + $0x48] sm:$0xff] }
   0x9   :  { %v41_v26 = vmul.f32 %v33_v10, %v27_v16  ;;  %v333_v48 = vld [vmem:[%s503_s1] sm:$0xff] }
   0xa   :  { %201 = vmatpush.bf16.msra.mxu0 %v338_v4  ;;  %362 = vmatpush.bf16.msra.mxu2 %v338_v4  ;;  %v51_v34 = vadd.f32 %v47_v23, %v37_v22  ;;  %v53_v35 = vadd.f32 %v47_v23, %v39_v25  ;;  %v57_v37 = vadd.f32 %v47_v23, %v43_v27  ;;  %v341_v53 = vld [vmem:[%s503_s1 + $0x40] sm:$0xff] }
   0xb   :  { %220 = vmatpush.bf16.msra.mxu1 %v346_v5  ;;  %370 = vmatpush.bf16.msra.mxu3 %v346_v5  ;;  %v55_v36 = vadd.f32 %v47_v23, %v41_v26  ;;  %v52_v38 = vadd.f32 %v48_v24, %v38_v28  ;;  %v54_v40 = vadd.f32 %v48_v24, %v40_v30  ;;  %v376_v61 = vld [vmem:[%s507_s2] ss:$0 sm:$0xff] }
   0xc   :  { %v56_v41 = vadd.f32 %v48_v24, %v42_v31  ;;  %v58_v42 = vadd.f32 %v48_v24, %v44_v32  ;;  %v59_v44 = vmax.f32 %v51_v34, 0.0  ;;  %v61_v45 = vmax.f32 %v53_v35, 0.0  ;;  %v377_v1 = vld [vmem:[%s508_s3] ss:$0 sm:$0xff] }
   0xd   :  { %v63_v46 = vmax.f32 %v55_v36, 0.0  ;;  %v65_v47 = vmax.f32 %v57_v37, 0.0  ;;  %v60_v49 = vmax.f32 %v52_v38, 0.0  ;;  %v62_v50 = vmax.f32 %v54_v40, 0.0 }
   0xe   :  { %202 = vmatpush.bf16.msra.mxu0 %v337_v7  ;;  %363 = vmatpush.bf16.msra.mxu2 %v337_v7  ;;  %v64_v51 = vmax.f32 %v56_v41, 0.0  ;;  %v66_v52 = vmax.f32 %v58_v42, 0.0  ;;  %v67_v54 = vpack.c.bf16 %v61_v45, %v59_v44 }
   0xf   :  { %221 = vmatpush.bf16.msra.mxu1 %v345_v8  ;;  %371 = vmatpush.bf16.msra.mxu3 %v345_v8  ;;  %v69_v55 = vpack.c.bf16 %v65_v47, %v63_v46  ;;  %v68_v56 = vpack.c.bf16 %v62_v50, %v60_v49 }
  0x10   :  { %v70_v57 = vpack.c.bf16 %v66_v52, %v64_v51 }
  0x12   :  { %203 = vmatpush.bf16.msra.mxu0 %v336_v9  ;;  %364 = vmatpush.bf16.msra.mxu2 %v336_v9 }
  0x13   :  { %222 = vmatpush.bf16.msra.mxu1 %v344_v11  ;;  %372 = vmatpush.bf16.msra.mxu3 %v344_v11 }
  0x16   :  { %204 = vmatpush.bf16.msra.mxu0 %v335_v29  ;;  %365 = vmatpush.bf16.msra.mxu2 %v335_v29 }
  0x17   :  { %223 = vmatpush.bf16.msra.mxu1 %v343_v33  ;;  %373 = vmatpush.bf16.msra.mxu3 %v343_v33 }
  0x1a   :  { %205 = vmatpush.bf16.msra.mxu0 %v334_v39  ;;  %366 = vmatpush.bf16.msra.mxu2 %v334_v39 }
  0x1b   :  { %224 = vmatpush.bf16.msra.mxu1 %v342_v43  ;;  %374 = vmatpush.bf16.msra.mxu3 %v342_v43 }
  0x1e   :  { %206 = vmatpush.bf16.msra.mxu0 %v333_v48  ;;  %367 = vmatpush.bf16.msra.mxu2 %v333_v48 }
  0x1f   :  { %225 = vmatpush.bf16.msra.mxu1 %v341_v53  ;;  %375 = vmatpush.bf16.msra.mxu3 %v341_v53 }
  0x21   :  { %207 = vmatmul.bf16.vlgmr.msra.gmra.mxu0 %v67_v54  ;;  %212 = vmatmul.bf16.vlgmr.msra.gmra.mxu2 %v69_v55 }
  0x22   :  { %226 = vmatmul.bf16.vlgmr.msra.gmra.mxu1 %v68_v56  ;;  %231 = vmatmul.bf16.vlgmr.msra.gmra.mxu3 %v70_v57 }
  0x9e   :  { %v208_v58 = vpop.f32.mrf.mxu0 }
  0x9f   :  { %v227_v59 = vpop.f32.mrf.mxu1 }
  0xa0   :  { %v228_v60 = vadd.f32 %v227_v59, %v208_v58 }
  0xa2   :  { %v241_v0 = vmul.f32 %v376_v61, %v228_v60 }
  0xa4   :  { %v213_v62 = vpop.f32.mrf.mxu2  ;;  %v249_v6 = vadd.f32 %v377_v1, %v241_v0 }
  0xa5   :  { %v232_v63 = vpop.f32.mrf.mxu3 }
  0xa6   :  { %v210_v2 = vpop.f32.mrf.mxu0  ;;  %v233_v4 = vadd.f32 %v232_v63, %v213_v62  ;;  %v253_v12 = vmax.f32 %v249_v6, 0.0 }
  0xa7   :  { %v229_v3 = vpop.f32.mrf.mxu1 }
  0xa8   :  { %v230_v5 = vadd.f32 %v229_v3, %v210_v2  ;;  %v243_v8 = vmul.f32 %v376_v61, %v233_v4 }
  0xaa   :  { %v242_v7 = vmul.f32 %v376_v61, %v230_v5  ;;  %v251_v15 = vadd.f32 %v377_v1, %v243_v8 }
  0xac   :  { %v250_v9 = vadd.f32 %v377_v1, %v242_v7  ;;  %v215_v10 = vpop.f32.mrf.mxu2  ;;  %v255_v19 = vmax.f32 %v251_v15, 0.0 }
  0xad   :  { %v234_v11 = vpop.f32.mrf.mxu3 }
  0xae   :  { %v254_v13 = vmax.f32 %v250_v9, 0.0  ;;  %v235_v14 = vadd.f32 %v234_v11, %v215_v10 }
  0xb0   :  { %v352_v16 = vpack.c.bf16 %v254_v13, %v253_v12  ;;  %v244_v17 = vmul.f32 %v376_v61, %v235_v14 }
  0xb2   :  { %353 = vst [vmem:[%s509_s6] sm:$0xff] %v352_v16   ;;  %v252_v18 = vadd.f32 %v377_v1, %v244_v17 }
  0xb4   :  { %v256_v20 = vmax.f32 %v252_v18, 0.0 }
  0xb6   :  { %v357_v21 = vpack.c.bf16 %v256_v20, %v255_v19 }
  0xb8   :  { %359 = vst [vmem:[%s509_s6 + $0x8] sm:$0xff] %v357_v21  }

// kernel: net_forward.34
= control target key start
LH: loop header
LB: loop body
LE: loop exit
PB: predicated region body
PF: predicated region fallthrough
CT: control target
= control target key end

     0   :  { %s1547_s1 = inlined_call_operand.vmem [shape: bf16[1024,128], index: 1, kind: input, shape index: {}]   ;;  %s1548_s0 = inlined_call_operand.vmem [shape: bf16[32,1024], index: 0, kind: input, shape index: {}]   ;;  %s1549_s2 = inlined_call_operand.vmem [shape: f32[1,128], index: 2, kind: input, shape index: {}]   ;;  %s1550_s3 = inlined_call_operand.vmem [shape: f32[1,128], index: 3, kind: input, shape index: {}]   ;;  %s1551_s4 = inlined_call_operand.vmem [shape: bf16[32,128], index: 4, kind: output, shape index: {}]  }
   0x1   :  { %v1152_v0 = vld [vmem:[%s1547_s1 + $0x38] sm:$0xff]  ;;  %v1151_v4 = vld [vmem:[%s1547_s1 + $0x30] sm:$0xff]  ;;  %v1150_v8 = vld [vmem:[%s1547_s1 + $0x28] sm:$0xff] }
   0x2   :  { %v1160_v1 = vld [vmem:[%s1547_s1 + $0x78] sm:$0xff]  ;;  %625 = vmatpush.bf16.msra.mxu0 %v1152_v0  ;;  %v1159_v5 = vld [vmem:[%s1547_s1 + $0x70] sm:$0xff]  ;;  %v1158_v9 = vld [vmem:[%s1547_s1 + $0x68] sm:$0xff] }
   0x3   :  { %v1168_v2 = vld [vmem:[%s1547_s1 + $0xb8] sm:$0xff]  ;;  %644 = vmatpush.bf16.msra.mxu1 %v1160_v1  ;;  %v1167_v6 = vld [vmem:[%s1547_s1 + $0xb0] sm:$0xff]  ;;  %v1166_v10 = vld [vmem:[%s1547_s1 + $0xa8] sm:$0xff] }
   0x4   :  { %v1176_v3 = vld [vmem:[%s1547_s1 + $0xf8] sm:$0xff]  ;;  %663 = vmatpush.bf16.msra.mxu2 %v1168_v2  ;;  %v1175_v7 = vld [vmem:[%s1547_s1 + $0xf0] sm:$0xff]  ;;  %v1174_v11 = vld [vmem:[%s1547_s1 + $0xe8] sm:$0xff] }
   0x5   :  { %682 = vmatpush.bf16.msra.mxu3 %v1176_v3  ;;  %v1149_v12 = vld [vmem:[%s1547_s1 + $0x20] sm:$0xff]  ;;  %v1148_v16 = vld [vmem:[%s1547_s1 + $0x18] sm:$0xff]  ;;  %v1147_v20 = vld [vmem:[%s1547_s1 + $0x10] sm:$0xff] }
   0x6   :  { %626 = vmatpush.bf16.msra.mxu0 %v1151_v4  ;;  %v1157_v13 = vld [vmem:[%s1547_s1 + $0x60] sm:$0xff]  ;;  %v1156_v17 = vld [vmem:[%s1547_s1 + $0x58] sm:$0xff]  ;;  %v1155_v21 = vld [vmem:[%s1547_s1 + $0x50] sm:$0xff] }
   0x7   :  { %645 = vmatpush.bf16.msra.mxu1 %v1159_v5  ;;  %v1165_v14 = vld [vmem:[%s1547_s1 + $0xa0] sm:$0xff]  ;;  %v1164_v18 = vld [vmem:[%s1547_s1 + $0x98] sm:$0xff]  ;;  %v1163_v22 = vld [vmem:[%s1547_s1 + $0x90] sm:$0xff] }
   0x8   :  { %664 = vmatpush.bf16.msra.mxu2 %v1167_v6  ;;  %v1173_v15 = vld [vmem:[%s1547_s1 + $0xe0] sm:$0xff]  ;;  %v1172_v19 = vld [vmem:[%s1547_s1 + $0xd8] sm:$0xff]  ;;  %v1171_v23 = vld [vmem:[%s1547_s1 + $0xd0] sm:$0xff] }
   0x9   :  { %683 = vmatpush.bf16.msra.mxu3 %v1175_v7  ;;  %v1146_v24 = vld [vmem:[%s1547_s1 + $0x8] sm:$0xff]  ;;  %v1145_v28 = vld [vmem:[%s1547_s1] sm:$0xff]  ;;  %v1200_v40 = vld [vmem:[%s1547_s1 + $0x1b8] sm:$0xff] }
   0xa   :  { %627 = vmatpush.bf16.msra.mxu0 %v1150_v8  ;;  %v1154_v25 = vld [vmem:[%s1547_s1 + $0x48] sm:$0xff]  ;;  %v1153_v29 = vld [vmem:[%s1547_s1 + $0x40] sm:$0xff]  ;;  %v1184_v41 = vld [vmem:[%s1547_s1 + $0x138] sm:$0xff] }
   0xb   :  { %646 = vmatpush.bf16.msra.mxu1 %v1158_v9  ;;  %v1162_v26 = vld [vmem:[%s1547_s1 + $0x88] sm:$0xff]  ;;  %v1161_v30 = vld [vmem:[%s1547_s1 + $0x80] sm:$0xff]  ;;  %v1192_v46 = vld [vmem:[%s1547_s1 + $0x178] sm:$0xff] }
   0xc   :  { %665 = vmatpush.bf16.msra.mxu2 %v1166_v10  ;;  %v1170_v27 = vld [vmem:[%s1547_s1 + $0xc8] sm:$0xff]  ;;  %v1169_v31 = vld [vmem:[%s1547_s1 + $0xc0] sm:$0xff]  ;;  %v1208_v47 = vld [vmem:[%s1547_s1 + $0x1f8] sm:$0xff] }
   0xd   :  { %684 = vmatpush.bf16.msra.mxu3 %v1174_v11  ;;  %v811_v32 = vld [vmem:[%s1548_s0] sm:$0xf]  ;;  %v1129_v34 = vld [vmem:[%s1548_s0 + $0x4] sm:$0xf]  ;;  %v819_v36 = vld [vmem:[%s1548_s0 + $0x8] sm:$0xf] }
   0xe   :  { %628 = vmatpush.bf16.msra.mxu0 %v1149_v12  ;;  %v1133_v33 = vld [vmem:[%s1548_s0 + $0x1c] sm:$0xf0]  ;;  %v813_v35 = vld [vmem:[%s1548_s0 + $0x20] sm:$0xf0]  ;;  %v1134_v37 = vld [vmem:[%s1548_s0 + $0x24] sm:$0xf0] }
   0xf   :  { %647 = vmatpush.bf16.msra.mxu1 %v1157_v13  ;;  %v1130_v38 = vld [vmem:[%s1548_s0 + $0xc] sm:$0xf]  ;;  %v812_v42 = vor.u32 %v1133_v33, %v811_v32  ;;  %v816_v43 = vor.u32 %v1129_v34, %v813_v35  ;;  %v820_v44 = vor.u32 %v1134_v37, %v819_v36  ;;  %v1199_v48 = vld [vmem:[%s1547_s1 + $0x1b0] sm:$0xff]  ;;  %v1197_v56 = vld [vmem:[%s1547_s1 + $0x1a0] sm:$0xff] }
  0x10   :  { %666 = vmatpush.bf16.msra.mxu2 %v1165_v14  ;;  %v821_v39 = vld [vmem:[%s1548_s0 + $0x28] sm:$0xf0]  ;;  %v1183_v49 = vld [vmem:[%s1547_s1 + $0x130] sm:$0xff]  ;;  %v1181_v57 = vld [vmem:[%s1547_s1 + $0x120] sm:$0xff] }
  0x11   :  { %685 = vmatpush.bf16.msra.mxu3 %v1173_v15  ;;  %v824_v45 = vor.u32 %v1130_v38, %v821_v39  ;;  %v1191_v50 = vld [vmem:[%s1547_s1 + $0x170] sm:$0xff]  ;;  %v1198_v52 = vld [vmem:[%s1547_s1 + $0x1a8] sm:$0xff]  ;;  %v1189_v58 = vld [vmem:[%s1547_s1 + $0x160] sm:$0xff] }
  0x12   :  { %629 = vmatpush.bf16.msra.mxu0 %v1148_v16  ;;  %v1207_v51 = vld [vmem:[%s1547_s1 + $0x1f0] sm:$0xff]  ;;  %v1182_v53 = vld [vmem:[%s1547_s1 + $0x128] sm:$0xff]  ;;  %v1205_v59 = vld [vmem:[%s1547_s1 + $0x1e0] sm:$0xff] }
  0x13   :  { %648 = vmatpush.bf16.msra.mxu1 %v1156_v17  ;;  %v1190_v54 = vld [vmem:[%s1547_s1 + $0x168] sm:$0xff]  ;;  %v843_v60 = vld [vmem:[%s1548_s0 + $0x40] sm:$0xf]  ;;  %v1137_v62 = vld [vmem:[%s1548_s0 + $0x44] sm:$0xf] }
  0x14   :  { %667 = vmatpush.bf16.msra.mxu2 %v1164_v18  ;;  %v1206_v55 = vld [vmem:[%s1547_s1 + $0x1e8] sm:$0xff]  ;;  %v1141_v61 = vld [vmem:[%s1548_s0 + $0x5c] sm:$0xf0]  ;;  %v845_v63 = vld [vmem:[%s1548_s0 + $0x60] sm:$0xf0] }
  0x15   :  { %686 = vmatpush.bf16.msra.mxu3 %v1172_v19  ;;  %v851_v0 = vld [vmem:[%s1548_s0 + $0x48] sm:$0xf]  ;;  %v1138_v2 = vld [vmem:[%s1548_s0 + $0x4c] sm:$0xf]  ;;  %v1196_v4 = vld [vmem:[%s1547_s1 + $0x198] sm:$0xff]  ;;  %v844_v6 = vor.u32 %v1141_v61, %v843_v60  ;;  %v848_v7 = vor.u32 %v1137_v62, %v845_v63 }
  0x16   :  { %630 = vmatpush.bf16.msra.mxu0 %v1147_v20  ;;  %v1142_v1 = vld [vmem:[%s1548_s0 + $0x64] sm:$0xf0]  ;;  %v853_v3 = vld [vmem:[%s1548_s0 + $0x68] sm:$0xf0]  ;;  %v1180_v5 = vld [vmem:[%s1547_s1 + $0x118] sm:$0xff] }
  0x17   :  { %649 = vmatpush.bf16.msra.mxu1 %v1155_v21  ;;  %v852_v8 = vor.u32 %v1142_v1, %v851_v0  ;;  %v856_v9 = vor.u32 %v1138_v2, %v853_v3  ;;  %v1188_v10 = vld [vmem:[%s1547_s1 + $0x158] sm:$0xff]  ;;  %v1195_v12 = vld [vmem:[%s1547_s1 + $0x190] sm:$0xff]  ;;  %v1194_v16 = vld [vmem:[%s1547_s1 + $0x188] sm:$0xff] }
  0x18   :  { %668 = vmatpush.bf16.msra.mxu2 %v1163_v22  ;;  %v1204_v11 = vld [vmem:[%s1547_s1 + $0x1d8] sm:$0xff]  ;;  %v1179_v13 = vld [vmem:[%s1547_s1 + $0x110] sm:$0xff]  ;;  %v1178_v17 = vld [vmem:[%s1547_s1 + $0x108] sm:$0xff] }
  0x19   :  { %687 = vmatpush.bf16.msra.mxu3 %v1171_v23  ;;  %v1187_v14 = vld [vmem:[%s1547_s1 + $0x150] sm:$0xff]  ;;  %v1186_v18 = vld [vmem:[%s1547_s1 + $0x148] sm:$0xff]  ;;  %v1193_v20 = vld [vmem:[%s1547_s1 + $0x180] sm:$0xff] }
  0x1a   :  { %631 = vmatpush.bf16.msra.mxu0 %v1146_v24  ;;  %v1203_v15 = vld [vmem:[%s1547_s1 + $0x1d0] sm:$0xff]  ;;  %v1202_v19 = vld [vmem:[%s1547_s1 + $0x1c8] sm:$0xff]  ;;  %v1177_v21 = vld [vmem:[%s1547_s1 + $0x100] sm:$0xff] }
  0x1b   :  { %650 = vmatpush.bf16.msra.mxu1 %v1154_v25  ;;  %v1185_v22 = vld [vmem:[%s1547_s1 + $0x140] sm:$0xff]  ;;  %v827_v24 = vld [vmem:[%s1548_s0 + $0x10] sm:$0xf]  ;;  %v1139_v38 = vld [vmem:[%s1548_s0 + $0x54] sm:$0xf] }
  0x1c   :  { %669 = vmatpush.bf16.msra.mxu2 %v1162_v26  ;;  %v1201_v23 = vld [vmem:[%s1547_s1 + $0x1c0] sm:$0xff]  ;;  %v1135_v25 = vld [vmem:[%s1548_s0 + $0x2c] sm:$0xf0]  ;;  %v1131_v26 = vld [vmem:[%s1548_s0 + $0x14] sm:$0xf] }
  0x1d   :  { %688 = vmatpush.bf16.msra.mxu3 %v1170_v27  ;;  %v829_v27 = vld [vmem:[%s1548_s0 + $0x30] sm:$0xf0]  ;;  %v828_v32 = vor.u32 %v1135_v25, %v827_v24  ;;  %v859_v36 = vld [vmem:[%s1548_s0 + $0x50] sm:$0xf]  ;;  %v1221_v24 = vld [vmem:[%s1550_s3] ss:$0 sm:$0xff] }
  0x1e   :  { %632 = vmatpush.bf16.msra.mxu0 %v1145_v28  ;;  %v835_v28 = vld [vmem:[%s1548_s0 + $0x18] sm:$0xf]  ;;  %v832_v33 = vor.u32 %v1131_v26, %v829_v27  ;;  %v1143_v37 = vld [vmem:[%s1548_s0 + $0x6c] sm:$0xf0]  ;;  %v861_v39 = vld [vmem:[%s1548_s0 + $0x70] sm:$0xf0] }
  0x1f   :  { %651 = vmatpush.bf16.msra.mxu1 %v1153_v29  ;;  %v1136_v29 = vld [vmem:[%s1548_s0 + $0x34] sm:$0xf0] }
  0x20   :  { %670 = vmatpush.bf16.msra.mxu2 %v1161_v30  ;;  %v1132_v30 = vld [vmem:[%s1548_s0 + $0x1c] sm:$0xf]  ;;  %v836_v34 = vor.u32 %v1136_v29, %v835_v28 }
  0x21   :  { %689 = vmatpush.bf16.msra.mxu3 %v1169_v31  ;;  %633 = vmatmul.bf16.vlgmr.msra.gmra.mxu0 %v812_v42  ;;  %v837_v31 = vld [vmem:[%s1548_s0 + $0x38] sm:$0xf0] }
  0x22   :  { %701 = vmatpush.bf16.msrb.mxu0 %v1184_v41  ;;  %652 = vmatmul.bf16.vlgmr.msra.gmra.mxu1 %v816_v43  ;;  %v840_v35 = vor.u32 %v1132_v30, %v837_v31  ;;  %v1144_v41 = vld [vmem:[%s1548_s0 + $0x74] sm:$0xf0]  ;;  %v1140_v42 = vld [vmem:[%s1548_s0 + $0x5c] sm:$0xf] }
  0x23   :  { %671 = vmatmul.bf16.vlgmr.msra.gmra.mxu2 %v820_v44  ;;  %720 = vmatpush.bf16.msrb.mxu1 %v1192_v46  ;;  %v869_v43 = vld [vmem:[%s1548_s0 + $0x78] sm:$0xf0]  ;;  %v860_v44 = vor.u32 %v1143_v37, %v859_v36 }
  0x24   :  { %739 = vmatpush.bf16.msrb.mxu2 %v1200_v40  ;;  %690 = vmatmul.bf16.vlgmr.msra.gmra.mxu3 %v824_v45  ;;  %v867_v40 = vld [vmem:[%s1548_s0 + $0x58] sm:$0xf]  ;;  %v864_v45 = vor.u32 %v1139_v38, %v861_v39 }
  0x25   :  { %758 = vmatpush.bf16.msrb.mxu3 %v1208_v47  ;;  %v868_v46 = vor.u32 %v1144_v41, %v867_v40  ;;  %v872_v47 = vor.u32 %v1140_v42, %v869_v43 }
  0x26   :  { %702 = vmatpush.bf16.msrb.mxu0 %v1183_v49 }
  0x27   :  { %721 = vmatpush.bf16.msrb.mxu1 %v1191_v50 }
  0x28   :  { %740 = vmatpush.bf16.msrb.mxu2 %v1199_v48 }
  0x29   :  { %759 = vmatpush.bf16.msrb.mxu3 %v1207_v51 }
  0x2a   :  { %703 = vmatpush.bf16.msrb.mxu0 %v1182_v53 }
  0x2b   :  { %722 = vmatpush.bf16.msrb.mxu1 %v1190_v54 }
  0x2c   :  { %741 = vmatpush.bf16.msrb.mxu2 %v1198_v52 }
  0x2d   :  { %760 = vmatpush.bf16.msrb.mxu3 %v1206_v55 }
  0x2e   :  { %704 = vmatpush.bf16.msrb.mxu0 %v1181_v57 }
  0x2f   :  { %723 = vmatpush.bf16.msrb.mxu1 %v1189_v58 }
  0x30   :  { %742 = vmatpush.bf16.msrb.mxu2 %v1197_v56 }
  0x31   :  { %761 = vmatpush.bf16.msrb.mxu3 %v1205_v59  ;;  %638 = vmatmul.bf16.gmra.mxu0 %v844_v6 }
  0x32   :  { %705 = vmatpush.bf16.msrb.mxu0 %v1180_v5  ;;  %657 = vmatmul.bf16.gmra.mxu1 %v848_v7 }
  0x33   :  { %676 = vmatmul.bf16.gmra.mxu2 %v852_v8  ;;  %724 = vmatpush.bf16.msrb.mxu1 %v1188_v10 }
  0x34   :  { %743 = vmatpush.bf16.msrb.mxu2 %v1196_v4  ;;  %695 = vmatmul.bf16.gmra.mxu3 %v856_v9 }
  0x35   :  { %762 = vmatpush.bf16.msrb.mxu3 %v1204_v11 }
  0x36   :  { %706 = vmatpush.bf16.msrb.mxu0 %v1179_v13 }
  0x37   :  { %725 = vmatpush.bf16.msrb.mxu1 %v1187_v14 }
  0x38   :  { %744 = vmatpush.bf16.msrb.mxu2 %v1195_v12 }
  0x39   :  { %763 = vmatpush.bf16.msrb.mxu3 %v1203_v15 }
  0x3a   :  { %707 = vmatpush.bf16.msrb.mxu0 %v1178_v17 }
  0x3b   :  { %726 = vmatpush.bf16.msrb.mxu1 %v1186_v18 }
  0x3c   :  { %745 = vmatpush.bf16.msrb.mxu2 %v1194_v16 }
  0x3d   :  { %764 = vmatpush.bf16.msrb.mxu3 %v1202_v19  ;;  %v1220_v19 = vld [vmem:[%s1549_s2] ss:$0 sm:$0xff] }
  0x3e   :  { %708 = vmatpush.bf16.msrb.mxu0 %v1177_v21 }
  0x3f   :  { %727 = vmatpush.bf16.msrb.mxu1 %v1185_v22 }
  0x40   :  { %746 = vmatpush.bf16.msrb.mxu2 %v1193_v20 }
  0x41   :  { %765 = vmatpush.bf16.msrb.mxu3 %v1201_v23  ;;  %709 = vmatmul.bf16.vlgmr.msrb.gmra.mxu0 %v828_v32 }
  0x42   :  { %728 = vmatmul.bf16.vlgmr.msrb.gmra.mxu1 %v832_v33 }
  0x43   :  { %747 = vmatmul.bf16.vlgmr.msrb.gmra.mxu2 %v836_v34 }
  0x44   :  { %766 = vmatmul.bf16.vlgmr.msrb.gmra.mxu3 %v840_v35 }
  0x51   :  { %714 = vmatmul.bf16.gmra.mxu0 %v860_v44 }
  0x52   :  { %733 = vmatmul.bf16.gmra.mxu1 %v864_v45 }
  0x53   :  { %752 = vmatmul.bf16.gmra.mxu2 %v868_v46 }
  0x54   :  { %771 = vmatmul.bf16.gmra.mxu3 %v872_v47 }
  0x9e   :  { %v634_v48 = vpop.f32.mrf.mxu0 }
  0x9f   :  { %v653_v49 = vpop.f32.mrf.mxu1 }
  0xa0   :  { %v654_v62 = vadd.f32 %v653_v49, %v634_v48 }
  0xa6   :  { %v672_v50 = vpop.f32.mrf.mxu2  ;;  %v636_v52 = vpop.f32.mrf.mxu0 }
  0xa7   :  { %v691_v51 = vpop.f32.mrf.mxu3  ;;  %v655_v53 = vpop.f32.mrf.mxu1  ;;  %v673_v63 = vadd.f32 %v672_v50, %v654_v62 }
  0xa8   :  { %v656_v5 = vadd.f32 %v655_v53, %v636_v52 }
  0xa9   :  { %v692_v2 = vadd.f32 %v691_v51, %v673_v63 }
  0xae   :  { %v674_v54 = vpop.f32.mrf.mxu2  ;;  %v639_v56 = vpop.f32.mrf.mxu0 }
  0xaf   :  { %v693_v55 = vpop.f32.mrf.mxu3  ;;  %v658_v57 = vpop.f32.mrf.mxu1  ;;  %v675_v7 = vadd.f32 %v674_v54, %v656_v5 }
  0xb0   :  { %v659_v15 = vadd.f32 %v658_v57, %v639_v56 }
  0xb1   :  { %v694_v10 = vadd.f32 %v693_v55, %v675_v7 }
  0xb6   :  { %v677_v58 = vpop.f32.mrf.mxu2  ;;  %v641_v60 = vpop.f32.mrf.mxu0 }
  0xb7   :  { %v696_v59 = vpop.f32.mrf.mxu3  ;;  %v660_v61 = vpop.f32.mrf.mxu1  ;;  %v678_v17 = vadd.f32 %v677_v58, %v659_v15 }
  0xb8   :  { %v661_v28 = vadd.f32 %v660_v61, %v641_v60 }
  0xb9   :  { %v697_v22 = vadd.f32 %v696_v59, %v678_v17 }
  0xbe   :  { %v679_v0 = vpop.f32.mrf.mxu2  ;;  %v710_v3 = vpop.f32.mrf.mxu0 }
  0xbf   :  { %v698_v1 = vpop.f32.mrf.mxu3  ;;  %v729_v4 = vpop.f32.mrf.mxu1  ;;  %v711_v6 = vadd.f32 %v710_v3, %v692_v2  ;;  %v680_v32 = vadd.f32 %v679_v0, %v661_v28 }
  0xc1   :  { %v730_v8 = vadd.f32 %v729_v4, %v711_v6  ;;  %v699_v38 = vadd.f32 %v698_v1, %v680_v32 }
  0xc6   :  { %v748_v9 = vpop.f32.mrf.mxu2  ;;  %v712_v13 = vpop.f32.mrf.mxu0 }
  0xc7   :  { %v749_v11 = vadd.f32 %v748_v9, %v730_v8  ;;  %v767_v12 = vpop.f32.mrf.mxu3  ;;  %v731_v14 = vpop.f32.mrf.mxu1  ;;  %v713_v16 = vadd.f32 %v712_v13, %v694_v10 }
  0xc9   :  { %v768_v18 = vadd.f32 %v767_v12, %v749_v11  ;;  %v732_v20 = vadd.f32 %v731_v14, %v713_v16 }
  0xcb   :  { %v781_v23 = vmul.f32 %v1220_v19, %v768_v18 }
  0xcd   :  { %v789_v33 = vadd.f32 %v1221_v24, %v781_v23 }
  0xce   :  { %v750_v21 = vpop.f32.mrf.mxu2  ;;  %v715_v27 = vpop.f32.mrf.mxu0 }
  0xcf   :  { %v751_v25 = vadd.f32 %v750_v21, %v732_v20  ;;  %v769_v26 = vpop.f32.mrf.mxu3  ;;  %v716_v30 = vadd.f32 %v715_v27, %v697_v22  ;;  %v734_v31 = vpop.f32.mrf.mxu1  ;;  %v793_v39 = vmax.f32 %v789_v33, 0.0 }
  0xd1   :  { %v770_v29 = vadd.f32 %v769_v26, %v751_v25  ;;  %v735_v36 = vadd.f32 %v734_v31, %v716_v30 }
  0xd3   :  { %v782_v34 = vmul.f32 %v1220_v19, %v770_v29 }
  0xd5   :  { %v790_v35 = vadd.f32 %v1221_v24, %v782_v34 }
  0xd6   :  { %v753_v37 = vpop.f32.mrf.mxu2  ;;  %v717_v43 = vpop.f32.mrf.mxu0 }
  0xd7   :  { %v794_v40 = vmax.f32 %v790_v35, 0.0  ;;  %v754_v41 = vadd.f32 %v753_v37, %v735_v36  ;;  %v772_v42 = vpop.f32.mrf.mxu3  ;;  %v718_v45 = vadd.f32 %v717_v43, %v699_v38  ;;  %v736_v47 = vpop.f32.mrf.mxu1 }
  0xd9   :  { %v1212_v44 = vpack.c.bf16 %v794_v40, %v793_v39  ;;  %v773_v46 = vadd.f32 %v772_v42, %v754_v41  ;;  %v737_v48 = vadd.f32 %v736_v47, %v718_v45 }
  0xdb   :  { %1213 = vst [vmem:[%s1551_s4] sm:$0xff] %v1212_v44   ;;  %v783_v50 = vmul.f32 %v1220_v19, %v773_v46 }
  0xdd   :  { %v791_v54 = vadd.f32 %v1221_v24, %v783_v50 }
  0xde   :  { %v755_v49 = vpop.f32.mrf.mxu2 }
  0xdf   :  { %v756_v51 = vadd.f32 %v755_v49, %v737_v48  ;;  %v774_v52 = vpop.f32.mrf.mxu3  ;;  %v795_v57 = vmax.f32 %v791_v54, 0.0 }
  0xe1   :  { %v775_v53 = vadd.f32 %v774_v52, %v756_v51 }
  0xe3   :  { %v784_v55 = vmul.f32 %v1220_v19, %v775_v53 }
  0xe5   :  { %v792_v56 = vadd.f32 %v1221_v24, %v784_v55 }
  0xe7   :  { %v796_v58 = vmax.f32 %v792_v56, 0.0 }
  0xe9   :  { %v1217_v59 = vpack.c.bf16 %v796_v58, %v795_v57 }
  0xeb   :  { %1219 = vst [vmem:[%s1551_s4 + $0x8] sm:$0xff] %v1217_v59  }

// kernel: net_forward.38
= control target key start
LH: loop header
LB: loop body
LE: loop exit
PB: predicated region body
PF: predicated region fallthrough
CT: control target
= control target key end

     0   :  { %vm771_vm0 = vcmask 7168   ;;  %s1587_s1 = inlined_call_operand.vmem [shape: bf16[512,1], index: 1, kind: input, shape index: {}]   ;;  %s1588_s0 = inlined_call_operand.vmem [shape: bf16[128,512], index: 0, kind: input, shape index: {}]   ;;  %s1589_s2 = inlined_call_operand.<no memory space> [shape: f32[1,1], index: 2, kind: input, shape index: {}]   ;;  %s1590_s3 = inlined_call_operand.<no memory space> [shape: f32[1,1], index: 3, kind: input, shape index: {}]   ;;  %s1591_s4 = inlined_call_operand.<no memory space> [shape: f32[1,1], index: 4, kind: input, shape index: {}]   ;;  %s1592_s5 = inlined_call_operand.<no memory space> [shape: f32[1,1], index: 5, kind: input, shape index: {}]   ;;  %s1593_s6 = inlined_call_operand.vmem [shape: f32[128,1], index: 6, kind: output, shape index: {}]  }
   0x1   :  { %v1087_v0 = vld [vmem:[%s1587_s1 + $0x38] sm:$0xff]  ;;  %v1086_v4 = vld [vmem:[%s1587_s1 + $0x30] sm:$0xff]  ;;  %v1085_v8 = vld [vmem:[%s1587_s1 + $0x28] sm:$0xff] }
   0x2   :  { %v1095_v1 = vld [vmem:[%s1587_s1 + $0x78] sm:$0xff]  ;;  %479 = vmatpush.bf16.msra.mxu0 %v1087_v0  ;;  %v1094_v5 = vld [vmem:[%s1587_s1 + $0x70] sm:$0xff]  ;;  %v1093_v9 = vld [vmem:[%s1587_s1 + $0x68] sm:$0xff] }
   0x3   :  { %v1103_v2 = vld [vmem:[%s1587_s1 + $0xb8] sm:$0xff]  ;;  %528 = vmatpush.bf16.msra.mxu1 %v1095_v1  ;;  %v1102_v6 = vld [vmem:[%s1587_s1 + $0xb0] sm:$0xff]  ;;  %v1101_v10 = vld [vmem:[%s1587_s1 + $0xa8] sm:$0xff] }
   0x4   :  { %v1111_v3 = vld [vmem:[%s1587_s1 + $0xf8] sm:$0xff]  ;;  %577 = vmatpush.bf16.msra.mxu2 %v1103_v2  ;;  %v1110_v7 = vld [vmem:[%s1587_s1 + $0xf0] sm:$0xff]  ;;  %v1109_v11 = vld [vmem:[%s1587_s1 + $0xe8] sm:$0xff] }
   0x5   :  { %626 = vmatpush.bf16.msra.mxu3 %v1111_v3  ;;  %v1084_v12 = vld [vmem:[%s1587_s1 + $0x20] sm:$0xff]  ;;  %v1083_v16 = vld [vmem:[%s1587_s1 + $0x18] sm:$0xff]  ;;  %v1082_v20 = vld [vmem:[%s1587_s1 + $0x10] sm:$0xff] }
   0x6   :  { %480 = vmatpush.bf16.msra.mxu0 %v1086_v4  ;;  %v1092_v13 = vld [vmem:[%s1587_s1 + $0x60] sm:$0xff]  ;;  %v1091_v17 = vld [vmem:[%s1587_s1 + $0x58] sm:$0xff]  ;;  %v1090_v21 = vld [vmem:[%s1587_s1 + $0x50] sm:$0xff] }
   0x7   :  { %529 = vmatpush.bf16.msra.mxu1 %v1094_v5  ;;  %v1100_v14 = vld [vmem:[%s1587_s1 + $0xa0] sm:$0xff]  ;;  %v1099_v18 = vld [vmem:[%s1587_s1 + $0x98] sm:$0xff]  ;;  %v1098_v22 = vld [vmem:[%s1587_s1 + $0x90] sm:$0xff] }
   0x8   :  { %578 = vmatpush.bf16.msra.mxu2 %v1102_v6  ;;  %v1108_v15 = vld [vmem:[%s1587_s1 + $0xe0] sm:$0xff]  ;;  %v1107_v19 = vld [vmem:[%s1587_s1 + $0xd8] sm:$0xff]  ;;  %v1106_v23 = vld [vmem:[%s1587_s1 + $0xd0] sm:$0xff] }
   0x9   :  { %627 = vmatpush.bf16.msra.mxu3 %v1110_v7  ;;  %v1081_v24 = vld [vmem:[%s1587_s1 + $0x8] sm:$0xff]  ;;  %v1080_v28 = vld [vmem:[%s1587_s1] sm:$0xff]  ;;  %v1050_v33 = vld [vmem:[%s1588_s0 + $0xc] sm:$0xf0] }
   0xa   :  { %481 = vmatpush.bf16.msra.mxu0 %v1085_v8  ;;  %v1089_v25 = vld [vmem:[%s1587_s1 + $0x48] sm:$0xff]  ;;  %v1088_v29 = vld [vmem:[%s1587_s1 + $0x40] sm:$0xff]  ;;  %v796_v35 = vld [vmem:[%s1588_s0 + $0x10] sm:$0xf0] }
   0xb   :  { %530 = vmatpush.bf16.msra.mxu1 %v1093_v9  ;;  %v1097_v26 = vld [vmem:[%s1587_s1 + $0x88] sm:$0xff]  ;;  %v1096_v30 = vld [vmem:[%s1587_s1 + $0x80] sm:$0xff]  ;;  %v1051_v37 = vld [vmem:[%s1588_s0 + $0x14] sm:$0xf0] }
   0xc   :  { %579 = vmatpush.bf16.msra.mxu2 %v1101_v10  ;;  %v1105_v27 = vld [vmem:[%s1587_s1 + $0xc8] sm:$0xff]  ;;  %v1104_v31 = vld [vmem:[%s1587_s1 + $0xc0] sm:$0xff]  ;;  %v804_v39 = vld [vmem:[%s1588_s0 + $0x18] sm:$0xf0] }
   0xd   :  { %628 = vmatpush.bf16.msra.mxu3 %v1109_v11  ;;  %v794_v32 = vld [vmem:[%s1588_s0] sm:$0xf]  ;;  %v1048_v34 = vld [vmem:[%s1588_s0 + $0x4] sm:$0xf]  ;;  %v802_v36 = vld [vmem:[%s1588_s0 + $0x8] sm:$0xf] }
   0xe   :  { %482 = vmatpush.bf16.msra.mxu0 %v1084_v12  ;;  %v1049_v38 = vld [vmem:[%s1588_s0 + $0xc] sm:$0xf]  ;;  %v795_v40 = vor.u32 %v1050_v33, %v794_v32  ;;  %v799_v41 = vor.u32 %v1048_v34, %v796_v35  ;;  %v803_v42 = vor.u32 %v1051_v37, %v802_v36  ;;  %v810_v44 = vld [vmem:[%s1588_s0 + $0x20] sm:$0xf]  ;;  %v1054_v45 = vld [vmem:[%s1588_s0 + $0x2c] sm:$0xf0] }
   0xf   :  { %531 = vmatpush.bf16.msra.mxu1 %v1092_v13  ;;  %v807_v43 = vor.u32 %v1049_v38, %v804_v39  ;;  %v1052_v46 = vld [vmem:[%s1588_s0 + $0x24] sm:$0xf]  ;;  %v812_v47 = vld [vmem:[%s1588_s0 + $0x30] sm:$0xf0]  ;;  %v818_v48 = vld [vmem:[%s1588_s0 + $0x28] sm:$0xf]  ;;  %v811_v52 = vor.u32 %v1054_v45, %v810_v44 }
  0x10   :  { %580 = vmatpush.bf16.msra.mxu2 %v1100_v14  ;;  %v1055_v49 = vld [vmem:[%s1588_s0 + $0x34] sm:$0xf0]  ;;  %v1053_v50 = vld [vmem:[%s1588_s0 + $0x2c] sm:$0xf]  ;;  %v820_v51 = vld [vmem:[%s1588_s0 + $0x38] sm:$0xf0]  ;;  %v815_v53 = vor.u32 %v1052_v46, %v812_v47 }
  0x11   :  { %629 = vmatpush.bf16.msra.mxu3 %v1108_v15  ;;  %v819_v54 = vor.u32 %v1055_v49, %v818_v48  ;;  %v823_v55 = vor.u32 %v1053_v50, %v820_v51  ;;  %v826_v56 = vld [vmem:[%s1588_s0 + $0x40] sm:$0xf]  ;;  %v1058_v57 = vld [vmem:[%s1588_s0 + $0x4c] sm:$0xf0]  ;;  %v1056_v58 = vld [vmem:[%s1588_s0 + $0x44] sm:$0xf] }
  0x12   :  { %483 = vmatpush.bf16.msra.mxu0 %v1083_v16  ;;  %v828_v59 = vld [vmem:[%s1588_s0 + $0x50] sm:$0xf0]  ;;  %v834_v60 = vld [vmem:[%s1588_s0 + $0x48] sm:$0xf]  ;;  %v1059_v61 = vld [vmem:[%s1588_s0 + $0x54] sm:$0xf0]  ;;  %v827_v0 = vor.u32 %v1058_v57, %v826_v56 }
  0x13   :  { %532 = vmatpush.bf16.msra.mxu1 %v1091_v17  ;;  %v1057_v62 = vld [vmem:[%s1588_s0 + $0x4c] sm:$0xf]  ;;  %v836_v63 = vld [vmem:[%s1588_s0 + $0x58] sm:$0xf0]  ;;  %v831_v1 = vor.u32 %v1056_v58, %v828_v59  ;;  %v835_v2 = vor.u32 %v1059_v61, %v834_v60  ;;  %v842_v4 = vld [vmem:[%s1588_s0 + $0x60] sm:$0xf] }
  0x14   :  { %581 = vmatpush.bf16.msra.mxu2 %v1099_v18  ;;  %v839_v3 = vor.u32 %v1057_v62, %v836_v63  ;;  %v1062_v5 = vld [vmem:[%s1588_s0 + $0x6c] sm:$0xf0]  ;;  %v1060_v6 = vld [vmem:[%s1588_s0 + $0x64] sm:$0xf]  ;;  %v844_v7 = vld [vmem:[%s1588_s0 + $0x70] sm:$0xf0] }
  0x15   :  { %630 = vmatpush.bf16.msra.mxu3 %v1107_v19  ;;  %v850_v8 = vld [vmem:[%s1588_s0 + $0x68] sm:$0xf]  ;;  %v1063_v9 = vld [vmem:[%s1588_s0 + $0x74] sm:$0xf0]  ;;  %v1061_v10 = vld [vmem:[%s1588_s0 + $0x6c] sm:$0xf]  ;;  %v843_v12 = vor.u32 %v1062_v5, %v842_v4  ;;  %v847_v13 = vor.u32 %v1060_v6, %v844_v7 }
  0x16   :  { %484 = vmatpush.bf16.msra.mxu0 %v1082_v20  ;;  %v852_v11 = vld [vmem:[%s1588_s0 + $0x78] sm:$0xf0]  ;;  %v851_v14 = vor.u32 %v1063_v9, %v850_v8  ;;  %v858_v16 = vld [vmem:[%s1588_s0 + $0x80] sm:$0xf]  ;;  %v1066_v17 = vld [vmem:[%s1588_s0 + $0x8c] sm:$0xf0] }
  0x17   :  { %533 = vmatpush.bf16.msra.mxu1 %v1090_v21  ;;  %v855_v15 = vor.u32 %v1061_v10, %v852_v11  ;;  %v1064_v18 = vld [vmem:[%s1588_s0 + $0x84] sm:$0xf]  ;;  %v860_v19 = vld [vmem:[%s1588_s0 + $0x90] sm:$0xf0]  ;;  %v866_v20 = vld [vmem:[%s1588_s0 + $0x88] sm:$0xf] }
  0x18   :  { %582 = vmatpush.bf16.msra.mxu2 %v1098_v22  ;;  %v1067_v21 = vld [vmem:[%s1588_s0 + $0x94] sm:$0xf0]  ;;  %v1065_v22 = vld [vmem:[%s1588_s0 + $0x8c] sm:$0xf]  ;;  %v882_v32 = vld [vmem:[%s1588_s0 + $0xa8] sm:$0xf] }
  0x19   :  { %631 = vmatpush.bf16.msra.mxu3 %v1106_v23  ;;  %v868_v23 = vld [vmem:[%s1588_s0 + $0x98] sm:$0xf0]  ;;  %v1071_v33 = vld [vmem:[%s1588_s0 + $0xb4] sm:$0xf0]  ;;  %v1069_v34 = vld [vmem:[%s1588_s0 + $0xac] sm:$0xf] }
  0x1a   :  { %485 = vmatpush.bf16.msra.mxu0 %v1081_v24  ;;  %v859_v24 = vor.u32 %v1066_v17, %v858_v16  ;;  %v884_v35 = vld [vmem:[%s1588_s0 + $0xb8] sm:$0xf0]  ;;  %v883_v38 = vor.u32 %v1071_v33, %v882_v32  ;;  %v898_v44 = vld [vmem:[%s1588_s0 + $0xc8] sm:$0xf]  ;;  %v1075_v45 = vld [vmem:[%s1588_s0 + $0xd4] sm:$0xf0] }
  0x1b   :  { %534 = vmatpush.bf16.msra.mxu1 %v1089_v25  ;;  %v863_v25 = vor.u32 %v1064_v18, %v860_v19  ;;  %v887_v39 = vor.u32 %v1069_v34, %v884_v35  ;;  %v1073_v46 = vld [vmem:[%s1588_s0 + $0xcc] sm:$0xf]  ;;  %v900_v47 = vld [vmem:[%s1588_s0 + $0xd8] sm:$0xf0]  ;;  %v899_v50 = vor.u32 %v1075_v45, %v898_v44  ;;  %v906_v56 = vld [vmem:[%s1588_s0 + $0xe0] sm:$0xf] }
  0x1c   :  { %583 = vmatpush.bf16.msra.mxu2 %v1097_v26  ;;  %v867_v26 = vor.u32 %v1067_v21, %v866_v20  ;;  %v903_v51 = vor.u32 %v1073_v46, %v900_v47  ;;  %v1078_v57 = vld [vmem:[%s1588_s0 + $0xec] sm:$0xf0]  ;;  %v1076_v58 = vld [vmem:[%s1588_s0 + $0xe4] sm:$0xf]  ;;  %v908_v59 = vld [vmem:[%s1588_s0 + $0xf0] sm:$0xf0] }
  0x1d   :  { %632 = vmatpush.bf16.msra.mxu3 %v1105_v27  ;;  %v871_v27 = vor.u32 %v1065_v22, %v868_v23  ;;  %v914_v60 = vld [vmem:[%s1588_s0 + $0xe8] sm:$0xf]  ;;  %v1079_v61 = vld [vmem:[%s1588_s0 + $0xf4] sm:$0xf0]  ;;  %v1077_v62 = vld [vmem:[%s1588_s0 + $0xec] sm:$0xf] }
  0x1e   :  { %486 = vmatpush.bf16.msra.mxu0 %v1080_v28  ;;  %v874_v28 = vld [vmem:[%s1588_s0 + $0xa0] sm:$0xf]  ;;  %v916_v63 = vld [vmem:[%s1588_s0 + $0xf8] sm:$0xf0] }
  0x1f   :  { %535 = vmatpush.bf16.msra.mxu1 %v1088_v29  ;;  %v1070_v29 = vld [vmem:[%s1588_s0 + $0xac] sm:$0xf0] }
  0x20   :  { %584 = vmatpush.bf16.msra.mxu2 %v1096_v30  ;;  %v1068_v30 = vld [vmem:[%s1588_s0 + $0xa4] sm:$0xf]  ;;  %v875_v36 = vor.u32 %v1070_v29, %v874_v28 }
  0x21   :  { %633 = vmatpush.bf16.msra.mxu3 %v1104_v31  ;;  %487 = vmatmul.bf16.vlgmr.msra.gmra.mxu0 %v795_v40  ;;  %v876_v31 = vld [vmem:[%s1588_s0 + $0xb0] sm:$0xf0]  ;;  %v890_v40 = vld [vmem:[%s1588_s0 + $0xc0] sm:$0xf] }
  0x22   :  { %536 = vmatmul.bf16.vlgmr.msra.gmra.mxu1 %v799_v41  ;;  %v879_v37 = vor.u32 %v1068_v30, %v876_v31  ;;  %v1074_v41 = vld [vmem:[%s1588_s0 + $0xcc] sm:$0xf0] }
  0x23   :  { %585 = vmatmul.bf16.vlgmr.msra.gmra.mxu2 %v803_v42  ;;  %v1072_v42 = vld [vmem:[%s1588_s0 + $0xc4] sm:$0xf]  ;;  %v891_v48 = vor.u32 %v1074_v41, %v890_v40 }
  0x24   :  { %634 = vmatmul.bf16.vlgmr.msra.gmra.mxu3 %v807_v43  ;;  %v892_v43 = vld [vmem:[%s1588_s0 + $0xd0] sm:$0xf0] }
  0x25   :  { %v895_v49 = vor.u32 %v1072_v42, %v892_v43 }
  0x31   :  { %492 = vmatmul.bf16.gmra.mxu0 %v811_v52  ;;  %v11_v52 = vstv %s1589_s2 }
  0x32   :  { %541 = vmatmul.bf16.gmra.mxu1 %v815_v53  ;;  %12 = vst [vmem:[#allocation2] sm:$0x1] %v11_v52  ;;  %v13_v53 = vstv %s1590_s3 }
  0x33   :  { %590 = vmatmul.bf16.gmra.mxu2 %v819_v54  ;;  %14 = vst [vmem:[#allocation3] sm:$0x1] %v13_v53  ;;  %v15_v54 = vstv %s1591_s4 }
  0x34   :  { %639 = vmatmul.bf16.gmra.mxu3 %v823_v55  ;;  %v17_v55 = vstv %s1592_s5  ;;  %16 = vst [vmem:[#allocation4] sm:$0x1] %v15_v54 }
  0x35   :  { %18 = vst [vmem:[#allocation5] sm:$0x1] %v17_v55 }
  0x39   :  { %v1451_v10 = vld [vmem:[#allocation2] ss:$0 sm:$0xff] }
  0x3b   :  { %v1457_v17 = vld [vmem:[#allocation4] ss:$0 sm:$0xff] }
  0x3c   :  { %v1459_v22 = vld [vmem:[#allocation5] ss:$0 sm:$0xff] }
  0x41   :  { %497 = vmatmul.bf16.gmra.mxu0 %v827_v0  ;;  %v907_v0 = vor.u32 %v1078_v57, %v906_v56 }
  0x42   :  { %546 = vmatmul.bf16.gmra.mxu1 %v831_v1  ;;  %v911_v1 = vor.u32 %v1076_v58, %v908_v59 }
  0x43   :  { %595 = vmatmul.bf16.gmra.mxu2 %v835_v2  ;;  %v915_v2 = vor.u32 %v1079_v61, %v914_v60 }
  0x44   :  { %644 = vmatmul.bf16.gmra.mxu3 %v839_v3  ;;  %v919_v3 = vor.u32 %v1077_v62, %v916_v63 }
  0x51   :  { %502 = vmatmul.bf16.gmra.mxu0 %v843_v12 }
  0x52   :  { %551 = vmatmul.bf16.gmra.mxu1 %v847_v13 }
  0x53   :  { %600 = vmatmul.bf16.gmra.mxu2 %v851_v14  ;;  %v1453_v14 = vld [vmem:[#allocation3] ss:$0 sm:$0xff] }
  0x54   :  { %649 = vmatmul.bf16.gmra.mxu3 %v855_v15 }
  0x61   :  { %507 = vmatmul.bf16.gmra.mxu0 %v859_v24 }
  0x62   :  { %556 = vmatmul.bf16.gmra.mxu1 %v863_v25 }
  0x63   :  { %605 = vmatmul.bf16.gmra.mxu2 %v867_v26 }
  0x64   :  { %654 = vmatmul.bf16.gmra.mxu3 %v871_v27 }
  0x71   :  { %512 = vmatmul.bf16.gmra.mxu0 %v875_v36 }
  0x72   :  { %561 = vmatmul.bf16.gmra.mxu1 %v879_v37 }
  0x73   :  { %610 = vmatmul.bf16.gmra.mxu2 %v883_v38 }
  0x74   :  { %659 = vmatmul.bf16.gmra.mxu3 %v887_v39 }
  0x81   :  { %517 = vmatmul.bf16.gmra.mxu0 %v891_v48 }
  0x82   :  { %566 = vmatmul.bf16.gmra.mxu1 %v895_v49 }
  0x83   :  { %615 = vmatmul.bf16.gmra.mxu2 %v899_v50 }
  0x84   :  { %664 = vmatmul.bf16.gmra.mxu3 %v903_v51 }
  0x91   :  { %522 = vmatmul.bf16.gmra.mxu0 %v907_v0 }
  0x92   :  { %571 = vmatmul.bf16.gmra.mxu1 %v911_v1 }
  0x93   :  { %620 = vmatmul.bf16.gmra.mxu2 %v915_v2 }
  0x94   :  { %669 = vmatmul.bf16.gmra.mxu3 %v919_v3 }
  0x9e   :  { %v488_v4 = vpop.f32.mrf.mxu0 }
  0x9f   :  { %v537_v5 = vpop.f32.mrf.mxu1 }
  0xa0   :  { %v538_v6 = vadd.f32 %v537_v5, %v488_v4 }
  0xa6   :  { %v586_v7 = vpop.f32.mrf.mxu2  ;;  %v490_v11 = vpop.f32.mrf.mxu0 }
  0xa7   :  { %v635_v8 = vpop.f32.mrf.mxu3  ;;  %v587_v9 = vadd.f32 %v586_v7, %v538_v6  ;;  %v539_v12 = vpop.f32.mrf.mxu1 }
  0xa8   :  { %v540_v18 = vadd.f32 %v539_v12, %v490_v11 }
  0xa9   :  { %v636_v13 = vadd.f32 %v635_v8, %v587_v9 }
  0xab   :  { %v679_v15 = vmul.f32 %v1451_v10, %v636_v13 }
  0xad   :  { %v699_v16 = vadd.f32 %v1453_v14, %v679_v15 }
  0xae   :  { %v588_v19 = vpop.f32.mrf.mxu2  ;;  %v493_v24 = vpop.f32.mrf.mxu0 }
  0xaf   :  { %v637_v20 = vpop.f32.mrf.mxu3  ;;  %v715_v21 = vmax.f32 %v699_v16, 0.0  ;;  %v589_v23 = vadd.f32 %v588_v19, %v540_v18  ;;  %v542_v25 = vpop.f32.mrf.mxu1 }
  0xb0   :  { %v543_v30 = vadd.f32 %v542_v25, %v493_v24 }
  0xb1   :  { %v735_v26 = vmul.f32 %v1457_v17, %v715_v21  ;;  %v638_v27 = vadd.f32 %v637_v20, %v589_v23 }
  0xb3   :  { %v755_v28 = vadd.f32 %v1459_v22, %v735_v26  ;;  %v680_v29 = vmul.f32 %v1451_v10, %v638_v27 }
  0xb5   :  { %772 = vst.msk [vmem:[%s1593_s6] sm:$0xff] %vm771_vm0, %v755_v28  ;;  %v700_v31 = vadd.f32 %v1453_v14, %v680_v29 }
  0xb6   :  { %v591_v32 = vpop.f32.mrf.mxu2  ;;  %v495_v36 = vpop.f32.mrf.mxu0 }
  0xb7   :  { %v640_v33 = vpop.f32.mrf.mxu3  ;;  %v716_v34 = vmax.f32 %v700_v31, 0.0  ;;  %v592_v35 = vadd.f32 %v591_v32, %v543_v30  ;;  %v544_v37 = vpop.f32.mrf.mxu1 }
  0xb8   :  { %v545_v43 = vadd.f32 %v544_v37, %v495_v36 }
  0xb9   :  { %v736_v38 = vmul.f32 %v1457_v17, %v716_v34  ;;  %v641_v39 = vadd.f32 %v640_v33, %v592_v35 }
  0xbb   :  { %v756_v40 = vadd.f32 %v1459_v22, %v736_v38  ;;  %v681_v41 = vmul.f32 %v1451_v10, %v641_v39 }
  0xbd   :  { %773 = vst.msk [vmem:[%s1593_s6 + $0x8] sm:$0xff] %vm771_vm0, %v756_v40  ;;  %v701_v42 = vadd.f32 %v1453_v14, %v681_v41 }
  0xbe   :  { %v593_v44 = vpop.f32.mrf.mxu2  ;;  %v498_v48 = vpop.f32.mrf.mxu0 }
  0xbf   :  { %v642_v45 = vpop.f32.mrf.mxu3  ;;  %v717_v46 = vmax.f32 %v701_v42, 0.0  ;;  %v594_v47 = vadd.f32 %v593_v44, %v545_v43  ;;  %v547_v49 = vpop.f32.mrf.mxu1 }
  0xc0   :  { %v548_v54 = vadd.f32 %v547_v49, %v498_v48 }
  0xc1   :  { %v737_v50 = vmul.f32 %v1457_v17, %v717_v46  ;;  %v643_v51 = vadd.f32 %v642_v45, %v594_v47 }
  0xc3   :  { %v757_v52 = vadd.f32 %v1459_v22, %v737_v50  ;;  %v682_v53 = vmul.f32 %v1451_v10, %v643_v51 }
  0xc5   :  { %774 = vst.msk [vmem:[%s1593_s6 + $0x10] sm:$0xff] %vm771_vm0, %v757_v52  ;;  %v702_v55 = vadd.f32 %v1453_v14, %v682_v53 }
  0xc6   :  { %v596_v56 = vpop.f32.mrf.mxu2  ;;  %v500_v60 = vpop.f32.mrf.mxu0 }
  0xc7   :  { %v645_v57 = vpop.f32.mrf.mxu3  ;;  %v718_v58 = vmax.f32 %v702_v55, 0.0  ;;  %v597_v59 = vadd.f32 %v596_v56, %v548_v54  ;;  %v549_v61 = vpop.f32.mrf.mxu1 }
  0xc8   :  { %v550_v3 = vadd.f32 %v549_v61, %v500_v60 }
  0xc9   :  { %v738_v62 = vmul.f32 %v1457_v17, %v718_v58  ;;  %v646_v63 = vadd.f32 %v645_v57, %v597_v59 }
  0xcb   :  { %v758_v0 = vadd.f32 %v1459_v22, %v738_v62  ;;  %v683_v1 = vmul.f32 %v1451_v10, %v646_v63 }
  0xcd   :  { %775 = vst.msk [vmem:[%s1593_s6 + $0x18] sm:$0xff] %vm771_vm0, %v758_v0  ;;  %v703_v2 = vadd.f32 %v1453_v14, %v683_v1 }
  0xce   :  { %v598_v4 = vpop.f32.mrf.mxu2  ;;  %v503_v8 = vpop.f32.mrf.mxu0 }
  0xcf   :  { %v647_v5 = vpop.f32.mrf.mxu3  ;;  %v719_v6 = vmax.f32 %v703_v2, 0.0  ;;  %v599_v7 = vadd.f32 %v598_v4, %v550_v3  ;;  %v552_v9 = vpop.f32.mrf.mxu1 }
  0xd0   :  { %v553_v16 = vadd.f32 %v552_v9, %v503_v8 }
  0xd1   :  { %v739_v11 = vmul.f32 %v1457_v17, %v719_v6  ;;  %v648_v12 = vadd.f32 %v647_v5, %v599_v7 }
  0xd3   :  { %v759_v13 = vadd.f32 %v1459_v22, %v739_v11  ;;  %v684_v15 = vmul.f32 %v1451_v10, %v648_v12 }
  0xd5   :  { %776 = vst.msk [vmem:[%s1593_s6 + $0x20] sm:$0xff] %vm771_vm0, %v759_v13  ;;  %v704_v18 = vadd.f32 %v1453_v14, %v684_v15 }
  0xd6   :  { %v601_v19 = vpop.f32.mrf.mxu2  ;;  %v505_v24 = vpop.f32.mrf.mxu0 }
  0xd7   :  { %v650_v20 = vpop.f32.mrf.mxu3  ;;  %v720_v21 = vmax.f32 %v704_v18, 0.0  ;;  %v602_v23 = vadd.f32 %v601_v19, %v553_v16  ;;  %v554_v25 = vpop.f32.mrf.mxu1 }
  0xd8   :  { %v555_v31 = vadd.f32 %v554_v25, %v505_v24 }
  0xd9   :  { %v740_v26 = vmul.f32 %v1457_v17, %v720_v21  ;;  %v651_v27 = vadd.f32 %v650_v20, %v602_v23 }
  0xdb   :  { %v760_v28 = vadd.f32 %v1459_v22, %v740_v26  ;;  %v685_v29 = vmul.f32 %v1451_v10, %v651_v27 }
  0xdd   :  { %777 = vst.msk [vmem:[%s1593_s6 + $0x28] sm:$0xff] %vm771_vm0, %v760_v28  ;;  %v705_v30 = vadd.f32 %v1453_v14, %v685_v29 }
  0xde   :  { %v603_v32 = vpop.f32.mrf.mxu2  ;;  %v508_v36 = vpop.f32.mrf.mxu0 }
  0xdf   :  { %v652_v33 = vpop.f32.mrf.mxu3  ;;  %v721_v34 = vmax.f32 %v705_v30, 0.0  ;;  %v604_v35 = vadd.f32 %v603_v32, %v555_v31  ;;  %v557_v37 = vpop.f32.mrf.mxu1 }
  0xe0   :  { %v558_v42 = vadd.f32 %v557_v37, %v508_v36 }
  0xe1   :  { %v741_v38 = vmul.f32 %v1457_v17, %v721_v34  ;;  %v653_v39 = vadd.f32 %v652_v33, %v604_v35 }
  0xe3   :  { %v761_v40 = vadd.f32 %v1459_v22, %v741_v38  ;;  %v686_v41 = vmul.f32 %v1451_v10, %v653_v39 }
  0xe5   :  { %778 = vst.msk [vmem:[%s1593_s6 + $0x30] sm:$0xff] %vm771_vm0, %v761_v40  ;;  %v706_v43 = vadd.f32 %v1453_v14, %v686_v41 }
  0xe6   :  { %v606_v44 = vpop.f32.mrf.mxu2  ;;  %v510_v48 = vpop.f32.mrf.mxu0 }
  0xe7   :  { %v655_v45 = vpop.f32.mrf.mxu3  ;;  %v722_v46 = vmax.f32 %v706_v43, 0.0  ;;  %v607_v47 = vadd.f32 %v606_v44, %v558_v42  ;;  %v559_v49 = vpop.f32.mrf.mxu1 }
  0xe8   :  { %v560_v55 = vadd.f32 %v559_v49, %v510_v48 }
  0xe9   :  { %v742_v50 = vmul.f32 %v1457_v17, %v722_v46  ;;  %v656_v51 = vadd.f32 %v655_v45, %v607_v47 }
  0xeb   :  { %v762_v52 = vadd.f32 %v1459_v22, %v742_v50  ;;  %v687_v53 = vmul.f32 %v1451_v10, %v656_v51 }
  0xed   :  { %779 = vst.msk [vmem:[%s1593_s6 + $0x38] sm:$0xff] %vm771_vm0, %v762_v52  ;;  %v707_v54 = vadd.f32 %v1453_v14, %v687_v53 }
  0xee   :  { %v608_v56 = vpop.f32.mrf.mxu2  ;;  %v513_v60 = vpop.f32.mrf.mxu0 }
  0xef   :  { %v657_v57 = vpop.f32.mrf.mxu3  ;;  %v723_v58 = vmax.f32 %v707_v54, 0.0  ;;  %v609_v59 = vadd.f32 %v608_v56, %v560_v55  ;;  %v562_v61 = vpop.f32.mrf.mxu1 }
  0xf0   :  { %v563_v2 = vadd.f32 %v562_v61, %v513_v60 }
  0xf1   :  { %v743_v62 = vmul.f32 %v1457_v17, %v723_v58  ;;  %v658_v63 = vadd.f32 %v657_v57, %v609_v59 }
  0xf3   :  { %v763_v0 = vadd.f32 %v1459_v22, %v743_v62  ;;  %v688_v1 = vmul.f32 %v1451_v10, %v658_v63 }
  0xf5   :  { %780 = vst.msk [vmem:[%s1593_s6 + $0x40] sm:$0xff] %vm771_vm0, %v763_v0  ;;  %v708_v3 = vadd.f32 %v1453_v14, %v688_v1 }
  0xf6   :  { %v611_v4 = vpop.f32.mrf.mxu2  ;;  %v515_v8 = vpop.f32.mrf.mxu0 }
  0xf7   :  { %v660_v5 = vpop.f32.mrf.mxu3  ;;  %v724_v6 = vmax.f32 %v708_v3, 0.0  ;;  %v612_v7 = vadd.f32 %v611_v4, %v563_v2  ;;  %v564_v9 = vpop.f32.mrf.mxu1 }
  0xf8   :  { %v565_v18 = vadd.f32 %v564_v9, %v515_v8 }
  0xf9   :  { %v744_v11 = vmul.f32 %v1457_v17, %v724_v6  ;;  %v661_v12 = vadd.f32 %v660_v5, %v612_v7 }
  0xfb   :  { %v764_v13 = vadd.f32 %v1459_v22, %v744_v11  ;;  %v689_v15 = vmul.f32 %v1451_v10, %v661_v12 }
  0xfd   :  { %781 = vst.msk [vmem:[%s1593_s6 + $0x48] sm:$0xff] %vm771_vm0, %v764_v13  ;;  %v709_v16 = vadd.f32 %v1453_v14, %v689_v15 }
  0xfe   :  { %v613_v19 = vpop.f32.mrf.mxu2  ;;  %v518_v24 = vpop.f32.mrf.mxu0 }
  0xff   :  { %v662_v20 = vpop.f32.mrf.mxu3  ;;  %v725_v21 = vmax.f32 %v709_v16, 0.0  ;;  %v614_v23 = vadd.f32 %v613_v19, %v565_v18  ;;  %v567_v25 = vpop.f32.mrf.mxu1 }
 0x100   :  { %v568_v30 = vadd.f32 %v567_v25, %v518_v24 }
 0x101   :  { %v745_v26 = vmul.f32 %v1457_v17, %v725_v21  ;;  %v663_v27 = vadd.f32 %v662_v20, %v614_v23 }
 0x103   :  { %v765_v28 = vadd.f32 %v1459_v22, %v745_v26  ;;  %v690_v29 = vmul.f32 %v1451_v10, %v663_v27 }
 0x105   :  { %782 = vst.msk [vmem:[%s1593_s6 + $0x50] sm:$0xff] %vm771_vm0, %v765_v28  ;;  %v710_v31 = vadd.f32 %v1453_v14, %v690_v29 }
 0x106   :  { %v616_v32 = vpop.f32.mrf.mxu2  ;;  %v520_v36 = vpop.f32.mrf.mxu0 }
 0x107   :  { %v665_v33 = vpop.f32.mrf.mxu3  ;;  %v726_v34 = vmax.f32 %v710_v31, 0.0  ;;  %v617_v35 = vadd.f32 %v616_v32, %v568_v30  ;;  %v569_v37 = vpop.f32.mrf.mxu1 }
 0x108   :  { %v570_v43 = vadd.f32 %v569_v37, %v520_v36 }
 0x109   :  { %v746_v38 = vmul.f32 %v1457_v17, %v726_v34  ;;  %v666_v39 = vadd.f32 %v665_v33, %v617_v35 }
 0x10b   :  { %v766_v40 = vadd.f32 %v1459_v22, %v746_v38  ;;  %v691_v41 = vmul.f32 %v1451_v10, %v666_v39 }
 0x10d   :  { %783 = vst.msk [vmem:[%s1593_s6 + $0x58] sm:$0xff] %vm771_vm0, %v766_v40  ;;  %v711_v42 = vadd.f32 %v1453_v14, %v691_v41 }
 0x10e   :  { %v618_v44 = vpop.f32.mrf.mxu2  ;;  %v523_v48 = vpop.f32.mrf.mxu0 }
 0x10f   :  { %v667_v45 = vpop.f32.mrf.mxu3  ;;  %v727_v46 = vmax.f32 %v711_v42, 0.0  ;;  %v619_v47 = vadd.f32 %v618_v44, %v570_v43  ;;  %v572_v49 = vpop.f32.mrf.mxu1 }
 0x110   :  { %v573_v54 = vadd.f32 %v572_v49, %v523_v48 }
 0x111   :  { %v747_v50 = vmul.f32 %v1457_v17, %v727_v46  ;;  %v668_v51 = vadd.f32 %v667_v45, %v619_v47 }
 0x113   :  { %v767_v52 = vadd.f32 %v1459_v22, %v747_v50  ;;  %v692_v53 = vmul.f32 %v1451_v10, %v668_v51 }
 0x115   :  { %784 = vst.msk [vmem:[%s1593_s6 + $0x60] sm:$0xff] %vm771_vm0, %v767_v52  ;;  %v712_v55 = vadd.f32 %v1453_v14, %v692_v53 }
 0x116   :  { %v621_v56 = vpop.f32.mrf.mxu2  ;;  %v525_v62 = vpop.f32.mrf.mxu0 }
 0x117   :  { %v670_v57 = vpop.f32.mrf.mxu3  ;;  %v728_v58 = vmax.f32 %v712_v55, 0.0  ;;  %v622_v59 = vadd.f32 %v621_v56, %v573_v54  ;;  %v574_v63 = vpop.f32.mrf.mxu1 }
 0x118   :  { %v575_v3 = vadd.f32 %v574_v63, %v525_v62 }
 0x119   :  { %v748_v60 = vmul.f32 %v1457_v17, %v728_v58  ;;  %v671_v61 = vadd.f32 %v670_v57, %v622_v59 }
 0x11b   :  { %v768_v0 = vadd.f32 %v1459_v22, %v748_v60  ;;  %v693_v1 = vmul.f32 %v1451_v10, %v671_v61 }
 0x11d   :  { %785 = vst.msk [vmem:[%s1593_s6 + $0x68] sm:$0xff] %vm771_vm0, %v768_v0  ;;  %v713_v2 = vadd.f32 %v1453_v14, %v693_v1 }
 0x11e   :  { %v623_v4 = vpop.f32.mrf.mxu2 }
 0x11f   :  { %v729_v5 = vmax.f32 %v713_v2, 0.0  ;;  %v624_v6 = vadd.f32 %v623_v4, %v575_v3  ;;  %v672_v7 = vpop.f32.mrf.mxu3 }
 0x121   :  { %v749_v8 = vmul.f32 %v1457_v17, %v729_v5  ;;  %v673_v9 = vadd.f32 %v672_v7, %v624_v6 }
 0x123   :  { %v769_v11 = vadd.f32 %v1459_v22, %v749_v8  ;;  %v694_v12 = vmul.f32 %v1451_v10, %v673_v9 }
 0x125   :  { %786 = vst.msk [vmem:[%s1593_s6 + $0x70] sm:$0xff] %vm771_vm0, %v769_v11  ;;  %v714_v13 = vadd.f32 %v1453_v14, %v694_v12 }
 0x127   :  { %v730_v15 = vmax.f32 %v714_v13, 0.0 }
 0x129   :  { %v750_v16 = vmul.f32 %v1457_v17, %v730_v15 }
 0x12b   :  { %v770_v18 = vadd.f32 %v1459_v22, %v750_v16 }
 0x12d   :  { %787 = vst.msk [vmem:[%s1593_s6 + $0x78] sm:$0xff] %vm771_vm0, %v770_v18 }

</bundles_post_ra>
